<compile_context>
chip_gen: v5e
topology: v5e:2x2
jax: 0.10.0
libtpu: 0.0.40
codegen_flags: <defaults>
</compile_context>

<pallas_src>
import math

import jax
import jax.numpy as jnp
from jax.experimental import pallas as pl
from jax.experimental.pallas import tpu as pltpu


# ----------------------------- Pallas kernel --------------------------------

def _layernorm(x, gamma, beta, eps=1e-5):
    mean = jnp.mean(x, axis=-1, keepdims=True)
    var = jnp.mean((x - mean) ** 2, axis=-1, keepdims=True)
    return (x - mean) * jax.lax.rsqrt(var + eps) * gamma + beta


def tenet_kernel(seqs_ref,                     # (3, TB, L, F) bf16: item|pos|neg
                 ul_ref,                       # (TB, 1, F)    bf16: user + list
                 mask_ref,                     # (TB, L)       f32
                 posc_ref,                     # (2, L, F)     f32: pos_emb | PE
                 wqkv_ref, bqkv_ref,           # (F, 3F) bf16 / (1, 3F) f32
                 wstack_ref,                   # (3, F, F) bf16: Wo | W1 | W2
                 vecs_ref,                     # (8, F) f32: bo,ln1g,ln1b,b1,b2,ln2g,ln2b,pad
                 out_ref):                     # (1, 2, TB*L) f32
    _, TB, L, F = seqs_ref.shape
    M = TB * L
    f32 = jnp.float32
    bf16 = jnp.bfloat16
    scale = jnp.float32(math.sqrt(F))
    inv_scale = jnp.float32(1.0 / math.sqrt(F))

    vecs = vecs_ref[...]                                   # one padded vreg
    bo, ln1g, ln1b, b1, b2, ln2g, ln2b = [vecs[i:i + 1] for i in range(7)]

    ul = ul_ref[...].astype(f32)                           # (TB, 1, F)
    m3 = mask_ref[...][:, :, None]                         # (TB, L, 1)
    posemb = posc_ref[0]                                   # (L, F)
    pe = posc_ref[1]                                       # (L, F)

    # --- embedding mix: item + (user+list) + pos, masked (VPU f32) ----------
    item3 = seqs_ref[0].astype(f32)                        # (TB, L, F)
    x3 = (item3 + ul + posemb[None]) * m3
    src3 = x3 * scale + pe[None]                           # (TB, L, F)
    src = src3.reshape(M, F)                               # flat rows for matmuls

    # --- fused QKV projection: single (M, F) x (F, 3F) MXU launch -----------
    qkv = jnp.dot(src.astype(bf16), wqkv_ref[...],
                  preferred_element_type=f32) + bqkv_ref[...]        # (M, 3F)
    q3 = qkv[:, :F].reshape(TB, L, F)
    k3 = qkv[:, F:2 * F].reshape(TB, L, F)
    v3 = qkv[:, 2 * F:].reshape(TB, L, F)

    # --- causal (square-subsequent) additive mask, generated in-kernel ------
    rows = jax.lax.broadcasted_iota(jnp.int32, (L, L), 0)
    cols = jax.lax.broadcasted_iota(jnp.int32, (L, L), 1)
    causal = jnp.where(rows >= cols, 0.0, -1e9).astype(f32)          # (L, L)

    # --- single-head self-attention, batched over the TB sequences ----------
    scores = jnp.einsum("bqd,bkd->bqk", q3.astype(bf16), k3.astype(bf16),
                        preferred_element_type=f32) * inv_scale      # (TB, L, L)
    scores = scores + causal[None]
    smax = jnp.max(scores, axis=-1, keepdims=True)
    p = jnp.exp(scores - smax)
    p = p * pl.reciprocal(jnp.sum(p, axis=-1, keepdims=True), approx=True)
    attn3 = jnp.einsum("bqk,bkd->bqd", p.astype(bf16), v3.astype(bf16),
                       preferred_element_type=f32)                   # (TB, L, F)
    attn = jnp.dot(attn3.reshape(M, F).astype(bf16), wstack_ref[0],
                   preferred_element_type=f32) + bo                  # (M, F)

    # --- post-LN transformer encoder layer (LN / FFN math in f32) -----------
    x1 = _layernorm(src + attn, ln1g, ln1b)
    ff = jnp.dot(x1.astype(bf16), wstack_ref[1],
                 preferred_element_type=f32) + b1
    ff = jnp.maximum(ff, 0.0)
    ff = jnp.dot(ff.astype(bf16), wstack_ref[2],
                 preferred_element_type=f32) + b2
    seq_out = _layernorm(x1 + ff, ln2g, ln2b)                        # (M, F)

    # --- flag == 2 logits: fused pos/neg epilogue, lane-dense store ----------
    base = (seq_out.reshape(TB, L, F) + ul).reshape(M, F)
    pos_flat = seqs_ref[1].astype(f32).reshape(M, F)
    neg_flat = seqs_ref[2].astype(f32).reshape(M, F)
    tp = jnp.sum(base * pos_flat, axis=-1)                           # (M,)
    tn = jnp.sum(base * neg_flat, axis=-1)                           # (M,)
    logits = jnp.concatenate([tp.reshape(1, M), tn.reshape(1, M)], axis=0)
    out_ref[0] = jax.nn.sigmoid(logits)                              # (2, M)


# ------------------------------- wrapper -------------------------------------

def tenet_seq_forward(params, user_indices, list_indices,
                      item_seq, item_seq_pos, item_seq_neg, *, seq_tile=16):
    B, L = item_seq.shape
    F = params["item_emb"].shape[1]
    TB = min(seq_tile, B)
    assert B % TB == 0, "batch must be divisible by the batch tile"
    M = TB * L
    bf16 = jnp.bfloat16

    # Glue: embedding gathers / masks (plain JAX). Activation streams enter the
    # kernel as bf16 to halve HBM->VMEM bytes; accumulation stays f32 in-kernel.
    item_tab = params["item_emb"].astype(bf16)
    idx = jnp.stack([item_seq, item_seq_pos, item_seq_neg], axis=0)      # (3, B, L)
    seqs = item_tab[idx]                                                 # (3, B, L, F)
    ul = (params["user_emb"][user_indices]
          + params["list_emb"][list_indices])[:, None, :].astype(bf16)  # (B, 1, F)
    mask = (item_seq != 0).astype(jnp.float32)                          # (B, L)
    is_target = (item_seq_pos != 0).astype(jnp.float32)                 # (B, L)

    # Fused / stacked weights: one (F, 3F) QKV matmul, one (3, F, F) weight DMA,
    # one (8, F) vreg of bias / LayerNorm vectors, one (2, L, F) positional block.
    wqkv = jnp.concatenate([params["wq"], params["wk"], params["wv"]],
                           axis=1).astype(bf16)                          # (F, 3F)
    bqkv = jnp.concatenate([params["bq"], params["bk"], params["bv"]], axis=1)
    wstack = jnp.stack([params["wo"], params["w1"], params["w2"]],
                       axis=0).astype(bf16)                              # (3, F, F)
    vecs = jnp.concatenate([params["bo"], params["ln1_g"], params["ln1_b"],
                            params["b1"], params["b2"],
                            params["ln2_g"], params["ln2_b"],
                            jnp.zeros((1, F), jnp.float32)], axis=0)     # (8, F)
    posc = jnp.stack([params["pos_emb"], params["pe"]], axis=0)          # (2, L, F)

    per_seq = lambda i: (0, i, 0, 0)
    per_b3 = lambda i: (i, 0, 0)
    per_b2 = lambda i: (i, 0)
    full2 = lambda i: (0, 0)
    full3 = lambda i: (0, 0, 0)

    grid_spec = pltpu.PrefetchScalarGridSpec(
        num_scalar_prefetch=0,
        grid=(B // TB,),
        in_specs=[
            pl.BlockSpec((3, TB, L, F), per_seq),   # item|pos|neg embeddings
            pl.BlockSpec((TB, 1, F), per_b3),       # user + list embeddings
            pl.BlockSpec((TB, L), per_b2),          # padding mask (lane-aligned)
            pl.BlockSpec((2, L, F), full3),         # pos_emb | sinusoidal PE
            pl.BlockSpec((F, 3 * F), full2),        # Wqkv (fused)
            pl.BlockSpec((1, 3 * F), full2),        # bqkv (fused)
            pl.BlockSpec((3, F, F), full3),         # Wo | W1 | W2
            pl.BlockSpec((8, F), full2),            # bo, LN1 g/b, b1, b2, LN2 g/b
        ],
        out_specs=pl.BlockSpec((1, 2, M), per_b3),  # lane-dense (2, TB*L) block
    )

    out = pl.pallas_call(
        tenet_kernel,
        out_shape=jax.ShapeDtypeStruct((B // TB, 2, M), jnp.float32),
        grid_spec=grid_spec,
        compiler_params=pltpu.CompilerParams(
            dimension_semantics=("parallel",),
            vmem_limit_bytes=32 * 1024 * 1024,
        ),
    )(seqs, ul, mask, posc, wqkv, bqkv, wstack, vecs)

    out = out.reshape(B // TB, 2, TB, L)
    pos_logits = out[:, 0].reshape(B, L)
    neg_logits = out[:, 1].reshape(B, L)
    return pos_logits, neg_logits, is_target


# --------------------------- pure-JAX reference ------------------------------

def tenet_seq_reference(params, user_indices, list_indices,
                        item_seq, item_seq_pos, item_seq_neg):
    B, L = item_seq.shape
    F = params["item_emb"].shape[1]

    item_e = params["item_emb"][item_seq]
    pos_e = params["item_emb"][item_seq_pos]
    neg_e = params["item_emb"][item_seq_neg]
    user_e = params["user_emb"][user_indices][:, None, :]
    list_e = params["list_emb"][list_indices][:, None, :]
    mask = (item_seq != 0).astype(jnp.float32)[:, :, None]
    is_target = (item_seq_pos != 0).astype(jnp.float32)

    x = (item_e + user_e + list_e + params["pos_emb"][None]) * mask
    src = x * math.sqrt(F) + params["pe"][None]

    q = src @ params["wq"] + params["bq"]
    k = src @ params["wk"] + params["bk"]
    v = src @ params["wv"] + params["bv"]
    causal = jnp.where(jnp.arange(L)[:, None] >= jnp.arange(L)[None, :], 0.0, -1e9)
    scores = jnp.einsum("bqd,bkd->bqk", q, k) / math.sqrt(F) + causal[None]
    p = jax.nn.softmax(scores, axis=-1)
    attn = jnp.einsum("bqk,bkd->bqd", p, v) @ params["wo"] + params["bo"]

    def ln(y, g, b, eps=1e-5):
        mu = y.mean(-1, keepdims=True)
        var = ((y - mu) ** 2).mean(-1, keepdims=True)
        return (y - mu) / jnp.sqrt(var + eps) * g + b

    x1 = ln(src + attn, params["ln1_g"], params["ln1_b"])
    ff = jnp.maximum(x1 @ params["w1"] + params["b1"], 0.0) @ params["w2"] + params["b2"]
    seq_out = ln(x1 + ff, params["ln2_g"], params["ln2_b"])

    base = seq_out + user_e + list_e
    pos_logits = jax.nn.sigmoid(jnp.sum(base * pos_e, axis=-1))
    neg_logits = jax.nn.sigmoid(jnp.sum(base * neg_e, axis=-1))
    return pos_logits, neg_logits, is_target


# --------------------------------- main --------------------------------------

def _sinusoidal_pe(L, F):
    pos = jnp.arange(L, dtype=jnp.float32)[:, None]
    div = jnp.exp(jnp.arange(0, F, 2, dtype=jnp.float32) * (-math.log(10000.0) / F))
    pe = jnp.zeros((L, F), jnp.float32)
    pe = pe.at[:, 0::2].set(jnp.sin(pos * div))
    pe = pe.at[:, 1::2].set(jnp.cos(pos * div))
    return pe


if __name__ == "__main__":
    # Small synthetic config (params.*): num_user=10, num_list=10, num_item=20,
    # num_factors=32, max_item_seq_length=8; batch=32 (two batch-tiles of 16 ->
    # flattened matmul rows = 128, grid length 2 for v7x's two TensorCores).
    NUM_USER, NUM_LIST, NUM_ITEM = 10, 10, 20
    F, L, B = 32, 8, 32

    key = jax.random.PRNGKey(0)
    ks = jax.random.split(key, 24)

    def emb(k, n, d, zero_row0=True):
        w = 0.1 * jax.random.normal(k, (n, d), jnp.float32)
        return w.at[0].set(0.0) if zero_row0 else w

    params = {
        "user_emb": emb(ks[0], NUM_USER, F),
        "list_emb": emb(ks[1], NUM_LIST, F),
        "item_emb": emb(ks[2], NUM_ITEM, F),
        "pos_emb": 0.1 * jax.random.normal(ks[3], (L, F), jnp.float32),
        "pe": _sinusoidal_pe(L, F),
        "wq": 0.1 * jax.random.normal(ks[4], (F, F), jnp.float32),
        "bq": 0.01 * jax.random.normal(ks[5], (1, F), jnp.float32),
        "wk": 0.1 * jax.random.normal(ks[6], (F, F), jnp.float32),
        "bk": 0.01 * jax.random.normal(ks[7], (1, F), jnp.float32),
        "wv": 0.1 * jax.random.normal(ks[8], (F, F), jnp.float32),
        "bv": 0.01 * jax.random.normal(ks[9], (1, F), jnp.float32),
        "wo": 0.1 * jax.random.normal(ks[10], (F, F), jnp.float32),
        "bo": 0.01 * jax.random.normal(ks[11], (1, F), jnp.float32),
        "ln1_g": jnp.ones((1, F), jnp.float32),
        "ln1_b": jnp.zeros((1, F), jnp.float32),
        "w1": 0.1 * jax.random.normal(ks[12], (F, F), jnp.float32),
        "b1": 0.01 * jax.random.normal(ks[13], (1, F), jnp.float32),
        "w2": 0.1 * jax.random.normal(ks[14], (F, F), jnp.float32),
        "b2": 0.01 * jax.random.normal(ks[15], (1, F), jnp.float32),
        "ln2_g": jnp.ones((1, F), jnp.float32),
        "ln2_b": jnp.zeros((1, F), jnp.float32),
    }

    user_indices = jax.random.randint(ks[16], (B,), 1, NUM_USER, jnp.int32)
    list_indices = jax.random.randint(ks[17], (B,), 1, NUM_LIST, jnp.int32)
    item_seq = jax.random.randint(ks[18], (B, L), 0, NUM_ITEM, jnp.int32)      # 0 = pad
    item_seq_pos = jax.random.randint(ks[19], (B, L), 0, NUM_ITEM, jnp.int32)  # 0 = pad
    item_seq_neg = jax.random.randint(ks[20], (B, L), 1, NUM_ITEM, jnp.int32)

    pos_logits, neg_logits, is_target = jax.jit(tenet_seq_forward)(
        params, user_indices, list_indices, item_seq, item_seq_pos, item_seq_neg)
    jax.block_until_ready((pos_logits, neg_logits, is_target))

    # Sanity check against a pure-f32 JAX reference. The kernel feeds bf16
    # embedding streams / weights into f32-accumulated matmuls, so compare
    # with a bf16-appropriate tolerance.
    ref_pos, ref_neg, ref_tgt = tenet_seq_reference(
        params, user_indices, list_indices, item_seq, item_seq_pos, item_seq_neg)
    assert pos_logits.shape == (B, L) and neg_logits.shape == (B, L)
    assert jnp.allclose(pos_logits, ref_pos, atol=2e-2, rtol=2e-2)
    assert jnp.allclose(neg_logits, ref_neg, atol=2e-2, rtol=2e-2)
    assert jnp.array_equal(is_target, ref_tgt)

    print("KERNEL_OK")
</pallas_src>

<mosaic_0001>
module attributes {stable_mosaic.version = 11 : i64} {
  func.func @tenet_kernel(%arg0: i32, %arg1: memref<3x16x8x32xbf16, #tpu.memory_space<vmem>>, %arg2: memref<16x1x32xbf16, #tpu.memory_space<vmem>>, %arg3: memref<16x8xf32, #tpu.memory_space<vmem>>, %arg4: memref<2x8x32xf32, #tpu.memory_space<vmem>>, %arg5: memref<32x96xbf16, #tpu.memory_space<vmem>>, %arg6: memref<1x96xf32, #tpu.memory_space<vmem>>, %arg7: memref<3x32x32xbf16, #tpu.memory_space<vmem>>, %arg8: memref<8x32xf32, #tpu.memory_space<vmem>>, %arg9: memref<1x2x128xf32, #tpu.memory_space<vmem>>) attributes {dimension_semantics = [#tpu.dimension_semantics<parallel>], iteration_bounds = array<i64: 2>, scalar_prefetch = 0 : i64, scratch_operands = 0 : i64, tpu.core_type = #tpu.core_type<tc>, window_params = [{transform_indices = @transform_0, window_bounds = array<i64: 3, 16, 8, 32>}, {transform_indices = @transform_1, window_bounds = array<i64: 16, 1, 32>}, {transform_indices = @transform_2, window_bounds = array<i64: 16, 8>}, {pipeline_mode = #tpu.pipeline_mode<synchronous>, transform_indices = @transform_3, window_bounds = array<i64: 2, 8, 32>}, {pipeline_mode = #tpu.pipeline_mode<synchronous>, transform_indices = @transform_4, window_bounds = array<i64: 32, 96>}, {pipeline_mode = #tpu.pipeline_mode<synchronous>, transform_indices = @transform_5, window_bounds = array<i64: 1, 96>}, {pipeline_mode = #tpu.pipeline_mode<synchronous>, transform_indices = @transform_6, window_bounds = array<i64: 3, 32, 32>}, {pipeline_mode = #tpu.pipeline_mode<synchronous>, transform_indices = @transform_7, window_bounds = array<i64: 8, 32>}, {transform_indices = @transform_8, window_bounds = array<i64: 1, 2, 128>}]} {
    %c0 = arith.constant 0 : index
    %c0_0 = arith.constant 0 : index
    %0 = vector.load %arg8[%c0, %c0_0] : memref<8x32xf32, #tpu.memory_space<vmem>>, vector<8x32xf32>
    %1 = vector.extract_strided_slice %0 {offsets = [0, 0], sizes = [1, 32], strides = [1, 1]} : vector<8x32xf32> to vector<1x32xf32>
    %2 = vector.extract_strided_slice %0 {offsets = [1, 0], sizes = [1, 32], strides = [1, 1]} : vector<8x32xf32> to vector<1x32xf32>
    %3 = vector.extract_strided_slice %0 {offsets = [2, 0], sizes = [1, 32], strides = [1, 1]} : vector<8x32xf32> to vector<1x32xf32>
    %4 = vector.extract_strided_slice %0 {offsets = [3, 0], sizes = [1, 32], strides = [1, 1]} : vector<8x32xf32> to vector<1x32xf32>
    %5 = vector.extract_strided_slice %0 {offsets = [4, 0], sizes = [1, 32], strides = [1, 1]} : vector<8x32xf32> to vector<1x32xf32>
    %6 = vector.extract_strided_slice %0 {offsets = [5, 0], sizes = [1, 32], strides = [1, 1]} : vector<8x32xf32> to vector<1x32xf32>
    %7 = vector.extract_strided_slice %0 {offsets = [6, 0], sizes = [1, 32], strides = [1, 1]} : vector<8x32xf32> to vector<1x32xf32>
    %c0_1 = arith.constant 0 : index
    %c0_2 = arith.constant 0 : index
    %c0_3 = arith.constant 0 : index
    %8 = vector.load %arg2[%c0_1, %c0_2, %c0_3] : memref<16x1x32xbf16, #tpu.memory_space<vmem>>, vector<16x1x32xbf16>
    %9 = arith.extf %8 : vector<16x1x32xbf16> to vector<16x1x32xf32>
    %c0_4 = arith.constant 0 : index
    %c0_5 = arith.constant 0 : index
    %10 = vector.load %arg3[%c0_4, %c0_5] : memref<16x8xf32, #tpu.memory_space<vmem>>, vector<16x8xf32>
    %11 = vector.shape_cast %10 : vector<16x8xf32> to vector<16x8x1xf32>
    %c0_6 = arith.constant 0 : index
    %c0_7 = arith.constant 0 : index
    %c0_8 = arith.constant 0 : index
    %12 = vector.load %arg4[%c0_6, %c0_7, %c0_8] : memref<2x8x32xf32, #tpu.memory_space<vmem>>, vector<1x8x32xf32>
    %13 = vector.shape_cast %12 : vector<1x8x32xf32> to vector<8x32xf32>
    %c1 = arith.constant 1 : index
    %c0_9 = arith.constant 0 : index
    %c0_10 = arith.constant 0 : index
    %14 = vector.load %arg4[%c1, %c0_9, %c0_10] : memref<2x8x32xf32, #tpu.memory_space<vmem>>, vector<1x8x32xf32>
    %15 = vector.shape_cast %14 : vector<1x8x32xf32> to vector<8x32xf32>
    %c0_11 = arith.constant 0 : index
    %c0_12 = arith.constant 0 : index
    %c0_13 = arith.constant 0 : index
    %c0_14 = arith.constant 0 : index
    %16 = vector.load %arg1[%c0_11, %c0_12, %c0_13, %c0_14] : memref<3x16x8x32xbf16, #tpu.memory_space<vmem>>, vector<1x16x8x32xbf16>
    %17 = vector.shape_cast %16 : vector<1x16x8x32xbf16> to vector<16x8x32xbf16>
    %18 = arith.extf %17 : vector<16x8x32xbf16> to vector<16x8x32xf32>
    %19 = vector.broadcast %9 : vector<16x1x32xf32> to vector<16x8x32xf32>
    %20 = arith.addf %18, %19 : vector<16x8x32xf32>
    %21 = vector.shape_cast %13 : vector<8x32xf32> to vector<1x8x32xf32>
    %22 = vector.broadcast %21 : vector<1x8x32xf32> to vector<16x8x32xf32>
    %23 = arith.addf %20, %22 : vector<16x8x32xf32>
    %24 = vector.broadcast %11 : vector<16x8x1xf32> to vector<16x8x32xf32>
    %25 = arith.mulf %23, %24 : vector<16x8x32xf32>
    %cst = arith.constant 5.65685415 : f32
    %26 = vector.broadcast %cst : f32 to vector<16x8x32xf32>
    %27 = arith.mulf %25, %26 : vector<16x8x32xf32>
    %28 = vector.shape_cast %15 : vector<8x32xf32> to vector<1x8x32xf32>
    %29 = vector.broadcast %28 : vector<1x8x32xf32> to vector<16x8x32xf32>
    %30 = arith.addf %27, %29 : vector<16x8x32xf32>
    %31 = vector.shape_cast %30 : vector<16x8x32xf32> to vector<128x32xf32>
    %32 = arith.truncf %31 : vector<128x32xf32> to vector<128x32xbf16>
    %c0_15 = arith.constant 0 : index
    %c0_16 = arith.constant 0 : index
    %33 = vector.load %arg5[%c0_15, %c0_16] : memref<32x96xbf16, #tpu.memory_space<vmem>>, vector<32x96xbf16>
    %cst_17 = arith.constant dense<0.000000e+00> : vector<128x96xf32>
    %34 = tpu.matmul %32, %33, %cst_17 {dimension_numbers = #tpu.dot_dimension_numbers<[1], [0], [0], [1], [0, 0, 1, 1], [], []>} : vector<128x32xbf16>, vector<32x96xbf16>, vector<128x96xf32> -> vector<128x96xf32>
    %c0_18 = arith.constant 0 : index
    %c0_19 = arith.constant 0 : index
    %35 = vector.load %arg6[%c0_18, %c0_19] : memref<1x96xf32, #tpu.memory_space<vmem>>, vector<1x96xf32>
    %36 = vector.broadcast %35 : vector<1x96xf32> to vector<128x96xf32>
    %37 = arith.addf %34, %36 : vector<128x96xf32>
    %38 = vector.extract_strided_slice %37 {offsets = [0, 0], sizes = [128, 32], strides = [1, 1]} : vector<128x96xf32> to vector<128x32xf32>
    %39 = vector.shape_cast %38 : vector<128x32xf32> to vector<16x8x32xf32>
    %40 = vector.extract_strided_slice %37 {offsets = [0, 32], sizes = [128, 32], strides = [1, 1]} : vector<128x96xf32> to vector<128x32xf32>
    %41 = vector.shape_cast %40 : vector<128x32xf32> to vector<16x8x32xf32>
    %42 = vector.extract_strided_slice %37 {offsets = [0, 64], sizes = [128, 32], strides = [1, 1]} : vector<128x96xf32> to vector<128x32xf32>
    %43 = vector.shape_cast %42 : vector<128x32xf32> to vector<16x8x32xf32>
    %44 = tpu.iota {dimensions = array<i32: 0>} : vector<8x8xi32>
    %45 = tpu.iota {dimensions = array<i32: 1>} : vector<8x8xi32>
    %46 = arith.cmpi sge, %44, %45 : vector<8x8xi32>
    %cst_20 = arith.constant 0.000000e+00 : f32
    %cst_21 = arith.constant -1.000000e+09 : f32
    %47 = vector.broadcast %cst_20 : f32 to vector<8x8xf32>
    %48 = vector.broadcast %cst_21 : f32 to vector<8x8xf32>
    %49 = arith.select %46, %47, %48 : vector<8x8xi1>, vector<8x8xf32>
    %50 = arith.truncf %39 : vector<16x8x32xf32> to vector<16x8x32xbf16>
    %51 = arith.truncf %41 : vector<16x8x32xf32> to vector<16x8x32xbf16>
    "tpu.trace_start"() <{level = 10 : i32, message = "bqd,bkd->bqk"}> : () -> ()
    %cst_22 = arith.constant dense<0.000000e+00> : vector<16x8x8xf32>
    %52 = tpu.matmul %50, %51, %cst_22 {dimension_numbers = #tpu.dot_dimension_numbers<[2], [2], [1], [1], [0, 0, 0, 1, 1, 1], [0], [0]>} : vector<16x8x32xbf16>, vector<16x8x32xbf16>, vector<16x8x8xf32> -> vector<16x8x8xf32>
    "tpu.trace_stop"() : () -> ()
    %cst_23 = arith.constant 0.176776692 : f32
    %53 = vector.broadcast %cst_23 : f32 to vector<16x8x8xf32>
    %54 = arith.mulf %52, %53 : vector<16x8x8xf32>
    %55 = vector.shape_cast %49 : vector<8x8xf32> to vector<1x8x8xf32>
    %56 = vector.broadcast %55 : vector<1x8x8xf32> to vector<16x8x8xf32>
    %57 = arith.addf %54, %56 : vector<16x8x8xf32>
    %cst_24 = arith.constant dense<0xFF800000> : vector<16x8xf32>
    %58 = vector.multi_reduction <maximumf>, %57, %cst_24 [2] : vector<16x8x8xf32> to vector<16x8xf32>
    %59 = vector.shape_cast %58 : vector<16x8xf32> to vector<16x8x1xf32>
    %60 = vector.broadcast %59 : vector<16x8x1xf32> to vector<16x8x8xf32>
    %61 = arith.subf %57, %60 : vector<16x8x8xf32>
    %62 = math.exp %61 : vector<16x8x8xf32>
    %cst_25 = arith.constant dense<0.000000e+00> : vector<16x8xf32>
    %63 = vector.multi_reduction <add>, %62, %cst_25 [2] : vector<16x8x8xf32> to vector<16x8xf32>
    %64 = vector.shape_cast %63 : vector<16x8xf32> to vector<16x8x1xf32>
    %65 = tpu.reciprocal %64 {approx = true} : vector<16x8x1xf32> -> vector<16x8x1xf32>
    %66 = vector.broadcast %65 : vector<16x8x1xf32> to vector<16x8x8xf32>
    %67 = arith.mulf %62, %66 : vector<16x8x8xf32>
    %68 = arith.truncf %67 : vector<16x8x8xf32> to vector<16x8x8xbf16>
    %69 = arith.truncf %43 : vector<16x8x32xf32> to vector<16x8x32xbf16>
    "tpu.trace_start"() <{level = 10 : i32, message = "bqk,bkd->bqd"}> : () -> ()
    %cst_26 = arith.constant dense<0.000000e+00> : vector<16x8x32xf32>
    %70 = tpu.matmul %68, %69, %cst_26 {dimension_numbers = #tpu.dot_dimension_numbers<[2], [1], [1], [2], [0, 0, 0, 1, 1, 2], [0], [0]>} : vector<16x8x8xbf16>, vector<16x8x32xbf16>, vector<16x8x32xf32> -> vector<16x8x32xf32>
    "tpu.trace_stop"() : () -> ()
    %71 = vector.shape_cast %70 : vector<16x8x32xf32> to vector<128x32xf32>
    %72 = arith.truncf %71 : vector<128x32xf32> to vector<128x32xbf16>
    %c0_27 = arith.constant 0 : index
    %c0_28 = arith.constant 0 : index
    %c0_29 = arith.constant 0 : index
    %73 = vector.load %arg7[%c0_27, %c0_28, %c0_29] : memref<3x32x32xbf16, #tpu.memory_space<vmem>>, vector<1x32x32xbf16>
    %74 = vector.shape_cast %73 : vector<1x32x32xbf16> to vector<32x32xbf16>
    %cst_30 = arith.constant dense<0.000000e+00> : vector<128x32xf32>
    %75 = tpu.matmul %72, %74, %cst_30 {dimension_numbers = #tpu.dot_dimension_numbers<[1], [0], [0], [1], [0, 0, 1, 1], [], []>} : vector<128x32xbf16>, vector<32x32xbf16>, vector<128x32xf32> -> vector<128x32xf32>
    %76 = vector.broadcast %1 : vector<1x32xf32> to vector<128x32xf32>
    %77 = arith.addf %75, %76 : vector<128x32xf32>
    %78 = arith.addf %31, %77 : vector<128x32xf32>
    %cst_31 = arith.constant dense<0.000000e+00> : vector<128xf32>
    %79 = vector.multi_reduction <add>, %78, %cst_31 [1] : vector<128x32xf32> to vector<128xf32>
    %80 = vector.shape_cast %79 : vector<128xf32> to vector<128x1xf32>
    %cst_32 = arith.constant 3.200000e+01 : f32
    %81 = vector.broadcast %cst_32 : f32 to vector<128x1xf32>
    %82 = arith.divf %80, %81 : vector<128x1xf32>
    %83 = vector.broadcast %82 : vector<128x1xf32> to vector<128x32xf32>
    %84 = arith.subf %78, %83 : vector<128x32xf32>
    %85 = arith.mulf %84, %84 : vector<128x32xf32>
    %cst_33 = arith.constant dense<0.000000e+00> : vector<128xf32>
    %86 = vector.multi_reduction <add>, %85, %cst_33 [1] : vector<128x32xf32> to vector<128xf32>
    %87 = vector.shape_cast %86 : vector<128xf32> to vector<128x1xf32>
    %cst_34 = arith.constant 3.200000e+01 : f32
    %88 = vector.broadcast %cst_34 : f32 to vector<128x1xf32>
    %89 = arith.divf %87, %88 : vector<128x1xf32>
    %90 = vector.broadcast %82 : vector<128x1xf32> to vector<128x32xf32>
    %91 = arith.subf %78, %90 : vector<128x32xf32>
    %cst_35 = arith.constant 9.99999974E-6 : f32
    %92 = vector.broadcast %cst_35 : f32 to vector<128x1xf32>
    %93 = arith.addf %89, %92 : vector<128x1xf32>
    %94 = math.rsqrt %93 : vector<128x1xf32>
    %95 = vector.broadcast %94 : vector<128x1xf32> to vector<128x32xf32>
    %96 = arith.mulf %91, %95 : vector<128x32xf32>
    %97 = vector.broadcast %2 : vector<1x32xf32> to vector<128x32xf32>
    %98 = arith.mulf %96, %97 : vector<128x32xf32>
    %99 = vector.broadcast %3 : vector<1x32xf32> to vector<128x32xf32>
    %100 = arith.addf %98, %99 : vector<128x32xf32>
    %101 = arith.truncf %100 : vector<128x32xf32> to vector<128x32xbf16>
    %c1_36 = arith.constant 1 : index
    %c0_37 = arith.constant 0 : index
    %c0_38 = arith.constant 0 : index
    %102 = vector.load %arg7[%c1_36, %c0_37, %c0_38] : memref<3x32x32xbf16, #tpu.memory_space<vmem>>, vector<1x32x32xbf16>
    %103 = vector.shape_cast %102 : vector<1x32x32xbf16> to vector<32x32xbf16>
    %cst_39 = arith.constant dense<0.000000e+00> : vector<128x32xf32>
    %104 = tpu.matmul %101, %103, %cst_39 {dimension_numbers = #tpu.dot_dimension_numbers<[1], [0], [0], [1], [0, 0, 1, 1], [], []>} : vector<128x32xbf16>, vector<32x32xbf16>, vector<128x32xf32> -> vector<128x32xf32>
    %105 = vector.broadcast %4 : vector<1x32xf32> to vector<128x32xf32>
    %106 = arith.addf %104, %105 : vector<128x32xf32>
    %cst_40 = arith.constant 0.000000e+00 : f32
    %107 = vector.broadcast %cst_40 : f32 to vector<128x32xf32>
    %108 = arith.maximumf %106, %107 : vector<128x32xf32>
    %109 = arith.truncf %108 : vector<128x32xf32> to vector<128x32xbf16>
    %c2 = arith.constant 2 : index
    %c0_41 = arith.constant 0 : index
    %c0_42 = arith.constant 0 : index
    %110 = vector.load %arg7[%c2, %c0_41, %c0_42] : memref<3x32x32xbf16, #tpu.memory_space<vmem>>, vector<1x32x32xbf16>
    %111 = vector.shape_cast %110 : vector<1x32x32xbf16> to vector<32x32xbf16>
    %cst_43 = arith.constant dense<0.000000e+00> : vector<128x32xf32>
    %112 = tpu.matmul %109, %111, %cst_43 {dimension_numbers = #tpu.dot_dimension_numbers<[1], [0], [0], [1], [0, 0, 1, 1], [], []>} : vector<128x32xbf16>, vector<32x32xbf16>, vector<128x32xf32> -> vector<128x32xf32>
    %113 = vector.broadcast %5 : vector<1x32xf32> to vector<128x32xf32>
    %114 = arith.addf %112, %113 : vector<128x32xf32>
    %115 = arith.addf %100, %114 : vector<128x32xf32>
    %cst_44 = arith.constant dense<0.000000e+00> : vector<128xf32>
    %116 = vector.multi_reduction <add>, %115, %cst_44 [1] : vector<128x32xf32> to vector<128xf32>
    %117 = vector.shape_cast %116 : vector<128xf32> to vector<128x1xf32>
    %cst_45 = arith.constant 3.200000e+01 : f32
    %118 = vector.broadcast %cst_45 : f32 to vector<128x1xf32>
    %119 = arith.divf %117, %118 : vector<128x1xf32>
    %120 = vector.broadcast %119 : vector<128x1xf32> to vector<128x32xf32>
    %121 = arith.subf %115, %120 : vector<128x32xf32>
    %122 = arith.mulf %121, %121 : vector<128x32xf32>
    %cst_46 = arith.constant dense<0.000000e+00> : vector<128xf32>
    %123 = vector.multi_reduction <add>, %122, %cst_46 [1] : vector<128x32xf32> to vector<128xf32>
    %124 = vector.shape_cast %123 : vector<128xf32> to vector<128x1xf32>
    %cst_47 = arith.constant 3.200000e+01 : f32
    %125 = vector.broadcast %cst_47 : f32 to vector<128x1xf32>
    %126 = arith.divf %124, %125 : vector<128x1xf32>
    %127 = vector.broadcast %119 : vector<128x1xf32> to vector<128x32xf32>
    %128 = arith.subf %115, %127 : vector<128x32xf32>
    %cst_48 = arith.constant 9.99999974E-6 : f32
    %129 = vector.broadcast %cst_48 : f32 to vector<128x1xf32>
    %130 = arith.addf %126, %129 : vector<128x1xf32>
    %131 = math.rsqrt %130 : vector<128x1xf32>
    %132 = vector.broadcast %131 : vector<128x1xf32> to vector<128x32xf32>
    %133 = arith.mulf %128, %132 : vector<128x32xf32>
    %134 = vector.broadcast %6 : vector<1x32xf32> to vector<128x32xf32>
    %135 = arith.mulf %133, %134 : vector<128x32xf32>
    %136 = vector.broadcast %7 : vector<1x32xf32> to vector<128x32xf32>
    %137 = arith.addf %135, %136 : vector<128x32xf32>
    %138 = vector.shape_cast %137 : vector<128x32xf32> to vector<16x8x32xf32>
    %139 = vector.broadcast %9 : vector<16x1x32xf32> to vector<16x8x32xf32>
    %140 = arith.addf %138, %139 : vector<16x8x32xf32>
    %141 = vector.shape_cast %140 : vector<16x8x32xf32> to vector<128x32xf32>
    %c1_49 = arith.constant 1 : index
    %c0_50 = arith.constant 0 : index
    %c0_51 = arith.constant 0 : index
    %c0_52 = arith.constant 0 : index
    %142 = vector.load %arg1[%c1_49, %c0_50, %c0_51, %c0_52] : memref<3x16x8x32xbf16, #tpu.memory_space<vmem>>, vector<1x16x8x32xbf16>
    %143 = vector.shape_cast %142 : vector<1x16x8x32xbf16> to vector<16x8x32xbf16>
    %144 = arith.extf %143 : vector<16x8x32xbf16> to vector<16x8x32xf32>
    %145 = vector.shape_cast %144 : vector<16x8x32xf32> to vector<128x32xf32>
    %c2_53 = arith.constant 2 : index
    %c0_54 = arith.constant 0 : index
    %c0_55 = arith.constant 0 : index
    %c0_56 = arith.constant 0 : index
    %146 = vector.load %arg1[%c2_53, %c0_54, %c0_55, %c0_56] : memref<3x16x8x32xbf16, #tpu.memory_space<vmem>>, vector<1x16x8x32xbf16>
    %147 = vector.shape_cast %146 : vector<1x16x8x32xbf16> to vector<16x8x32xbf16>
    %148 = arith.extf %147 : vector<16x8x32xbf16> to vector<16x8x32xf32>
    %149 = vector.shape_cast %148 : vector<16x8x32xf32> to vector<128x32xf32>
    %150 = arith.mulf %141, %145 : vector<128x32xf32>
    %cst_57 = arith.constant dense<0.000000e+00> : vector<128xf32>
    %151 = vector.multi_reduction <add>, %150, %cst_57 [1] : vector<128x32xf32> to vector<128xf32>
    %152 = arith.mulf %141, %149 : vector<128x32xf32>
    %cst_58 = arith.constant dense<0.000000e+00> : vector<128xf32>
    %153 = vector.multi_reduction <add>, %152, %cst_58 [1] : vector<128x32xf32> to vector<128xf32>
    %154 = vector.shape_cast %151 : vector<128xf32> to vector<1x128xf32>
    %155 = vector.shape_cast %153 : vector<128xf32> to vector<1x128xf32>
    %156 = tpu.concatenate %154, %155 in 0 : vector<1x128xf32>, vector<1x128xf32> -> vector<2x128xf32>
    %157 = arith.negf %156 : vector<2x128xf32>
    %158 = math.exp %157 : vector<2x128xf32>
    %cst_59 = arith.constant 1.000000e+00 : f32
    %159 = vector.broadcast %cst_59 : f32 to vector<2x128xf32>
    %160 = arith.addf %159, %158 : vector<2x128xf32>
    %161 = arith.divf %159, %160 : vector<2x128xf32>
    %c0_60 = arith.constant 0 : index
    %c0_61 = arith.constant 0 : index
    %c0_62 = arith.constant 0 : index
    %162 = vector.load %arg9[%c0_60, %c0_61, %c0_62] : memref<1x2x128xf32, #tpu.memory_space<vmem>>, vector<1x2x128xf32>
    %163 = vector.shape_cast %162 : vector<1x2x128xf32> to vector<2x128xf32>
    %164 = vector.shape_cast %161 : vector<2x128xf32> to vector<1x2x128xf32>
    tpu.vector_store %arg9[%c0_60, %c0_61, %c0_62], %164 {strides = array<i32>} : memref<1x2x128xf32, #tpu.memory_space<vmem>>, vector<1x2x128xf32>,
    return
  }
  func.func @transform_0(%arg0: i32) -> (i32, i32, i32, i32) {
    %c0_i32 = arith.constant 0 : i32
    %c0_i32_0 = arith.constant 0 : i32
    %c0_i32_1 = arith.constant 0 : i32
    %c0_i32_2 = arith.constant 0 : i32
    return %c0_i32, %arg0, %c0_i32_0, %c0_i32_1 : i32, i32, i32, i32
  }
  func.func @transform_1(%arg0: i32) -> (i32, i32, i32) {
    %c0_i32 = arith.constant 0 : i32
    %c0_i32_0 = arith.constant 0 : i32
    %c0_i32_1 = arith.constant 0 : i32
    return %arg0, %c0_i32, %c0_i32_0 : i32, i32, i32
  }
  func.func @transform_2(%arg0: i32) -> (i32, i32) {
    %c0_i32 = arith.constant 0 : i32
    %c0_i32_0 = arith.constant 0 : i32
    return %arg0, %c0_i32 : i32, i32
  }
  func.func @transform_3(%arg0: i32) -> (i32, i32, i32) {
    %c0_i32 = arith.constant 0 : i32
    %c0_i32_0 = arith.constant 0 : i32
    %c0_i32_1 = arith.constant 0 : i32
    %c0_i32_2 = arith.constant 0 : i32
    return %c0_i32, %c0_i32_0, %c0_i32_1 : i32, i32, i32
  }
  func.func @transform_4(%arg0: i32) -> (i32, i32) {
    %c0_i32 = arith.constant 0 : i32
    %c0_i32_0 = arith.constant 0 : i32
    %c0_i32_1 = arith.constant 0 : i32
    return %c0_i32, %c0_i32_0 : i32, i32
  }
  func.func @transform_5(%arg0: i32) -> (i32, i32) {
    %c0_i32 = arith.constant 0 : i32
    %c0_i32_0 = arith.constant 0 : i32
    %c0_i32_1 = arith.constant 0 : i32
    return %c0_i32, %c0_i32_0 : i32, i32
  }
  func.func @transform_6(%arg0: i32) -> (i32, i32, i32) {
    %c0_i32 = arith.constant 0 : i32
    %c0_i32_0 = arith.constant 0 : i32
    %c0_i32_1 = arith.constant 0 : i32
    %c0_i32_2 = arith.constant 0 : i32
    return %c0_i32, %c0_i32_0, %c0_i32_1 : i32, i32, i32
  }
  func.func @transform_7(%arg0: i32) -> (i32, i32) {
    %c0_i32 = arith.constant 0 : i32
    %c0_i32_0 = arith.constant 0 : i32
    %c0_i32_1 = arith.constant 0 : i32
    return %c0_i32, %c0_i32_0 : i32, i32
  }
  func.func @transform_8(%arg0: i32) -> (i32, i32, i32) {
    %c0_i32 = arith.constant 0 : i32
    %c0_i32_0 = arith.constant 0 : i32
    %c0_i32_1 = arith.constant 0 : i32
    return %arg0, %c0_i32, %c0_i32_0 : i32, i32, i32
  }
}

</mosaic_0001>

<bundles_post_ra>
// kernel: tenet_seq_forward.1
= control target key start
LH: loop header
LB: loop body
LE: loop exit
PB: predicated region body
PF: predicated region fallthrough
CT: control target
= control target key end

     0   :  { %s4015_s27 = smov 0   ;;  %s4017_s28 = smov 0   ;;  %s5673_s0 = inlined_call_operand.vmem [shape: bf16[3,32,8,32], index: 0, kind: input, shape index: {}]   ;;  %s5674_s1 = inlined_call_operand.vmem [shape: bf16[32,1,32], index: 1, kind: input, shape index: {}]   ;;  %s5675_s2 = inlined_call_operand.vmem [shape: f32[32,8], index: 2, kind: input, shape index: {}]   ;;  %s5676_s3 = inlined_call_operand.vmem [shape: f32[2,8,32], index: 3, kind: input, shape index: {}]   ;;  %s5677_s4 = inlined_call_operand.vmem [shape: bf16[32,96], index: 4, kind: input, shape index: {}]   ;;  %s5678_s5 = inlined_call_operand.vmem [shape: f32[1,96], index: 5, kind: input, shape index: {}]   ;;  %s5679_s6 = inlined_call_operand.vmem [shape: bf16[3,32,32], index: 6, kind: input, shape index: {}]   ;;  %s5680_s7 = inlined_call_operand.vmem [shape: f32[8,32], index: 7, kind: input, shape index: {}]   ;;  %s5681_s8 = inlined_call_operand.vmem [shape: f32[2,2,128], index: 8, kind: output, shape index: {}]  }
   0x1   :  { %s4019_s29 = smov 0  }
   0x2 LB: > { %s4031_s30 = sadd.s32 4294967295, %s3964_s29   ;;  %s4034_s9 = sadd.s32 1, %s3964_s29   ;;  %s3964_s29 = sphi %s4019_s29, %s5713_s29   ;;  %s3960_s28 = sphi %s4017_s28, %s5712_s28   ;;  %s3956_s27 = sphi %s4015_s27, %s5711_s27  }
   0x3   : > { %s22_s10 = ssub.s32 %s3964_s29, %s4034_s9  ;;  %s25_s11 = sadd.s32 1, %s3960_s28 }
   0x4   : > { %p23_p0 = scmp.eq.s32.totalorder %s22_s10, 0  ;;  %p32_p1 = scmp.ne.s32.totalorder %s3960_s28, %s3956_s27 }
   0x5   : > { %p33_p2 = scmp.eq.s32.totalorder %s3964_s29, 0  ;;  %p3491_p4 = scmp.ge.s32.totalorder %s3964_s29, 2 }
   0x6   : > { %s4043_s12 = scalar_select %p23_p0, %s3960_s28, %s25_s11  }
   0x7   : > { %p34_p3 = por %p33_p2, %p32_p1  ;;  %256 = sbr.rel (%p3491_p4) target bundleno = 40 (0x28), region = 36 }
   0xc   : > { %259 = sbr.rel (!%p34_p3) target bundleno = 40 (0x28), region = 40  ;;  %s261_s13 = sand.u32 (%p34_p3), 1, %s3960_s28  }
   0xd   : > { %s3639_s14 = sshll.u32 (%p34_p3), %s3964_s29, 6  ;;  %s3773_s15 = smul.u32 (%p34_p3), 192, %s261_s13 }
   0xe   : > { %s4051_s18 = scalar_lea.vmem (%p34_p3), %s5673_s0, %s3639_s14 }
   0xf   : > { %v283_v0 = vld [vmem:[%s4051_s18] sm:$0xff] (%p34_p3)   ;;  %v287_v1 = vld [vmem:[%s4051_s18 + $0x8] sm:$0xff] (%p34_p3)   ;;  %v291_v2 = vld [vmem:[%s4051_s18 + $0x10] sm:$0xff] (%p34_p3)   ;;  %s4056_s19 = scalar_lea.vmem (%p34_p3), [#allocation2], %s3773_s15 }
  0x10   : > { %284 = vst [vmem:[%s4056_s19] sm:$0xff] (%p34_p3), %v283_v0   ;;  %v295_v3 = vld [vmem:[%s4051_s18 + $0x18] sm:$0xff] (%p34_p3)   ;;  %v299_v4 = vld [vmem:[%s4051_s18 + $0x20] sm:$0xff] (%p34_p3)   ;;  %v303_v5 = vld [vmem:[%s4051_s18 + $0x28] sm:$0xff] (%p34_p3)  }
  0x11   : > { %288 = vst [vmem:[%s4056_s19 + $0x8] sm:$0xff] %v287_v1   ;;  %v307_v6 = vld [vmem:[%s4051_s18 + $0x30] sm:$0xff]   ;;  %v311_v7 = vld [vmem:[%s4051_s18 + $0x38] sm:$0xff]   ;;  %v315_v8 = vld [vmem:[%s4051_s18 + $0x80] sm:$0xff]  }
  0x12   : > { %292 = vst [vmem:[%s4056_s19 + $0x10] sm:$0xff] %v291_v2   ;;  %v319_v9 = vld [vmem:[%s4051_s18 + $0x88] sm:$0xff]   ;;  %v323_v10 = vld [vmem:[%s4051_s18 + $0x90] sm:$0xff]   ;;  %v327_v11 = vld [vmem:[%s4051_s18 + $0x98] sm:$0xff]  }
  0x13   : > { %296 = vst [vmem:[%s4056_s19 + $0x18] sm:$0xff] %v295_v3   ;;  %v331_v12 = vld [vmem:[%s4051_s18 + $0xa0] sm:$0xff]   ;;  %v335_v13 = vld [vmem:[%s4051_s18 + $0xa8] sm:$0xff]   ;;  %v339_v14 = vld [vmem:[%s4051_s18 + $0xb0] sm:$0xff]  }
  0x14   : > { %300 = vst [vmem:[%s4056_s19 + $0x20] sm:$0xff] %v299_v4   ;;  %v343_v15 = vld [vmem:[%s4051_s18 + $0xb8] sm:$0xff]   ;;  %v347_v16 = vld [vmem:[%s4051_s18 + $0x100] sm:$0xff]   ;;  %v351_v17 = vld [vmem:[%s4051_s18 + $0x108] sm:$0xff]  }
  0x15   : > { %304 = vst [vmem:[%s4056_s19 + $0x28] sm:$0xff] %v303_v5   ;;  %v355_v18 = vld [vmem:[%s4051_s18 + $0x110] sm:$0xff]   ;;  %v359_v19 = vld [vmem:[%s4051_s18 + $0x118] sm:$0xff]   ;;  %v363_v20 = vld [vmem:[%s4051_s18 + $0x120] sm:$0xff]  }
  0x16   : > { %308 = vst [vmem:[%s4056_s19 + $0x30] sm:$0xff] %v307_v6   ;;  %v367_v21 = vld [vmem:[%s4051_s18 + $0x128] sm:$0xff]   ;;  %v371_v22 = vld [vmem:[%s4051_s18 + $0x130] sm:$0xff]   ;;  %v375_v23 = vld [vmem:[%s4051_s18 + $0x138] sm:$0xff]  }
  0x17   : > { %312 = vst [vmem:[%s4056_s19 + $0x38] sm:$0xff] %v311_v7  }
  0x18   : > { %316 = vst [vmem:[%s4056_s19 + $0x40] sm:$0xff] %v315_v8  }
  0x19   : > { %320 = vst [vmem:[%s4056_s19 + $0x48] sm:$0xff] %v319_v9  }
  0x1a   : > { %324 = vst [vmem:[%s4056_s19 + $0x50] sm:$0xff] %v323_v10  }
  0x1b   : > { %328 = vst [vmem:[%s4056_s19 + $0x58] sm:$0xff] %v327_v11  }
  0x1c   : > { %332 = vst [vmem:[%s4056_s19 + $0x60] sm:$0xff] %v331_v12  }
  0x1d   : > { %336 = vst [vmem:[%s4056_s19 + $0x68] sm:$0xff] %v335_v13  }
  0x1e   : > { %340 = vst [vmem:[%s4056_s19 + $0x70] sm:$0xff] %v339_v14  }
  0x1f   : > { %344 = vst [vmem:[%s4056_s19 + $0x78] sm:$0xff] %v343_v15  }
  0x20   : > { %348 = vst [vmem:[%s4056_s19 + $0x80] sm:$0xff] %v347_v16  }
  0x21   : > { %352 = vst [vmem:[%s4056_s19 + $0x88] sm:$0xff] %v351_v17  }
  0x22   : > { %356 = vst [vmem:[%s4056_s19 + $0x90] sm:$0xff] %v355_v18  }
  0x23   : > { %360 = vst [vmem:[%s4056_s19 + $0x98] sm:$0xff] %v359_v19  }
  0x24   : > { %364 = vst [vmem:[%s4056_s19 + $0xa0] sm:$0xff] %v363_v20  }
  0x25   : > { %368 = vst [vmem:[%s4056_s19 + $0xa8] sm:$0xff] %v367_v21  }
  0x26   : > { %372 = vst [vmem:[%s4056_s19 + $0xb0] sm:$0xff] %v371_v22  }
  0x27   : > { %376 = vst [vmem:[%s4056_s19 + $0xb8] sm:$0xff] %v375_v23  }
  0x28 PF: > { %p3494_p5 = scmp.ge.s32.totalorder %s3964_s29, 1  ;;  %p514_p6 = scmp.lt.s32.totalorder %s3964_s29, 3 }
  0x2a   : > { %p515_p7 = pnand %p3494_p5, %p514_p6 }
  0x2c   : > { %518 = sbr.rel (%p515_p7) target bundleno = 2332 (0x91c), region = 89 }
  0x31   : > { %v5682_v24 = vlaneseq  ;;  %s3496_s20 = sshll.u32 %s4031_s30, 1  ;;  %s3495_s25 = sshll.u32 %s4031_s30, 4  ;;  %v3641_v44 = vld [vmem:[%s5677_s4 + $0x8] sm:$0xff]  ;;  %v3640_v46 = vld [vmem:[%s5677_s4] sm:$0xff]  ;;  %vm885_vm0 = vcmask 261120   ;;  %vm1595_vm1 = vcmask 1043456  }
  0x32   : > { %p569_p8 = scmp.lt.s32.totalorder %s3496_s20, 3  ;;  %p564_p9 = scmp.lt.s32.totalorder %s3495_s25, 31  ;;  %916 = vmatpush.bf16.msra.mxu0 %v3641_v44  ;;  %3767 = vmatpush.bf16.msra.mxu3 %v3641_v44  ;;  %v4146_v56 = vld [vmem:[%s5676_s3] sm:$0xff]  ;;  %v4160_v4 = vld [vmem:[%s5676_s3 + $0x8] sm:$0xff]  ;;  %vm1397_vm3 = vcmask 64512  }
  0x33   : > { %v4107_v25 = vshrl.u32 %v5682_v24, 7  ;;  %s521_s10 = sand.u32 1, %s3956_s27   ;;  %p574_p10 = scmp.lt.s32.totalorder %s4031_s30, 1 }
  0x34   : > { %s5715_s20 = smov (!%p569_p8, %s3496_s20), 3  ;;  %s5717_s25 = smov (!%p564_p9, %s3495_s25), 31 }
  0x35   : > { %3804 = vset.pattern.permute.xlu1 %v4107_v25  ;;  %3803 = vset.pattern.permute.xlu0 %v4107_v25  ;;  %s3497_s21 = sshll.u32 %s5715_s20, 3  ;;  %s3774_s14 = smul.u32 192, %s521_s10 }
  0x36   : > { %3805 = vset.pattern.permute.xlu2 %v4107_v25  ;;  %s572_s24 = scalar_lea.vmem %s5675_s2, %s3497_s21  ;;  %917 = vmatpush.bf16.msra.mxu0 %v3640_v46  ;;  %s4128_s17 = scalar_lea.vmem %s5674_s1, %s5717_s25 }
  0x37   : > { %v612_v26 = vld [vmem:[%s572_s24] sm:$0xff]  ;;  %v613_v33 = vld [vmem:[%s572_s24 + $0x8] sm:$0xff]  ;;  %3768 = vmatpush.bf16.msra.mxu3 %v3640_v46  ;;  %s4134_s27 = scalar_lea.vmem [#allocation2], %s3774_s14  ;;  %s3966_s24 = smov 96  }
  0x38   : > { %v628_v27 = vperm.slane %v612_v26, 2  ;;  %v614_v28 = vperm.slane %v612_v26, 0  ;;  %v642_v29 = vperm.slane %v612_v26, 4  ;;  %v635_v30 = vperm.slane %v612_v26, 3  ;;  %v588_v47 = vld [vmem:[%s4128_s17 + $0x8] sm:$0x1] }
  0x39   : > { %v621_v31 = vperm.slane %v612_v26, 1  ;;  %v649_v32 = vperm.slane %v612_v26, 5  ;;  %v663_v34 = vperm.slane %v612_v26, 7  ;;  %v656_v35 = vperm.slane %v612_v26, 6  ;;  %v580_v50 = vld [vmem:[%s4128_s17] sm:$0x1] }
  0x3a   : > { %v670_v36 = vperm.slane %v613_v33, 0  ;;  %v684_v37 = vperm.slane %v613_v33, 2  ;;  %v677_v38 = vperm.slane %v613_v33, 1  ;;  %v691_v39 = vperm.slane %v613_v33, 3  ;;  %v4137_v51 = vld [vmem:[%s4134_s27 + $0x20] sm:$0xff]   ;;  %v4154_v1 = vld [vmem:[%s4134_s27 + $0x28] sm:$0xff]  }
  0x3b   : > { %v705_v40 = vperm.slane %v613_v33, 5  ;;  %v698_v41 = vperm.slane %v613_v33, 4  ;;  %v712_v42 = vperm.slane %v613_v33, 6  ;;  %v719_v43 = vperm.slane %v613_v33, 7  ;;  %v3649_v57 = vld [vmem:[%s4134_s27] sm:$0xff]   ;;  %v3744_v15 = vld [vmem:[%s4134_s27 + $0x8] sm:$0xff]  }
  0x3c   : > { %v604_v49 = vunpack.c.l.bf16 %v588_v47  ;;  %v3666_v52 = vunpack.c.l.bf16 %v4137_v51  ;;  %v596_v54 = vunpack.c.l.bf16 %v580_v50  ;;  %v581_v58 = vld [vmem:[%s4128_s17 + $0x1] sm:$0x1]  ;;  %v3650_v60 = vunpack.c.l.bf16 %v3649_v57  ;;  %v582_v2 = vld [vmem:[%s4128_s17 + $0x2] sm:$0x1]  ;;  %v583_v6 = vld [vmem:[%s4128_s17 + $0x3] sm:$0x1] }
  0x3d   : > { %633 = vperm.xlu1 %3804, %v628_v27   ;;  %619 = vperm.xlu0 %3803, %v614_v28   ;;  %v597_v62 = vunpack.c.l.bf16 %v581_v58  ;;  %v3651_v7 = vunpack.c.h.bf16 %v3649_v57  ;;  %v591_v9 = vld [vmem:[%s4128_s17 + $0xb] sm:$0x1]  ;;  %v3671_v12 = vunpack.c.h.bf16 %v4154_v1  ;;  %v598_v14 = vunpack.c.l.bf16 %v582_v2  ;;  %v590_v33 = vld [vmem:[%s4128_s17 + $0xa] sm:$0x1]  ;;  %s3967_s25 = smov 64   ;;  %s5719_s30 = smov (!%p574_p10, %s4031_s30), 1 }
  0x3e   : > { %647 = vperm.xlu2 %3805, %v642_v29   ;;  %v4140_v53 = vperm.slane %v604_v49, 0  ;;  %v4151_v61 = vperm.slane %v596_v54, 0  ;;  %v607_v11 = vunpack.c.l.bf16 %v591_v9  ;;  %v599_v17 = vunpack.c.l.bf16 %v583_v6  ;;  %v584_v49 = vld [vmem:[%s4128_s17 + $0x4] sm:$0x1] }
  0x3f   : > { %v4164_v8 = vperm.slane %v597_v62, 0  ;;  %v3654_v22 = vunpack.c.l.bf16 %v3744_v15  ;;  %v4177_v23 = vperm.slane %v598_v14, 0  ;;  %v3655_v26 = vunpack.c.h.bf16 %v3744_v15  ;;  %v593_v62 = vld [vmem:[%s4128_s17 + $0xd] sm:$0x1]  ;;  %v3749_v15 = vld [vmem:[%s4134_s27 + $0x30] sm:$0xff]  }
  0x40   : > { %v785_v55 = vadd.f32 %v3666_v52, %v4140_v53  ;;  %v777_v5 = vadd.f32 %v3650_v60, %v4151_v61  ;;  %v4172_v18 = vperm.slane %v607_v11, 0  ;;  %v4179_v27 = vperm.slane %v599_v17, 0  ;;  %v585_v52 = vld [vmem:[%s4128_s17 + $0x5] sm:$0x1] }
  0x41   : > { %v778_v20 = vadd.f32 %v3651_v7, %v4164_v8  ;;  %v3667_v54 = vunpack.c.h.bf16 %v4137_v51  ;;  %v601_v2 = vunpack.c.l.bf16 %v585_v52  ;;  %v609_v7 = vunpack.c.l.bf16 %v593_v62  ;;  %v3750_v62 = vld [vmem:[%s4134_s27 + $0x38] sm:$0xff]  }
  0x42   : > { %v801_v59 = vadd.f32 %v785_v55, %v4146_v56  ;;  %5690 = vst [vmem:[#allocation3_spill] sm:$0xff] %v4172_v18  ;;  %v793_v19 = vadd.f32 %v777_v5, %v4146_v56  ;;  %v788_v21 = vadd.f32 %v3671_v12, %v4172_v18 }
  0x44   : > { %v804_v28 = vadd.f32 %v788_v21, %v4146_v56  ;;  %v3675_v21 = vunpack.c.h.bf16 %v3749_v15 }
  0x45   : > { %640 = vperm.xlu1 %3804, %v635_v30   ;;  %626 = vperm.xlu0 %3803, %v621_v31   ;;  %v794_v30 = vadd.f32 %v778_v20, %v4146_v56  ;;  %v589_v31 = vld [vmem:[%s4128_s17 + $0x9] sm:$0x1]  ;;  %v4221_v20 = vperm.slane %v601_v2, 0 }
  0x46   : > { %654 = vperm.xlu2 %3805, %v649_v32  }
  0x4d   : > { %668 = vperm.xlu1 %3804, %v663_v34   ;;  %661 = vperm.xlu0 %3803, %v656_v35   ;;  %v779_v35 = vadd.f32 %v3654_v22, %v4177_v23  ;;  %v4223_v22 = vperm.slane %v609_v7, 0  ;;  %v586_v7 = vld [vmem:[%s4128_s17 + $0x6] sm:$0x1] }
  0x4e   : > { %675 = vperm.xlu2 %3805, %v670_v36  }
  0x4f   : > { %v795_v47 = vadd.f32 %v779_v35, %v4146_v56  ;;  %5693 = vst [vmem:[#allocation6_spill] sm:$0xff] %v4223_v22 }
  0x55   : > { %689 = vperm.xlu1 %3804, %v684_v37   ;;  %682 = vperm.xlu0 %3803, %v677_v38   ;;  %v780_v37 = vadd.f32 %v3655_v26, %v4179_v27 }
  0x56   : > { %696 = vperm.xlu2 %3805, %v691_v39   ;;  %v605_v39 = vunpack.c.l.bf16 %v589_v31 }
  0x57   : > { %v796_v50 = vadd.f32 %v780_v37, %v4146_v56 }
  0x58   : > { %v4195_v55 = vperm.slane %v605_v39, 0  ;;  %v595_v39 = vld [vmem:[%s4128_s17 + $0xf] sm:$0x1] }
  0x5a   : > { %5691 = vst [vmem:[#allocation4_spill] sm:$0xff] %v4195_v55  ;;  %v786_v14 = vadd.f32 %v3667_v54, %v4195_v55 }
  0x5c   : > { %v802_v31 = vadd.f32 %v786_v14, %v4146_v56 }
  0x5d   : > { %710 = vperm.xlu1 %3804, %v705_v40   ;;  %703 = vperm.xlu0 %3803, %v698_v41  }
  0x5e   : > { %717 = vperm.xlu2 %3805, %v712_v42  }
  0x65   : > { %724 = vperm.xlu0 %3803, %v719_v43   ;;  %v606_v43 = vunpack.c.l.bf16 %v590_v33 }
  0x67   : > { %v4204_v60 = vperm.slane %v606_v43, 0 }
  0x69   : > { %5692 = vst [vmem:[#allocation5_spill] sm:$0xff] %v4204_v60 }
  0x98   : > { %v4119_v45 = vpop.permute.xlu2 %647 }
  0xa0   : > { %v4131_v48 = vpop.permute.xlu2 %654 }
  0xa8   : > { %v676_v63 = vpop.permute.xlu2 %675 }
  0xa9   : > { %v817_v0 = vmul.f32 %v801_v59, %v676_v63  ;;  %v3670_v59 = vunpack.c.l.bf16 %v4154_v1  ;;  %v592_v63 = vld [vmem:[%s4128_s17 + $0xc] sm:$0x1] }
  0xaa   : > { %v608_v9 = vunpack.c.l.bf16 %v592_v63 }
  0xab   : > { %v833_v3 = vmul.f32 5.656854, %v817_v0  ;;  %v600_v0 = vunpack.c.l.bf16 %v584_v49  ;;  %v787_v12 = vadd.f32 %v3670_v59, %v4204_v60 }
  0xac   : > { %v4225_v26 = vperm.slane %v608_v9, 0  ;;  %v3678_v9 = vunpack.c.l.bf16 %v3750_v62 }
  0xad   : > { %v4168_v10 = vadd.f32 %v4160_v4, %v833_v3  ;;  %v3745_v3 = vld [vmem:[%s4134_s27 + $0x10] sm:$0xff]   ;;  %v4219_v17 = vperm.slane %v600_v0, 0 }
  0xae   : > { %5694 = vst [vmem:[#allocation7_spill] sm:$0xff] %v4225_v26 }
  0xaf   : > { %v634_v13 = vpop.permute.xlu1 %633  ;;  %v620_v16 = vpop.permute.xlu0 %619 }
  0xb0   : > { %v809_v29 = vmul.f32 %v793_v19, %v620_v16  ;;  %v697_v32 = vpop.permute.xlu2 %696  ;;  %v811_v11 = vmul.f32 %v795_v47, %v634_v13  ;;  %v3658_v16 = vunpack.c.l.bf16 %v3745_v3  ;;  %v3659_v19 = vunpack.c.h.bf16 %v3745_v3  ;;  %v587_v3 = vld [vmem:[%s4128_s17 + $0x7] sm:$0x1] }
  0xb1   : > { %v820_v34 = vmul.f32 %v804_v28, %v697_v32  ;;  %v3674_v13 = vunpack.c.l.bf16 %v3749_v15 }
  0xb2   : > { %v825_v41 = vmul.f32 5.656854, %v809_v29  ;;  %v827_v28 = vmul.f32 5.656854, %v811_v11  ;;  %v781_v32 = vadd.f32 %v3658_v16, %v4219_v17  ;;  %v782_v33 = vadd.f32 %v3659_v19, %v4221_v20 }
  0xb3   : > { %v836_v40 = vmul.f32 5.656854, %v820_v34  ;;  %v789_v37 = vadd.f32 %v3674_v13, %v4225_v26 }
  0xb4   : > { %v4198_v57 = vadd.f32 %v4160_v4, %v825_v41  ;;  %v797_v52 = vadd.f32 %v781_v32, %v4146_v56  ;;  %v798_v54 = vadd.f32 %v782_v33, %v4146_v56 }
  0xb5   : > { %v4188_v44 = vadd.f32 %v4160_v4, %v836_v40  ;;  %v4236_v40 = vadd.f32 %v4160_v4, %v827_v28  ;;  %v805_v2 = vadd.f32 %v789_v37, %v4146_v56  ;;  %v603_v28 = vunpack.c.l.bf16 %v587_v3 }
  0xb6   : > { %v813_v16 = vmul.f32 %v797_v52, %v4119_v45  ;;  %v814_v19 = vmul.f32 %v798_v54, %v4131_v48 }
  0xb7   : > { %v641_v36 = vpop.permute.xlu1 %640  ;;  %v627_v38 = vpop.permute.xlu0 %626 }
  0xb8   : > { %v810_v42 = vmul.f32 %v794_v30, %v627_v38  ;;  %v812_v1 = vmul.f32 %v796_v50, %v641_v36  ;;  %v803_v30 = vadd.f32 %v787_v12, %v4146_v56  ;;  %v790_v36 = vadd.f32 %v3675_v21, %v4223_v22  ;;  %v594_v38 = vld [vmem:[%s4128_s17 + $0xe] sm:$0x1] }
  0xb9   : > { %v610_v49 = vunpack.c.l.bf16 %v594_v38  ;;  %v611_v50 = vunpack.c.l.bf16 %v595_v39  ;;  %v4272_v38 = vperm.slane %v603_v28, 0 }
  0xba   : > { %v826_v46 = vmul.f32 5.656854, %v810_v42  ;;  %v828_v29 = vmul.f32 5.656854, %v812_v1  ;;  %v806_v59 = vadd.f32 %v790_v36, %v4146_v56  ;;  %v3679_v1 = vunpack.c.h.bf16 %v3750_v62 }
  0xbb   : > { %v4256_v11 = vperm.slane %v610_v49, 0  ;;  %v4258_v12 = vperm.slane %v611_v50, 0  ;;  %v830_v36 = vmul.f32 5.656854, %v814_v19  ;;  %v718_v49 = vpop.permute.xlu2 %717 }
  0xbc   : > { %v4201_v58 = vadd.f32 %v4160_v4, %v826_v46  ;;  %v4239_v41 = vadd.f32 %v4160_v4, %v828_v29  ;;  %v602_v29 = vunpack.c.l.bf16 %v586_v7 }
  0xbd   : > { %5695 = vst [vmem:[#allocation8_spill] sm:$0xff] %v4256_v11  ;;  %v791_v33 = vadd.f32 %v3678_v9, %v4256_v11  ;;  %v4284_v54 = vadd.f32 %v4160_v4, %v830_v36 }
  0xbe   : > { %v857_v51 = vpack.c.bf16 %v4201_v58, %v4198_v57  ;;  %5696 = vst [vmem:[#allocation9_spill] sm:$0xff] %v4258_v12 }
  0xbf   : > { %v4211_v5 = vpop.permute.xlu1 %668  ;;  %v4213_v6 = vpop.permute.xlu0 %661 }
  0xc0   : > { %3508 = vmatmul.msk.bf16.vlgmr.msra.gmra.mxu0 %vm885_vm0, %v857_v51  ;;  %v858_v51 = vpack.c.bf16 %v4239_v41, %v4236_v40 }
  0xc7   : > { %v690_v34 = vpop.permute.xlu1 %689  ;;  %v683_v35 = vpop.permute.xlu0 %682 }
  0xc8   : > { %v819_v42 = vmul.f32 %v803_v30, %v690_v34  ;;  %v818_v43 = vmul.f32 %v802_v31, %v683_v35  ;;  %v3746_v30 = vld [vmem:[%s4134_s27 + $0x18] sm:$0xff]   ;;  %v792_v34 = vadd.f32 %v3679_v1, %v4258_v12  ;;  %v829_v35 = vmul.f32 5.656854, %v813_v16 }
  0xc9   : > { %v3663_v48 = vunpack.c.h.bf16 %v3746_v30  ;;  %v3662_v39 = vunpack.c.l.bf16 %v3746_v30 }
  0xca   : > { %v835_v46 = vmul.f32 5.656854, %v819_v42  ;;  %v834_v47 = vmul.f32 5.656854, %v818_v43  ;;  %v4274_v42 = vperm.slane %v602_v29, 0  ;;  %v807_v43 = vadd.f32 %v791_v33, %v4146_v56 }
  0xcb   : > { %v4281_v52 = vadd.f32 %v4160_v4, %v829_v35 }
  0xcc   : > { %v4246_v63 = vadd.f32 %v4160_v4, %v835_v46  ;;  %v4249_v0 = vadd.f32 %v4160_v4, %v834_v47  ;;  %v808_v46 = vadd.f32 %v792_v34, %v4146_v56  ;;  %v783_v62 = vadd.f32 %v3662_v39, %v4274_v42 }
  0xcd   : > { %v859_v3 = vpack.c.bf16 %v4284_v54, %v4281_v52 }
  0xce   : > { %v799_v9 = vadd.f32 %v783_v62, %v4146_v56  ;;  %v861_v30 = vpack.c.bf16 %v4249_v0, %v4168_v10 }
  0xcf   : > { %v711_v14 = vpop.permute.xlu1 %710  ;;  %v704_v15 = vpop.permute.xlu0 %703 }
  0xd0   : > { %v822_v21 = vmul.f32 %v806_v59, %v711_v14  ;;  %v821_v13 = vmul.f32 %v805_v2, %v704_v15  ;;  %3509 = vmatmul.msk.bf16.gmra.mxu0 %vm885_vm0, %v858_v51  ;;  %v784_v59 = vadd.f32 %v3663_v48, %v4272_v38  ;;  %v823_v2 = vmul.f32 %v807_v43, %v718_v49 }
  0xd1   : > { %v815_v16 = vmul.f32 %v799_v9, %v4213_v6 }
  0xd2   : > { %v838_v31 = vmul.f32 5.656854, %v822_v21  ;;  %v837_v32 = vmul.f32 5.656854, %v821_v13  ;;  %v800_v7 = vadd.f32 %v784_v59, %v4146_v56  ;;  %v839_v1 = vmul.f32 5.656854, %v823_v2 }
  0xd3   : > { %v831_v28 = vmul.f32 5.656854, %v815_v16 }
  0xd4   : > { %v4267_v37 = vadd.f32 %v4160_v4, %v838_v31  ;;  %v4270_v45 = vadd.f32 %v4160_v4, %v837_v32  ;;  %v816_v15 = vmul.f32 %v800_v7, %v4211_v5  ;;  %v4297_v19 = vadd.f32 %v4160_v4, %v839_v1 }
  0xd5   : > { %v4309_v5 = vadd.f32 %v4160_v4, %v831_v28  ;;  %v862_v31 = vpack.c.bf16 %v4188_v44, %v4246_v63 }
  0xd6   : > { %v863_v47 = vpack.c.bf16 %v4267_v37, %v4270_v45  ;;  %v832_v13 = vmul.f32 5.656854, %v816_v15 }
  0xd7   : > { %v725_v50 = vpop.permute.xlu0 %724 }
  0xd8   : > { %3514 = vmatmul.msk.bf16.vlgmr.msra.gmra.mxu3 %vm885_vm0, %v863_v47  ;;  %v824_v51 = vmul.f32 %v808_v46, %v725_v50  ;;  %v4306_v56 = vadd.f32 %v4160_v4, %v832_v13 }
  0xda   : > { %v840_v14 = vmul.f32 5.656854, %v824_v51  ;;  %v860_v6 = vpack.c.bf16 %v4306_v56, %v4309_v5 }
  0xdc   : > { %v4300_v21 = vadd.f32 %v4160_v4, %v840_v14  ;;  %v4323_v4 = vld [vmem:[%s5678_s5] ss:$0 sm:$0xff] }
  0xde   : > { %v864_v29 = vpack.c.bf16 %v4300_v21, %v4297_v19 }
  0xe0   : > { %3510 = vmatmul.msk.bf16.gmra.mxu0 %vm885_vm0, %v859_v3 }
  0xe8   : > { %3515 = vmatmul.msk.bf16.gmra.mxu3 %vm885_vm0, %v864_v29 }
  0xf0   : > { %3511 = vmatmul.msk.bf16.gmra.mxu0 %vm885_vm0, %v860_v6 }
 0x100   : > { %3512 = vmatmul.msk.bf16.gmra.mxu0 %vm885_vm0, %v861_v30 }
 0x110   : > { %3513 = vmatmul.msk.bf16.gmra.mxu0 %vm885_vm0, %v862_v31 }
 0x13d   : > { %v919_v32 = vpop.f32.mrf.mxu0 }
 0x13e   : > { %v920_v33 = vadd.f32 %v4323_v4, %v919_v32 }
 0x140   : > { %v4326_v34 = vpack.c.bf16 %v920_v33, %v920_v33 }
 0x142   : > { %v982_v35 = vunpack.c.l.b16 %v4326_v34 }
 0x144   : > { %v4329_v36 = vpack.c.b16 %v982_v35, %v982_v35 }
 0x145   : > { %v921_v48 = vpop.f32.mrf.mxu0 }
 0x146   : > { %v922_v39 = vadd.f32 %v4323_v4, %v921_v48  ;;  %984 = vrot.lane.b32.xlu2 %v4329_v36, %s3966_s24 }
 0x148   : > { %v4334_v43 = vpack.c.bf16 %v922_v39, %v922_v39 }
 0x14a   : > { %v1006_v46 = vunpack.c.l.b16 %v4334_v43 }
 0x14c   : > { %v4337_v47 = vpack.c.b16 %v1006_v46, %v1006_v46 }
 0x14d   : > { %v924_v49 = vpop.f32.mrf.mxu0 }
 0x14e   : > { %v925_v50 = vadd.f32 %v4323_v4, %v924_v49  ;;  %1008 = vrot.lane.b32.xlu1 %v4337_v47, %s3966_s24 }
 0x150   : > { %v4342_v59 = vpack.c.bf16 %v925_v50, %v925_v50 }
 0x152   : > { %v1030_v62 = vunpack.c.l.b16 %v4342_v59 }
 0x154   : > { %v4345_v2 = vpack.c.b16 %v1030_v62, %v1030_v62 }
 0x155   : > { %v926_v51 = vpop.f32.mrf.mxu0 }
 0x156   : > { %v927_v3 = vadd.f32 %v4323_v4, %v926_v51  ;;  %1032 = vrot.lane.b32.xlu0 %v4345_v2, %s3966_s24 }
 0x158   : > { %v4350_v7 = vpack.c.bf16 %v927_v3, %v927_v3 }
 0x15a   : > { %v1054_v9 = vunpack.c.l.b16 %v4350_v7 }
 0x15b   : > { %v949_v48 = vpop.f32.mrf.mxu3 }
 0x15c   : > { %v4353_v1 = vpack.c.b16 %v1054_v9, %v1054_v9 }
 0x15d   : > { %v929_v14 = vpop.f32.mrf.mxu0 }
 0x15e   : > { %v930_v15 = vadd.f32 %v4323_v4, %v929_v14  ;;  %1056 = vrot.lane.b32.xlu1 %v4353_v1, %s3966_s24 }
 0x160   : > { %v4358_v16 = vpack.c.bf16 %v930_v15, %v930_v15 }
 0x162   : > { %v1078_v13 = vunpack.c.l.b16 %v4358_v16 }
 0x163   : > { %v951_v3 = vpop.f32.mrf.mxu3 }
 0x164   : > { %v4361_v28 = vpack.c.b16 %v1078_v13, %v1078_v13 }
 0x165   : > { %v931_v29 = vpop.f32.mrf.mxu0 }
 0x166   : > { %v932_v6 = vadd.f32 %v4323_v4, %v931_v29  ;;  %1080 = vrot.lane.b32.xlu2 %v4361_v28, %s3966_s24 }
 0x168   : > { %v4366_v30 = vpack.c.bf16 %v932_v6, %v932_v6 }
 0x16a   : > { %v1102_v31 = vunpack.c.l.b16 %v4366_v30 }
 0x16c   : > { %v4369_v32 = vpack.c.b16 %v1102_v31, %v1102_v31  ;;  %v954_v31 = vpop.f32.mrf.mxu3 }
 0x16d   : > { %v934_v33 = vpop.f32.mrf.mxu0 }
 0x16e   : > { %v935_v35 = vadd.f32 %v4323_v4, %v934_v33  ;;  %1104 = vrot.lane.b32.xlu0 %v4369_v32, %s3966_s24 }
 0x170   : > { %v4374_v39 = vpack.c.bf16 %v935_v35, %v935_v35 }
 0x172   : > { %v1126_v46 = vunpack.c.l.b16 %v4374_v39 }
 0x174   : > { %v4377_v49 = vpack.c.b16 %v1126_v46, %v1126_v46  ;;  %v956_v24 = vpop.f32.mrf.mxu3 }
 0x175   : > { %v936_v50 = vpop.f32.mrf.mxu0  ;;  %v957_v11 = vadd.f32 %v4323_v4, %v956_v24  ;;  %v955_v24 = vadd.f32 %v4323_v4, %v954_v31 }
 0x176   : > { %v937_v62 = vadd.f32 %v4323_v4, %v936_v50  ;;  %1128 = vrot.lane.b32.xlu2 %v4377_v49, %s3966_s24  ;;  %v950_v50 = vadd.f32 %v4323_v4, %v949_v48 }
 0x178   : > { %v4382_v51 = vpack.c.bf16 %v937_v62, %v937_v62 }
 0x17a   : > { %v1150_v9 = vunpack.c.l.b16 %v4382_v51 }
 0x17c   : > { %v4385_v14 = vpack.c.b16 %v1150_v9, %v1150_v9 }
 0x17d   : > { %v939_v15 = vpop.f32.mrf.mxu0 }
 0x17e   : > { %v940_v13 = vadd.f32 %v4323_v4, %v939_v15  ;;  %1152 = vrot.lane.b32.xlu1 %v4385_v14, %s3966_s24  ;;  %v4402_v15 = vpack.c.bf16 %v950_v50, %v950_v50 }
 0x180   : > { %v4390_v29 = vpack.c.bf16 %v940_v13, %v940_v13 }
 0x182   : > { %v1174_v6 = vunpack.c.l.b16 %v4390_v29 }
 0x184   : > { %v4393_v33 = vpack.c.b16 %v1174_v6, %v1174_v6 }
 0x185   : > { %v941_v35 = vpop.f32.mrf.mxu0 }
 0x186   : > { %v942_v46 = vadd.f32 %v4323_v4, %v941_v35  ;;  %1176 = vrot.lane.b32.xlu0 %v4393_v33, %s3966_s24  ;;  %v1270_v35 = vunpack.c.l.b16 %v4402_v15 }
 0x188   : > { %v4399_v62 = vpack.c.bf16 %v942_v46, %v942_v46  ;;  %v952_v46 = vadd.f32 %v4323_v4, %v951_v3  ;;  %v4415_v22 = vpack.c.b16 %v1270_v35, %v1270_v35 }
 0x18a   : > { %v1198_v9 = vunpack.c.l.b16 %v4399_v62 }
 0x18c   : > { %v4404_v13 = vpack.c.b16 %v1198_v9, %v1198_v9  ;;  %v4417_v9 = vpack.c.bf16 %v957_v11, %v957_v11 }
 0x18d   : > { %v944_v12 = vpop.f32.mrf.mxu0 }
 0x18e   : > { %v945_v6 = vadd.f32 %v4323_v4, %v944_v12  ;;  %1200 = vrot.lane.b32.xlu1 %v4404_v13, %s3966_s24  ;;  %v4421_v12 = vpack.c.bf16 %v952_v46, %v952_v46  ;;  %v1342_v3 = vunpack.c.l.b16 %v4417_v9  ;;  %v4434_v46 = vpack.c.bf16 %v955_v24, %v955_v24 }
 0x190   : > { %v4411_v48 = vpack.c.bf16 %v945_v6, %v945_v6  ;;  %v1294_v11 = vunpack.c.l.b16 %v4421_v12 }
 0x192   : > { %v1222_v50 = vunpack.c.l.b16 %v4411_v48  ;;  %v4440_v55 = vpack.c.b16 %v1294_v11, %v1294_v11 }
 0x194   : > { %v4419_v18 = vpack.c.b16 %v1222_v50, %v1222_v50 }
 0x195   : > { %v946_v26 = vpop.f32.mrf.mxu0 }
 0x196   : > { %v947_v60 = vadd.f32 %v4323_v4, %v946_v26  ;;  %1272 = vrot.lane.b32.xlu1 %v4415_v22, %s3966_s24  ;;  %1224 = vrot.lane.b32.xlu2 %v4419_v18, %s3966_s24  ;;  %v4438_v26 = vpack.c.b16 %v1342_v3, %v1342_v3 }
 0x198   : > { %v4430_v6 = vpack.c.bf16 %v947_v60, %v947_v60  ;;  %v1318_v60 = vunpack.c.l.b16 %v4434_v46 }
 0x19a   : > { %v1246_v35 = vunpack.c.l.b16 %v4430_v6  ;;  %v4450_v24 = vpack.c.b16 %v1318_v60, %v1318_v60 }
 0x19c   : > { %v4436_v50 = vpack.c.b16 %v1246_v35, %v1246_v35 }
 0x19e   : > { %1248 = vrot.lane.b32.xlu0 %v4436_v50, %s3966_s24  ;;  %1344 = vrot.lane.b32.xlu1 %v4438_v26, %s3966_s24 }
 0x19f   : > { %1296 = vrot.lane.b32.xlu2 %v4440_v55, %s3966_s24 }
 0x1a0   : > { %v985_v4 = vpop.permute.xlu2 %984 }
 0x1a1   : > { %v990_v31 = vsel %vm885_vm0, %v985_v4, 0 }
 0x1a2   : > { %999 = vmatpush.bf16.xpose.msra.mxu1 %v990_v31 }
 0x1a6   : > { %1320 = vrot.lane.b32.xlu0 %v4450_v24, %s3966_s24  ;;  %1633 = vrot.lane.b32.xlu1 %v4345_v2, %s3967_s25 }
 0x1a7   : > { %1590 = vrot.lane.b32.xlu2 %v4329_v36, %s3967_s25 }
 0x1a9   : > { %3516 = vmatmul.msk.bf16.vlgmr.msra.gmra.mxu1 %vm885_vm0, %v4326_v34 }
 0x1ae   : > { %1612 = vrot.lane.b32.xlu0 %v4337_v47, %s3967_s25 }
 0x1af   : > { %1654 = vrot.lane.b32.xlu2 %v4353_v1, %s3967_s25 }
 0x1b6   : > { %1675 = vrot.lane.b32.xlu0 %v4361_v28, %s3967_s25 }
 0x1b7   : > { %1696 = vrot.lane.b32.xlu2 %v4369_v32, %s3967_s25 }
 0x1c0   : > { %v1009_v3 = vpop.permute.xlu1 %1008  ;;  %v1081_v2 = vpop.permute.xlu2 %1080 }
 0x1c1   : > { %v1014_v11 = vsel %vm885_vm0, %v1009_v3, 0  ;;  %v1086_v36 = vsel %vm885_vm0, %v1081_v2, 0 }
 0x1c2   : > { %1023 = vmatpush.bf16.xpose.msra.mxu2 %v1014_v11 }
 0x1c8   : > { %v1033_v34 = vpop.permute.xlu0 %1032 }
 0x1c9   : > { %3517 = vmatmul.msk.bf16.vlgmr.msra.gmra.mxu2 %vm885_vm0, %v4334_v43  ;;  %v1038_v47 = vsel %vm885_vm0, %v1033_v34, 0 }
 0x1ca   : > { %1095 = vmatpush.bf16.xpose.msrb.mxu2 %v1086_v36  ;;  %1047 = vmatpush.bf16.xpose.msrb.mxu3 %v1038_v47 }
 0x1d0   : > { %v1057_v1 = vpop.permute.xlu1 %1056  ;;  %v1129_v28 = vpop.permute.xlu2 %1128 }
 0x1d1   : > { %v1134_v35 = vsel %vm885_vm0, %v1129_v28, 0  ;;  %3518 = vmatmul.msk.bf16.vlgmr.msrb.gmra.mxu3 %vm885_vm0, %v4342_v59  ;;  %v1062_v32 = vsel %vm885_vm0, %v1057_v1, 0 }
 0x1d2   : > { %1071 = vmatpush.bf16.xpose.msrb.mxu1 %v1062_v32 }
 0x1d9   : > { %3519 = vmatmul.msk.bf16.vlgmr.msrb.gmra.mxu1 %vm885_vm0, %v4350_v7  ;;  %3520 = vmatmul.msk.bf16.vlgmr.msrb.gmra.mxu2 %vm885_vm0, %v4358_v16 }
 0x1da   : > { %1143 = vmatpush.bf16.xpose.msra.mxu1 %v1134_v35 }
 0x1e0   : > { %v1105_v43 = vpop.permute.xlu0 %1104 }
 0x1e1   : > { %v1110_v60 = vsel %vm885_vm0, %v1105_v43, 0 }
 0x1e2   : > { %1119 = vmatpush.bf16.xpose.msra.mxu3 %v1110_v60 }
 0x1e9   : > { %3521 = vmatmul.msk.bf16.vlgmr.msra.gmra.mxu3 %vm885_vm0, %v4366_v30  ;;  %3522 = vmatmul.msk.bf16.vlgmr.msra.gmra.mxu1 %vm885_vm0, %v4374_v39 }
 0x1f0   : > { %v1153_v59 = vpop.permute.xlu1 %1152  ;;  %v1225_v4 = vpop.permute.xlu2 %1224 }
 0x1f1   : > { %v1158_v31 = vsel %vm885_vm0, %v1153_v59, 0  ;;  %v1230_v3 = vsel %vm885_vm0, %v1225_v4, 0  ;;  %v5697_v4 = vlaneseq }
 0x1f2   : > { %1167 = vmatpush.bf16.xpose.msra.mxu2 %v1158_v31 }
 0x1f3   : > { %v4513_v31 = vand.u32 127, %v5697_v4 }
 0x1f5   : > { %vm963_vm2 = vcmp.ge.s32.totalorder %v4107_v25, %v4513_v31 }
 0x1f8   : > { %v1177_v7 = vpop.permute.xlu0 %1176 }
 0x1f9   : > { %v1182_v16 = vsel %vm885_vm0, %v1177_v7, 0  ;;  %v1297_v2 = vpop.permute.xlu2 %1296  ;;  %3523 = vmatmul.msk.bf16.vlgmr.msra.gmra.mxu2 %vm885_vm0, %v4382_v51 }
 0x1fa   : > { %1239 = vmatpush.bf16.xpose.msrb.mxu2 %v1230_v3  ;;  %v1302_v30 = vsel %vm885_vm0, %v1297_v2, 0  ;;  %1191 = vmatpush.bf16.xpose.msrb.mxu3 %v1182_v16 }
 0x200   : > { %v1201_v39 = vpop.permute.xlu1 %1200 }
 0x201   : > { %v1206_v11 = vsel %vm885_vm0, %v1201_v39, 0  ;;  %3524 = vmatmul.msk.bf16.vlgmr.msrb.gmra.mxu3 %vm885_vm0, %v4390_v29  ;;  %v1591_v36 = vpop.permute.xlu2 %1590 }
 0x202   : > { %1311 = vmatpush.bf16.xpose.msra.mxu2 %v1302_v30  ;;  %1215 = vmatpush.bf16.xpose.msrb.mxu1 %v1206_v11  ;;  %v1597_v47 = vsel %vm1595_vm1, %v1591_v36, 0 }
 0x208   : > { %v1273_v34 = vpop.permute.xlu1 %1272 }
 0x209   : > { %v1278_v1 = vsel %vm885_vm0, %v1273_v34, 0  ;;  %3525 = vmatmul.msk.bf16.vlgmr.msrb.gmra.mxu1 %vm885_vm0, %v4399_v62  ;;  %3526 = vmatmul.msk.bf16.vlgmr.msrb.gmra.mxu2 %vm885_vm0, %v4411_v48  ;;  %v1655_v32 = vpop.permute.xlu2 %1654 }
 0x20a   : > { %1606 = vmatpush.bf16.msrb.mxu2 %v1597_v47  ;;  %1287 = vmatpush.bf16.xpose.msra.mxu1 %v1278_v1  ;;  %v1660_v48 = vsel %vm1595_vm1, %v1655_v32, 0 }
 0x210   : > { %v1249_v51 = vpop.permute.xlu0 %1248  ;;  %v1345_v28 = vpop.permute.xlu1 %1344 }
 0x211   : > { %v1254_v29 = vsel %vm885_vm0, %v1249_v51, 0  ;;  %v1350_v35 = vsel %vm885_vm0, %v1345_v28, 0  ;;  %v1697_v16 = vpop.permute.xlu2 %1696 }
 0x212   : > { %1263 = vmatpush.bf16.xpose.msra.mxu3 %v1254_v29  ;;  %1359 = vmatpush.bf16.xpose.msrb.mxu1 %v1350_v35  ;;  %v1702_v39 = vsel %vm1595_vm1, %v1697_v16, 0 }
 0x218   : > { %v1321_v43 = vpop.permute.xlu0 %1320  ;;  %v1634_v60 = vpop.permute.xlu1 %1633 }
 0x219   : > { %v1326_v59 = vsel %vm885_vm0, %v1321_v43, 0  ;;  %v1639_v62 = vsel %vm1595_vm1, %v1634_v60, 0  ;;  %3527 = vmatmul.msk.bf16.vlgmr.msra.gmra.mxu3 %vm885_vm0, %v4430_v6  ;;  %3528 = vmatmul.msk.bf16.vlgmr.msra.gmra.mxu1 %vm885_vm0, %v4402_v15  ;;  %v3968_v6 = vmov -1e+09  }
 0x21a   : > { %3529 = vmatmul.msk.bf16.vlgmr.msra.gmra.mxu2 %vm885_vm0, %v4421_v12  ;;  %1335 = vmatpush.bf16.xpose.msrb.mxu3 %v1326_v59  ;;  %v4518_v15 = vsel %vm963_vm2, 0.0, %v3968_v6 }
 0x21b   : > { %1669 = vmatpush.bf16.msra.mxu2 %v1660_v48  ;;  %1648 = vmatpush.bf16.msra.mxu1 %v1639_v62 }
 0x220   : > { %v1613_v3 = vpop.permute.xlu0 %1612 }
 0x221   : > { %v1618_v7 = vsel %vm1595_vm1, %v1613_v3, 0 }
 0x222   : > { %1627 = vmatpush.bf16.msra.mxu3 %v1618_v7 }
 0x226   : > { %v1001_v2 = vpop.f32.mrf.mxu1 }
 0x227   : > { %v1365_v30 = vmul.f32 0.17677669, %v1001_v2 }
 0x228   : > { %v1676_v12 = vpop.permute.xlu0 %1675 }
 0x229   : > { %v1681_v11 = vsel %vm1595_vm1, %v1676_v12, 0  ;;  %3530 = vmatmul.msk.bf16.vlgmr.msrb.gmra.mxu3 %vm885_vm0, %v4434_v46  ;;  %3531 = vmatmul.msk.bf16.vlgmr.msrb.gmra.mxu1 %vm885_vm0, %v4417_v9  ;;  %v4527_v25 = vadd.f32 %v1365_v30, %v4518_v15 }
 0x22a   : > { %1711 = vmatpush.bf16.msrb.mxu1 %v1702_v39  ;;  %1690 = vmatpush.bf16.msrb.mxu3 %v1681_v11 }
 0x22b   : > { %v1398_v36 = vsel %vm1397_vm3, %v4527_v25, -inf }
 0x22c   : > { %1399 = vmax.xlane.f32.xlu2 %v1398_v36 }
 0x22e   : > { %v1003_v34 = vpop.f32.mrf.mxu1 }
 0x24c   : > { %v1025_v47 = vpop.f32.mrf.mxu2 }
 0x24d   : > { %v1366_v1 = vmul.f32 0.17677669, %v1025_v47 }
 0x24f   : > { %v4532_v51 = vadd.f32 %v1366_v1, %v4518_v15 }
 0x251   : > { %v1401_v46 = vsel %vm1397_vm3, %v4532_v51, -inf }
 0x252   : > { %1402 = vmax.xlane.f32.xlu0 %v1401_v46 }
 0x254   : > { %v1027_v9 = vpop.f32.mrf.mxu2  ;;  %v1049_v28 = vpop.f32.mrf.mxu3 }
 0x255   : > { %v1367_v29 = vmul.f32 0.17677669, %v1049_v28 }
 0x256   : > { %v1073_v35 = vpop.f32.mrf.mxu1 }
 0x257   : > { %v1368_v32 = vmul.f32 0.17677669, %v1073_v35  ;;  %v4537_v43 = vadd.f32 %v1367_v29, %v4518_v15 }
 0x259   : > { %v1404_v60 = vsel %vm1397_vm3, %v4537_v43, -inf  ;;  %v4542_v59 = vadd.f32 %v1368_v32, %v4518_v15 }
 0x25a   : > { %1405 = vmax.xlane.f32.xlu2 %v1404_v60 }
 0x25b   : > { %v1407_v62 = vsel %vm1397_vm3, %v4542_v59, -inf }
 0x25c   : > { %v1051_v48 = vpop.f32.mrf.mxu3  ;;  %1408 = vmax.xlane.f32.xlu1 %v1407_v62  ;;  %v1097_v4 = vpop.f32.mrf.mxu2 }
 0x25d   : > { %v1369_v3 = vmul.f32 0.17677669, %v1097_v4 }
 0x25e   : > { %v1075_v7 = vpop.f32.mrf.mxu1 }
 0x25f   : > { %v4547_v6 = vadd.f32 %v1369_v3, %v4518_v15 }
 0x261   : > { %v1410_v16 = vsel %vm1397_vm3, %v4547_v6, -inf }
 0x262   : > { %1411 = vmax.xlane.f32.xlu2 %v1410_v16 }
 0x264   : > { %v1099_v2 = vpop.f32.mrf.mxu2 }
 0x266   : > { %v1145_v30 = vpop.f32.mrf.mxu1 }
 0x267   : > { %v1371_v12 = vmul.f32 0.17677669, %v1145_v30 }
 0x269   : > { %v4552_v39 = vadd.f32 %v1371_v12, %v4518_v15 }
 0x26b   : > { %v1416_v11 = vsel %vm1397_vm3, %v4552_v39, -inf }
 0x26c   : > { %v1121_v36 = vpop.f32.mrf.mxu3  ;;  %1417 = vmax.xlane.f32.xlu1 %v1416_v11 }
 0x26d   : > { %v1370_v34 = vmul.f32 0.17677669, %v1121_v36 }
 0x26e   : > { %v1147_v47 = vpop.f32.mrf.mxu1 }
 0x26f   : > { %v4557_v1 = vadd.f32 %v1370_v34, %v4518_v15 }
 0x271   : > { %v1413_v46 = vsel %vm1397_vm3, %v4557_v1, -inf }
 0x272   : > { %1414 = vmax.xlane.f32.xlu0 %v1413_v46 }
 0x274   : > { %v1123_v9 = vpop.f32.mrf.mxu3 }
 0x27c   : > { %v1169_v28 = vpop.f32.mrf.mxu2 }
 0x27d   : > { %v1372_v29 = vmul.f32 0.17677669, %v1169_v28 }
 0x27f   : > { %v4562_v35 = vadd.f32 %v1372_v29, %v4518_v15 }
 0x281   : > { %v1419_v32 = vsel %vm1397_vm3, %v4562_v35, -inf }
 0x282   : > { %1420 = vmax.xlane.f32.xlu2 %v1419_v32 }
 0x284   : > { %v1171_v60 = vpop.f32.mrf.mxu2  ;;  %v1193_v62 = vpop.f32.mrf.mxu3 }
 0x285   : > { %v1373_v48 = vmul.f32 0.17677669, %v1193_v62 }
 0x286   : > { %v1217_v4 = vpop.f32.mrf.mxu1 }
 0x287   : > { %v4567_v3 = vadd.f32 %v1373_v48, %v4518_v15  ;;  %v1374_v7 = vmul.f32 0.17677669, %v1217_v4 }
 0x289   : > { %v1422_v16 = vsel %vm1397_vm3, %v4567_v3, -inf  ;;  %v4572_v12 = vadd.f32 %v1374_v7, %v4518_v15 }
 0x28a   : > { %1423 = vmax.xlane.f32.xlu1 %v1422_v16 }
 0x28b   : > { %v1425_v34 = vsel %vm1397_vm3, %v4572_v12, -inf }
 0x28c   : > { %v1195_v2 = vpop.f32.mrf.mxu3  ;;  %v1241_v30 = vpop.f32.mrf.mxu2 }
 0x28d   : > { %v1375_v36 = vmul.f32 0.17677669, %v1241_v30 }
 0x28e   : > { %v1219_v11 = vpop.f32.mrf.mxu1 }
 0x28f   : > { %v4577_v46 = vadd.f32 %v1375_v36, %v4518_v15 }
 0x291   : > { %v1428_v29 = vsel %vm1397_vm3, %v4577_v46, -inf }
 0x292   : > { %1426 = vmax.xlane.f32.xlu1 %v1425_v34 }
 0x294   : > { %v1243_v47 = vpop.f32.mrf.mxu2 }
 0x296   : > { %v1289_v9 = vpop.f32.mrf.mxu1 }
 0x297   : > { %v1377_v28 = vmul.f32 0.17677669, %v1289_v9 }
 0x299   : > { %v4582_v48 = vadd.f32 %v1377_v28, %v4518_v15 }
 0x29a   : > { %1429 = vmax.xlane.f32.xlu1 %v1428_v29 }
 0x29b   : > { %v1434_v36 = vsel %vm1397_vm3, %v4582_v48, -inf }
 0x29c   : > { %v1265_v32 = vpop.f32.mrf.mxu3 }
 0x29d   : > { %v1376_v60 = vmul.f32 0.17677669, %v1265_v32  ;;  %v1313_v62 = vpop.f32.mrf.mxu2 }
 0x29e   : > { %v1291_v4 = vpop.f32.mrf.mxu1  ;;  %v1378_v30 = vmul.f32 0.17677669, %v1313_v62 }
 0x29f   : > { %v1400_v7 = vpop.xlane.xlu2 %1399  ;;  %v4585_v16 = vadd.f32 %v1376_v60, %v4518_v15 }
 0x2a0   : > { %v1446_v2 = vsub.f32 %v4527_v25, %v1400_v7  ;;  %v4593_v28 = vadd.f32 %v1378_v30, %v4518_v15 }
 0x2a1   : > { %v1431_v11 = vsel %vm1397_vm3, %v4585_v16, -inf }
 0x2a2   : > { %v1462_v34 = vmul.f32 1.442695, %v1446_v2  ;;  %1432 = vmax.xlane.f32.xlu2 %v1431_v11  ;;  %1435 = vmax.xlane.f32.xlu1 %v1434_v36  ;;  %v1437_v25 = vsel %vm1397_vm3, %v4593_v28, -inf }
 0x2a4   : > { %3807 = vpow2.f32 %v1462_v34  ;;  %v1267_v47 = vpop.f32.mrf.mxu3 }
 0x2a5   : > { %v1315_v9 = vpop.f32.mrf.mxu2 }
 0x2a6   : > { %v4595_v29 = vpop.f32.mrf.mxu1 }
 0x2aa   : > { %v4599_v32 = vpop.eup %3807  ;;  %1438 = vmax.xlane.f32.xlu1 %v1437_v25 }
 0x2ab   : > { %v1494_v60 = vsel %vm1397_vm3, %v4599_v32, 0.0 }
 0x2ac   : > { %v1337_v62 = vpop.f32.mrf.mxu3  ;;  %1495 = vadd.xlane.f32.xlu0 %v1494_v60 }
 0x2ad   : > { %v1379_v4 = vmul.f32 0.17677669, %v1337_v62 }
 0x2ae   : > { %v1363_v7 = vpop.f32.mrf.mxu1 }
 0x2af   : > { %v4604_v2 = vadd.f32 %v1379_v4, %v4518_v15 }
 0x2b1   : > { %v1440_v30 = vsel %vm1397_vm3, %v4604_v2, -inf }
 0x2b2   : > { %1441 = vmax.xlane.f32.xlu2 %v1440_v30 }
 0x2b4   : > { %v1339_v11 = vpop.f32.mrf.mxu3 }
 0x2c0   : > { %1738 = vrot.lane.b32.xlu0 %v4385_v14, %s3967_s25 }
 0x2c5   : > { %v1403_v36 = vpop.xlane.xlu0 %1402 }
 0x2c6   : > { %v1447_v34 = vsub.f32 %v4532_v51, %v1403_v36 }
 0x2c8   : > { %v1464_v47 = vmul.f32 1.442695, %v1447_v34 }
 0x2ca   : > { %3809 = vpow2.f32 %v1464_v47  ;;  %1759 = vrot.lane.b32.xlu2 %v4393_v33, %s3967_s25 }
 0x2cd   : > { %v1406_v60 = vpop.xlane.xlu2 %1405 }
 0x2ce   : > { %v1448_v14 = vsub.f32 %v4537_v43, %v1406_v60 }
 0x2cf   : > { %v1409_v4 = vpop.xlane.xlu1 %1408 }
 0x2d0   : > { %v4613_v9 = vpop.eup %3809  ;;  %v1466_v62 = vmul.f32 1.442695, %v1448_v14 }
 0x2d1   : > { %v1497_v25 = vsel %vm1397_vm3, %v4613_v9, 0.0 }
 0x2d2   : > { %1780 = vrot.lane.b32.xlu2 %v4404_v13, %s3967_s25  ;;  %1498 = vadd.xlane.f32.xlu1 %v1497_v25  ;;  %3811 = vpow2.f32 %v1466_v62 }
 0x2d5   : > { %v1412_v43 = vpop.xlane.xlu2 %1411 }
 0x2d8   : > { %v4620_v30 = vpop.eup %3811 }
 0x2d9   : > { %v1500_v34 = vsel %vm1397_vm3, %v4620_v30, 0.0 }
 0x2df   : > { %v1418_v51 = vpop.xlane.xlu1 %1417 }
 0x2e0   : > { %v1452_v11 = vsub.f32 %v4552_v39, %v1418_v51 }
 0x2e2   : > { %v1474_v13 = vmul.f32 1.442695, %v1452_v11 }
 0x2e5   : > { %v1415_v7 = vpop.xlane.xlu0 %1414 }
 0x2e6   : > { %v1451_v33 = vsub.f32 %v4557_v1, %v1415_v7 }
 0x2e8   : > { %v1472_v36 = vmul.f32 1.442695, %v1451_v33 }
 0x2ea   : > { %3813 = vpow2.f32 %v1472_v36  ;;  %1501 = vadd.xlane.f32.xlu0 %v1500_v34  ;;  %v1449_v36 = vsub.f32 %v4542_v59, %v1409_v4  ;;  %v1450_v4 = vsub.f32 %v4547_v6, %v1412_v43 }
 0x2eb   : > { %1717 = vrot.lane.b32.xlu1 %v4377_v49, %s3967_s25  ;;  %3815 = vpow2.f32 %v1474_v13 }
 0x2ec   : > { %v1468_v13 = vmul.f32 1.442695, %v1449_v36 }
 0x2f0   : > { %v4628_v47 = vpop.eup %3813 }
 0x2f1   : > { %v1509_v25 = vsel %vm1397_vm3, %v4628_v47, 0.0  ;;  %v4632_v39 = vpop.eup %3815 }
 0x2f2   : > { %1510 = vadd.xlane.f32.xlu0 %v1509_v25  ;;  %v1512_v62 = vsel %vm1397_vm3, %v4632_v39, 0.0 }
 0x2f5   : > { %v1421_v1 = vpop.xlane.xlu2 %1420 }
 0x2f6   : > { %v1453_v60 = vsub.f32 %v4562_v35, %v1421_v1 }
 0x2f8   : > { %v1476_v14 = vmul.f32 1.442695, %v1453_v60 }
 0x2fa   : > { %3817 = vpow2.f32 %v1476_v14  ;;  %1513 = vadd.xlane.f32.xlu0 %v1512_v62 }
 0x2fd   : > { %v1424_v49 = vpop.xlane.xlu1 %1423 }
 0x2fe   : > { %v1454_v51 = vsub.f32 %v4567_v3, %v1424_v49 }
 0x300   : > { %v4638_v7 = vpop.eup %3817  ;;  %v1478_v33 = vmul.f32 1.442695, %v1454_v51  ;;  %v1470_v51 = vmul.f32 1.442695, %v1450_v4 }
 0x301   : > { %v1515_v11 = vsel %vm1397_vm3, %v4638_v7, 0.0 }
 0x302   : > { %3819 = vpow2.f32 %v1478_v33  ;;  %1516 = vadd.xlane.f32.xlu2 %v1515_v11 }
 0x305   : > { %v1427_v35 = vpop.xlane.xlu1 %1426 }
 0x306   : > { %v1455_v34 = vsub.f32 %v4572_v12, %v1427_v35  ;;  %v1380_v12 = vmul.f32 0.17677669, %v4595_v29 }
 0x308   : > { %v4644_v25 = vpop.eup %3819  ;;  %v1480_v1 = vmul.f32 1.442695, %v1455_v34  ;;  %v4660_v35 = vadd.f32 %v1380_v12, %v4518_v15 }
 0x309   : > { %v1518_v3 = vsel %vm1397_vm3, %v4644_v25, 0.0 }
 0x30a   : > { %3821 = vpow2.f32 %v1480_v1  ;;  %1519 = vadd.xlane.f32.xlu2 %v1518_v3  ;;  %v1443_v6 = vsel %vm1397_vm3, %v4660_v35, -inf }
 0x30b   : > { %3823 = vpow2.f32 %v1468_v13 }
 0x30c   : > { %3825 = vpow2.f32 %v1470_v51 }
 0x30d   : > { %v1430_v11 = vpop.xlane.xlu1 %1429 }
 0x30e   : > { %v1456_v34 = vsub.f32 %v4577_v46, %v1430_v11 }
 0x310   : > { %v4648_v60 = vpop.eup %3821  ;;  %v1482_v29 = vmul.f32 1.442695, %v1456_v34 }
 0x311   : > { %v4650_v14 = vpop.eup %3823  ;;  %v1521_v59 = vsel %vm1397_vm3, %v4648_v60, 0.0 }
 0x312   : > { %1522 = vadd.xlane.f32.xlu0 %v1521_v59  ;;  %v1503_v62 = vsel %vm1397_vm3, %v4650_v14, 0.0  ;;  %v4665_v13 = vpop.eup %3825 }
 0x313   : > { %v1506_v15 = vsel %vm1397_vm3, %v4665_v13, 0.0 }
 0x315   : > { %1504 = vadd.xlane.f32.xlu1 %v1503_v62  ;;  %v1433_v49 = vpop.xlane.xlu2 %1432 }
 0x316   : > { %v1457_v33 = vsub.f32 %v4585_v16, %v1433_v49 }
 0x318   : > { %v1484_v36 = vmul.f32 1.442695, %v1457_v33  ;;  %v1436_v33 = vpop.xlane.xlu1 %1435 }
 0x31a   : > { %3827 = vpow2.f32 %v1484_v36 }
 0x31d   : > { %1444 = vmax.xlane.f32.xlu1 %v1443_v6 }
 0x31f   : > { %v1496_v43 = vpop.xlane.xlu0 %1495 }
 0x320   : > { %3829 = vrcp.f32 %v1496_v43  ;;  %v4667_v1 = vpop.eup %3827 }
 0x321   : > { %v1527_v16 = vsel %vm1397_vm3, %v4667_v1, 0.0  ;;  %3831 = vpow2.f32 %v1482_v29 }
 0x322   : > { %1528 = vadd.xlane.f32.xlu2 %v1527_v16 }
 0x325   : > { %1507 = vadd.xlane.f32.xlu1 %v1506_v15  ;;  %v1442_v46 = vpop.xlane.xlu2 %1441 }
 0x326   : > { %v3830_v3 = vpop.eup %3829  ;;  %1822 = vrot.lane.b32.xlu0 %v4436_v50, %s3967_s25  ;;  %v1458_v50 = vsub.f32 %v4582_v48, %v1436_v33  ;;  %v1460_v34 = vsub.f32 %v4604_v2, %v1442_v46 }
 0x327   : > { %v1558_v59 = vmul.f32 %v3830_v3, %v4599_v32  ;;  %v4676_v4 = vpop.eup %3831  ;;  %v1439_v32 = vpop.xlane.xlu1 %1438 }
 0x328   : > { %v1524_v62 = vsel %vm1397_vm3, %v4676_v4, 0.0  ;;  %v1486_v11 = vmul.f32 1.442695, %v1458_v50  ;;  %v1490_v6 = vmul.f32 1.442695, %v1460_v34  ;;  %v1459_v46 = vsub.f32 %v4593_v28, %v1439_v32 }
 0x329   : > { %v1574_v12 = vpack.c.bf16 %v1558_v59, %v1558_v59 }
 0x32a   : > { %3833 = vpow2.f32 %v1486_v11  ;;  %v1488_v59 = vmul.f32 1.442695, %v1459_v46 }
 0x32b   : > { %3532 = vmatmul.msk.bf16.vlgmr.msrb.gmra.mxu2 %vm1397_vm3, %v1574_v12 }
 0x32d   : > { %1525 = vadd.xlane.f32.xlu1 %v1524_v62  ;;  %v1760_v49 = vpop.permute.xlu2 %1759 }
 0x32e   : > { %v1765_v51 = vsel %vm1595_vm1, %v1760_v49, 0 }
 0x32f   : > { %1774 = vmatpush.bf16.msrb.mxu0 %v1765_v51 }
 0x330   : > { %v4690_v29 = vpop.eup %3833 }
 0x331   : > { %v1530_v16 = vsel %vm1397_vm3, %v4690_v29, 0.0 }
 0x332   : > { %v1739_v43 = vpop.permute.xlu0 %1738 }
 0x333   : > { %v1744_v2 = vsel %vm1595_vm1, %v1739_v43, 0 }
 0x335   : > { %v1781_v49 = vpop.permute.xlu2 %1780 }
 0x336   : > { %v1786_v50 = vsel %vm1595_vm1, %v1781_v49, 0 }
 0x33a   : > { %1843 = vrot.lane.b32.xlu2 %v4415_v22, %s3967_s25 }
 0x342   : > { %1864 = vrot.lane.b32.xlu2 %v4440_v55, %s3967_s25 }
 0x345   : > { %v1499_v36 = vpop.xlane.xlu1 %1498 }
 0x346   : > { %3835 = vrcp.f32 %v1499_v36  ;;  %1801 = vrot.lane.b32.xlu1 %v4419_v18, %s3967_s25 }
 0x347   : > { %3837 = vpow2.f32 %v1490_v6 }
 0x34a   : > { %1885 = vrot.lane.b32.xlu2 %v4450_v24, %s3967_s25 }
 0x34c   : > { %v3836_v22 = vpop.eup %3835 }
 0x34d   : > { %v1559_v48 = vmul.f32 %v3836_v22, %v4613_v9  ;;  %v4699_v18 = vpop.eup %3837 }
 0x34e   : > { %v1536_v24 = vsel %vm1397_vm3, %v4699_v18, 0.0 }
 0x34f   : > { %v1575_v55 = vpack.c.bf16 %v1559_v48, %v1559_v48 }
 0x350   : > { %1531 = vadd.xlane.f32.xlu0 %v1530_v16 }
 0x351   : > { %3533 = vmatmul.msk.bf16.vlgmr.msra.gmra.mxu3 %vm1397_vm3, %v1575_v55 }
 0x352   : > { %1753 = vmatpush.bf16.msra.mxu3 %v1744_v2 }
 0x358   : > { %1537 = vadd.xlane.f32.xlu0 %v1536_v24 }
 0x35d   : > { %v1718_v15 = vpop.permute.xlu1 %1717  ;;  %v1502_v9 = vpop.xlane.xlu0 %1501 }
 0x35e   : > { %v1723_v3 = vsel %vm1595_vm1, %v1718_v15, 0  ;;  %3839 = vrcp.f32 %v1502_v9 }
 0x35f   : > { %1732 = vmatpush.bf16.msrb.mxu2 %v1723_v3  ;;  %3841 = vpow2.f32 %v1488_v59 }
 0x364   : > { %v3840_v12 = vpop.eup %3839 }
 0x365   : > { %v1560_v62 = vmul.f32 %v3840_v12, %v4620_v30  ;;  %v1511_v33 = vpop.xlane.xlu0 %1510  ;;  %v4708_v11 = vpop.eup %3841 }
 0x366   : > { %3843 = vrcp.f32 %v1511_v33  ;;  %v1533_v28 = vsel %vm1397_vm3, %v4708_v11, 0.0 }
 0x367   : > { %v1576_v51 = vpack.c.bf16 %v1560_v62, %v1560_v62 }
 0x369   : > { %3534 = vmatmul.msk.bf16.vlgmr.msra.gmra.mxu1 %vm1397_vm3, %v1576_v51 }
 0x36a   : > { %1795 = vmatpush.bf16.msra.mxu1 %v1786_v50 }
 0x36c   : > { %1906 = vrot.lane.b32.xlu0 %v4438_v26, %s3967_s25  ;;  %v3844_v32 = vpop.eup %3843 }
 0x36d   : > { %v1563_v30 = vmul.f32 %v3844_v32, %v4628_v47  ;;  %v1514_v6 = vpop.xlane.xlu0 %1513 }
 0x36f   : > { %v1579_v34 = vpack.c.bf16 %v1563_v30, %v1563_v30 }
 0x370   : > { %1534 = vadd.xlane.f32.xlu1 %v1533_v28 }
 0x375   : > { %v1517_v36 = vpop.xlane.xlu2 %1516 }
 0x379   : > { %3537 = vmatmul.msk.bf16.vlgmr.msrb.gmra.mxu1 %vm1397_vm3, %v1579_v34 }
 0x37d   : > { %v1520_v22 = vpop.xlane.xlu2 %1519 }
 0x37e   : > { %3845 = vrcp.f32 %v1520_v22 }
 0x384   : > { %v3846_v48 = vpop.eup %3845 }
 0x385   : > { %v1566_v43 = vmul.f32 %v3846_v48, %v4644_v25  ;;  %v1523_v55 = vpop.xlane.xlu0 %1522 }
 0x386   : > { %3847 = vrcp.f32 %v1523_v55 }
 0x387   : > { %v1582_v26 = vpack.c.bf16 %v1566_v43, %v1566_v43 }
 0x388   : > { %v1505_v16 = vpop.xlane.xlu1 %1504 }
 0x389   : > { %3849 = vrcp.f32 %v1505_v16  ;;  %3540 = vmatmul.msk.bf16.vlgmr.msrb.gmra.mxu0 %vm1397_vm3, %v1582_v26 }
 0x38a   : > { %3851 = vrcp.f32 %v1514_v6 }
 0x38c   : > { %v3848_v2 = vpop.eup %3847 }
 0x38d   : > { %v1567_v47 = vmul.f32 %v3848_v2, %v4648_v60 }
 0x38f   : > { %v3850_v24 = vpop.eup %3849  ;;  %v1583_v15 = vpack.c.bf16 %v1567_v47, %v1567_v47 }
 0x390   : > { %v1561_v9 = vmul.f32 %v3850_v24, %v4650_v14  ;;  %v1445_v46 = vpop.xlane.xlu1 %1444  ;;  %v3852_v49 = vpop.eup %3851  ;;  %v3643_v24 = vld [vmem:[%s5679_s6 + $0x8] sm:$0xff] }
 0x391   : > { %v1461_v3 = vsub.f32 %v4660_v35, %v1445_v46  ;;  %3541 = vmatmul.msk.bf16.vlgmr.msra.gmra.mxu1 %vm1397_vm3, %v1583_v15  ;;  %v1564_v35 = vmul.f32 %v3852_v49, %v4632_v39 }
 0x392   : > { %v1577_v25 = vpack.c.bf16 %v1561_v9, %v1561_v9 }
 0x393   : > { %v1492_v59 = vmul.f32 1.442695, %v1461_v3  ;;  %v1580_v30 = vpack.c.bf16 %v1564_v35, %v1564_v35 }
 0x394   : > { %3535 = vmatmul.msk.bf16.vlgmr.msra.gmra.mxu2 %vm1397_vm3, %v1577_v25  ;;  %v3642_v25 = vld [vmem:[%s5679_s6] sm:$0xff] }
 0x395   : > { %3853 = vpow2.f32 %v1492_v59  ;;  %v1529_v12 = vpop.xlane.xlu2 %1528 }
 0x398   : > { %v1508_v62 = vpop.xlane.xlu1 %1507  ;;  %v1823_v32 = vpop.permute.xlu0 %1822 }
 0x399   : > { %3855 = vrcp.f32 %v1508_v62  ;;  %v1828_v6 = vsel %vm1595_vm1, %v1823_v32, 0 }
 0x39a   : > { %3857 = vrcp.f32 %v1517_v36 }
 0x39b   : > { %v4723_v60 = vpop.eup %3853 }
 0x39c   : > { %v1539_v14 = vsel %vm1397_vm3, %v4723_v60, 0.0 }
 0x39d   : > { %1540 = vadd.xlane.f32.xlu1 %v1539_v14  ;;  %v1844_v51 = vpop.permute.xlu2 %1843 }
 0x39e   : > { %v1849_v50 = vsel %vm1595_vm1, %v1844_v51, 0 }
 0x39f   : > { %v3856_v33 = vpop.eup %3855  ;;  %1858 = vmatpush.bf16.msra.mxu0 %v1849_v50 }
 0x3a0   : > { %v1562_v28 = vmul.f32 %v3856_v33, %v4665_v13  ;;  %v3858_v48 = vpop.eup %3857  ;;  %v1526_v43 = vpop.xlane.xlu1 %1525 }
 0x3a1   : > { %v1565_v13 = vmul.f32 %v3858_v48, %v4638_v7  ;;  %3859 = vrcp.f32 %v1526_v43 }
 0x3a2   : > { %v1578_v34 = vpack.c.bf16 %v1562_v28, %v1562_v28  ;;  %3861 = vrcp.f32 %v1529_v12 }
 0x3a3   : > { %v1581_v26 = vpack.c.bf16 %v1565_v13, %v1565_v13  ;;  %1982 = vmatpush.bf16.msrb.mxu0 %v3643_v24 }
 0x3a4   : > { %3536 = vmatmul.msk.bf16.vlgmr.msrb.gmra.mxu3 %vm1397_vm3, %v1578_v34  ;;  %3538 = vmatmul.msk.bf16.vlgmr.msrb.gmra.mxu2 %vm1397_vm3, %v1580_v30 }
 0x3a5   : > { %1837 = vmatpush.bf16.msrb.mxu3 %v1828_v6  ;;  %v1865_v22 = vpop.permute.xlu2 %1864 }
 0x3a6   : > { %v1870_v39 = vsel %vm1595_vm1, %v1865_v22, 0 }
 0x3a7   : > { %1879 = vmatpush.bf16.msrb.mxu1 %v1870_v39  ;;  %v3860_v16 = vpop.eup %3859  ;;  %1983 = vmatpush.bf16.msrb.mxu0 %v3642_v25 }
 0x3a8   : > { %v1568_v47 = vmul.f32 %v3860_v16, %v4676_v4  ;;  %v3862_v46 = vpop.eup %3861 }
 0x3a9   : > { %v1569_v4 = vmul.f32 %v3862_v46, %v4667_v1 }
 0x3aa   : > { %v1584_v3 = vpack.c.bf16 %v1568_v47, %v1568_v47 }
 0x3ab   : > { %v1585_v59 = vpack.c.bf16 %v1569_v4, %v1569_v4 }
 0x3ad   : > { %v1886_v36 = vpop.permute.xlu2 %1885 }
 0x3ae   : > { %v1608_v55 = vpop.f32.mrf.mxu2  ;;  %v1891_v7 = vsel %vm1595_vm1, %v1886_v36, 0 }
 0x3b4   : > { %3539 = vmatmul.msk.bf16.vlgmr.msra.gmra.mxu3 %vm1397_vm3, %v1581_v26 }
 0x3b6   : > { %v1610_v2 = vpop.f32.mrf.mxu2 }
 0x3b8   : > { %v1802_v15 = vpop.permute.xlu1 %1801 }
 0x3b9   : > { %v1807_v9 = vsel %vm1595_vm1, %v1802_v15, 0 }
 0x3ba   : > { %1816 = vmatpush.bf16.msra.mxu2 %v1807_v9 }
 0x3bd   : > { %3542 = vmatmul.msk.bf16.vlgmr.msra.gmra.mxu2 %vm1397_vm3, %v1584_v3 }
 0x3be   : > { %1900 = vmatpush.bf16.msrb.mxu2 %v1891_v7 }
 0x3c3   : > { %v1532_v12 = vpop.xlane.xlu0 %1531 }
 0x3c4   : > { %3863 = vrcp.f32 %v1532_v12  ;;  %3543 = vmatmul.msk.bf16.vlgmr.msrb.gmra.mxu3 %vm1397_vm3, %v1585_v59 }
 0x3ca   : > { %v3864_v62 = vpop.eup %3863 }
 0x3cb   : > { %v1570_v49 = vmul.f32 %v3864_v62, %v4690_v29  ;;  %v1538_v14 = vpop.xlane.xlu0 %1537 }
 0x3cc   : > { %3865 = vrcp.f32 %v1538_v14 }
 0x3cd   : > { %v1586_v35 = vpack.c.bf16 %v1570_v49, %v1570_v49 }
 0x3cf   : > { %3544 = vmatmul.msk.bf16.vlgmr.msra.gmra.mxu0 %vm1397_vm3, %v1586_v35 }
 0x3d2   : > { %v3866_v51 = vpop.eup %3865 }
 0x3d3   : > { %v1572_v33 = vmul.f32 %v3866_v51, %v4699_v18 }
 0x3d4   : > { %v1629_v50 = vpop.f32.mrf.mxu3 }
 0x3d5   : > { %v1588_v28 = vpack.c.bf16 %v1572_v33, %v1572_v33  ;;  %v1927_v32 = vpack.c.bf16 %v1629_v50, %v1608_v55 }
 0x3d7   : > { %3546 = vmatmul.msk.bf16.vlgmr.msrb.gmra.mxu2 %vm1397_vm3, %v1588_v28 }
 0x3dc   : > { %v1631_v1 = vpop.f32.mrf.mxu3 }
 0x3dd   : > { %v4765_v1 = vld [vmem:[%s5680_s7] sm:$0xff] }
 0x3de   : > { %v1907_v30 = vpop.permute.xlu0 %1906 }
 0x3df   : > { %v1912_v34 = vsel %vm1595_vm1, %v1907_v30, 0  ;;  %3556 = vmatmul.msk.bf16.vlgmr.msrb.gmra.mxu0 %vm885_vm0, %v1927_v32  ;;  %v4768_v30 = vperm.slane %v4765_v1, 0 }
 0x3e0   : > { %1921 = vmatpush.bf16.msra.mxu3 %v1912_v34 }
 0x3e3   : > { %v1535_v29 = vpop.xlane.xlu1 %1534 }
 0x3e4   : > { %3867 = vrcp.f32 %v1535_v29 }
 0x3e6   : > { %v1650_v6 = vpop.f32.mrf.mxu1 }
 0x3ea   : > { %v3868_v22 = vpop.eup %3867 }
 0x3eb   : > { %v1571_v39 = vmul.f32 %v3868_v22, %v4708_v11 }
 0x3ed   : > { %v1587_v48 = vpack.c.bf16 %v1571_v39, %v1571_v39 }
 0x3ee   : > { %v1652_v18 = vpop.f32.mrf.mxu1 }
 0x3ef   : > { %3545 = vmatmul.msk.bf16.vlgmr.msrb.gmra.mxu1 %vm1397_vm3, %v1587_v48 }
 0x3f6   : > { %v1713_v43 = vpop.f32.mrf.mxu1 }
 0x3fe   : > { %v1715_v13 = vpop.f32.mrf.mxu1 }
 0x406   : > { %v1776_v26 = vpop.f32.mrf.mxu0 }
 0x40e   : > { %v1778_v55 = vpop.f32.mrf.mxu0  ;;  %v1797_v16 = vpop.f32.mrf.mxu1 }
 0x40f   : > { %v1931_v35 = vpack.c.bf16 %v1797_v16, %v1776_v26 }
 0x410   : > { %v1541_v2 = vpop.xlane.xlu1 %1540 }
 0x411   : > { %3869 = vrcp.f32 %v1541_v2 }
 0x416   : > { %v1799_v47 = vpop.f32.mrf.mxu1 }
 0x417   : > { %v3870_v36 = vpop.eup %3869  ;;  %v1671_v24 = vpop.f32.mrf.mxu2 }
 0x418   : > { %v1573_v15 = vmul.f32 %v3870_v36, %v4723_v60  ;;  %v1928_v9 = vpack.c.bf16 %v1671_v24, %v1650_v6 }
 0x41a   : > { %v1589_v7 = vpack.c.bf16 %v1573_v15, %v1573_v15  ;;  %3557 = vmatmul.msk.bf16.gmra.mxu0 %vm885_vm0, %v1928_v9 }
 0x41c   : > { %3547 = vmatmul.msk.bf16.vlgmr.msra.gmra.mxu3 %vm1397_vm3, %v1589_v7 }
 0x41f   : > { %v1673_v11 = vpop.f32.mrf.mxu2 }
 0x427   : > { %v1692_v46 = vpop.f32.mrf.mxu3  ;;  %v1734_v3 = vpop.f32.mrf.mxu2 }
 0x428   : > { %v1929_v25 = vpack.c.bf16 %v1713_v43, %v1692_v46 }
 0x42a   : > { %3558 = vmatmul.msk.bf16.gmra.mxu0 %vm885_vm0, %v1929_v25 }
 0x42f   : > { %v1694_v4 = vpop.f32.mrf.mxu3  ;;  %v1736_v59 = vpop.f32.mrf.mxu2 }
 0x437   : > { %v1755_v12 = vpop.f32.mrf.mxu3 }
 0x438   : > { %v1930_v62 = vpack.c.bf16 %v1755_v12, %v1734_v3 }
 0x43a   : > { %3559 = vmatmul.msk.bf16.gmra.mxu0 %vm885_vm0, %v1930_v62 }
 0x43f   : > { %v1757_v49 = vpop.f32.mrf.mxu3 }
 0x440   : > { %v1818_v60 = vpop.f32.mrf.mxu2 }
 0x447   : > { %v1839_v14 = vpop.f32.mrf.mxu3 }
 0x448   : > { %v1820_v51 = vpop.f32.mrf.mxu2  ;;  %v1932_v32 = vpack.c.bf16 %v1839_v14, %v1818_v60 }
 0x44a   : > { %3560 = vmatmul.msk.bf16.gmra.mxu0 %vm885_vm0, %v1931_v35  ;;  %v3969_v35 = vmov 32.0  }
 0x44b   : > { %3871 = vrcp.f32 %v3969_v35 }
 0x44c   : > { %v1860_v33 = vpop.f32.mrf.mxu0 }
 0x44f   : > { %v1841_v50 = vpop.f32.mrf.mxu3 }
 0x451   : > { %v3872_v50 = vpop.eup %3871 }
 0x452   : > { %vm2094_vm4 = vweird.f32 %v3872_v50 }
 0x454   : > { %v1862_v28 = vpop.f32.mrf.mxu0 }
 0x45a   : > { %v1902_v34 = vpop.f32.mrf.mxu2  ;;  %3561 = vmatmul.msk.bf16.gmra.mxu0 %vm885_vm0, %v1932_v32 }
 0x45c   : > { %v1985_v29 = vpop.f32.mrf.mxu0 }
 0x45d   : > { %v1986_v6 = vadd.f32 %v1985_v29, %v4768_v30 }
 0x45f   : > { %v2025_v22 = vadd.f32 %v1986_v6, %v4198_v57 }
 0x461   : > { %v2041_v39 = vsel %vm885_vm0, %v2025_v22, 0.0 }
 0x462   : > { %2042 = vadd.xlane.f32.xlu1 %v2041_v39  ;;  %v1904_v48 = vpop.f32.mrf.mxu2 }
 0x464   : > { %v1987_v18 = vpop.f32.mrf.mxu0 }
 0x465   : > { %v1988_v43 = vadd.f32 %v1987_v18, %v4768_v30 }
 0x467   : > { %v2026_v13 = vadd.f32 %v1988_v43, %v4201_v58 }
 0x469   : > { %v2044_v26 = vsel %vm885_vm0, %v2026_v13, 0.0 }
 0x46a   : > { %2045 = vadd.xlane.f32.xlu2 %v2044_v26 }
 0x46c   : > { %v1881_v55 = vpop.f32.mrf.mxu1 }
 0x46d   : > { %v1933_v16 = vpack.c.bf16 %v1881_v55, %v1860_v33 }
 0x46f   : > { %3562 = vmatmul.msk.bf16.gmra.mxu0 %vm885_vm0, %v1933_v16 }
 0x474   : > { %v1883_v2 = vpop.f32.mrf.mxu1 }
 0x497   : > { %v1990_v47 = vpop.f32.mrf.mxu0 }
 0x498   : > { %v1991_v57 = vadd.f32 %v1990_v47, %v4768_v30 }
 0x49a   : > { %v4780_v36 = vadd.f32 %v1991_v57, %v4236_v40 }
 0x49c   : > { %v2047_v24 = vsel %vm885_vm0, %v4780_v36, 0.0 }
 0x49d   : > { %2048 = vadd.xlane.f32.xlu1 %v2047_v24 }
 0x49f   : > { %v1923_v15 = vpop.f32.mrf.mxu3  ;;  %v1992_v58 = vpop.f32.mrf.mxu0 }
 0x4a0   : > { %v1934_v9 = vpack.c.bf16 %v1923_v15, %v1902_v34  ;;  %v1993_v7 = vadd.f32 %v1992_v58, %v4768_v30 }
 0x4a2   : > { %3563 = vmatmul.msk.bf16.gmra.mxu0 %vm885_vm0, %v1934_v9  ;;  %v4787_v11 = vadd.f32 %v1993_v7, %v4239_v41 }
 0x4a4   : > { %v2050_v46 = vsel %vm885_vm0, %v4787_v11, 0.0 }
 0x4a5   : > { %2051 = vadd.xlane.f32.xlu1 %v2050_v46 }
 0x4a7   : > { %v1925_v40 = vpop.f32.mrf.mxu3  ;;  %v1995_v3 = vpop.f32.mrf.mxu0 }
 0x4a8   : > { %v1996_v25 = vadd.f32 %v1995_v3, %v4768_v30 }
 0x4aa   : > { %v4793_v4 = vadd.f32 %v1996_v25, %v4281_v52 }
 0x4ac   : > { %v2053_v59 = vsel %vm885_vm0, %v4793_v4, 0.0 }
 0x4ad   : > { %2054 = vadd.xlane.f32.xlu0 %v2053_v59 }
 0x4af   : > { %v1997_v12 = vpop.f32.mrf.mxu0 }
 0x4b0   : > { %v1998_v62 = vadd.f32 %v1997_v12, %v4768_v30 }
 0x4b2   : > { %v4799_v41 = vadd.f32 %v1998_v62, %v4284_v54  ;;  %v2090_v54 = vmul.f32 32.0, %v3872_v50 }
 0x4b4   : > { %v2056_v49 = vsel %vm885_vm0, %v4799_v41, 0.0  ;;  %v2091_v32 = vsub.f32 1.0, %v2090_v54 }
 0x4b5   : > { %2057 = vadd.xlane.f32.xlu1 %v2056_v49 }
 0x4b6   : > { %v2092_v34 = vmul.f32 %v3872_v50, %v2091_v32 }
 0x4b7   : > { %v2000_v60 = vpop.f32.mrf.mxu0 }
 0x4b8   : > { %v2001_v14 = vadd.f32 %v2000_v60, %v4768_v30  ;;  %v2093_v29 = vadd.f32 %v3872_v50, %v2092_v34 }
 0x4ba   : > { %v4805_v52 = vadd.f32 %v2001_v14, %v4309_v5  ;;  %v4809_v39 = vsel %vm2094_vm4, %v3872_v50, %v2093_v29 }
 0x4bc   : > { %v2059_v51 = vsel %vm885_vm0, %v4805_v52, 0.0 }
 0x4bd   : > { %2060 = vadd.xlane.f32.xlu2 %v2059_v51 }
 0x4bf   : > { %v2002_v33 = vpop.f32.mrf.mxu0 }
 0x4c0   : > { %v2003_v24 = vadd.f32 %v2002_v33, %v4768_v30 }
 0x4c2   : > { %v4827_v58 = vadd.f32 %v2003_v24, %v4306_v56 }
 0x4c4   : > { %v2062_v7 = vsel %vm885_vm0, %v4827_v58, 0.0 }
 0x4c7   : > { %v2005_v28 = vpop.f32.mrf.mxu0 }
 0x4c8   : > { %v2006_v59 = vadd.f32 %v2005_v28, %v4768_v30 }
 0x4ca   : > { %v4845_v62 = vadd.f32 %v2006_v59, %v4168_v10 }
 0x4cf   : > { %v2007_v6 = vpop.f32.mrf.mxu0 }
 0x4d0   : > { %v2008_v35 = vadd.f32 %v2007_v6, %v4768_v30 }
 0x4d2   : > { %v4862_v54 = vadd.f32 %v2008_v35, %v4249_v0 }
 0x4d4   : > { %v2068_v34 = vsel %vm885_vm0, %v4862_v54, 0.0 }
 0x4d5   : > { %v2043_v48 = vpop.xlane.xlu1 %2042 }
 0x4d6   : > { %v2096_v5 = vmul.f32 %v4809_v39, %v2043_v48 }
 0x4d7   : > { %v4814_v43 = vpop.f32.mrf.mxu0 }
 0x4d8   : > { %v4812_v18 = vsub.f32 %v2025_v22, %v2096_v5 }
 0x4da   : > { %v2128_v26 = vmul.f32 %v4812_v18, %v4812_v18 }
 0x4dc   : > { %v2144_v55 = vsel %vm885_vm0, %v2128_v26, 0.0 }
 0x4dd   : > { %2145 = vadd.xlane.f32.xlu1 %v2144_v55  ;;  %v2046_v16 = vpop.xlane.xlu2 %2045 }
 0x4de   : > { %v2097_v2 = vmul.f32 %v4809_v39, %v2046_v16 }
 0x4df   : > { %v2012_v22 = vpop.f32.mrf.mxu0 }
 0x4e0   : > { %v4820_v47 = vsub.f32 %v2026_v13, %v2097_v2  ;;  %v2013_v26 = vadd.f32 %v2012_v22, %v4768_v30 }
 0x4e2   : > { %v2129_v57 = vmul.f32 %v4820_v47, %v4820_v47  ;;  %v4892_v22 = vadd.f32 %v2013_v26, %v4188_v44 }
 0x4e4   : > { %v2147_v15 = vsel %vm885_vm0, %v2129_v57, 0.0 }
 0x4e5   : > { %2148 = vadd.xlane.f32.xlu1 %v2147_v15 }
 0x4ec   : > { %v2015_v9 = vpop.f32.mrf.mxu0 }
 0x4ed   : > { %v2016_v46 = vadd.f32 %v2015_v9, %v4768_v30  ;;  %2063 = vadd.xlane.f32.xlu1 %v2062_v7  ;;  %v2011_v9 = vadd.f32 %v4814_v43, %v4768_v30 }
 0x4ef   : > { %v4833_v13 = vadd.f32 %v2016_v46, %v4270_v45  ;;  %v2065_v45 = vsel %vm885_vm0, %v4845_v62, 0.0  ;;  %v4904_v44 = vadd.f32 %v2011_v9, %v4246_v63  ;;  %v3645_v63 = vld [vmem:[%s5679_s6 + $0x18] sm:$0xff] }
 0x4f0   : > { %2490 = vmatpush.bf16.msra.mxu1 %v3645_v63  ;;  %3769 = vmatpush.bf16.msrb.mxu3 %v3645_v63 }
 0x4f1   : > { %v2077_v40 = vsel %vm885_vm0, %v4833_v13, 0.0 }
 0x4f2   : > { %2078 = vadd.xlane.f32.xlu2 %v2077_v40 }
 0x4f4   : > { %v2017_v3 = vpop.f32.mrf.mxu0 }
 0x4f5   : > { %v2018_v25 = vadd.f32 %v2017_v3, %v4768_v30  ;;  %v2071_v3 = vsel %vm885_vm0, %v4904_v44, 0.0 }
 0x4f7   : > { %v4839_v56 = vadd.f32 %v2018_v25, %v4267_v37 }
 0x4f9   : > { %v2080_v12 = vsel %vm885_vm0, %v4839_v56, 0.0 }
 0x4fa   : > { %2081 = vadd.xlane.f32.xlu1 %v2080_v12 }
 0x502   : > { %2066 = vadd.xlane.f32.xlu1 %v2065_v45 }
 0x510   : > { %v2049_v49 = vpop.xlane.xlu1 %2048 }
 0x511   : > { %v2098_v60 = vmul.f32 %v4809_v39, %v2049_v49  ;;  %v3644_v49 = vld [vmem:[%s5679_s6 + $0x10] sm:$0xff] }
 0x512   : > { %2491 = vmatpush.bf16.msra.mxu1 %v3644_v49  ;;  %3770 = vmatpush.bf16.msrb.mxu3 %v3644_v49 }
 0x513   : > { %v4851_v14 = vsub.f32 %v4780_v36, %v2098_v60 }
 0x515   : > { %v2130_v37 = vmul.f32 %v4851_v14, %v4851_v14 }
 0x517   : > { %v2150_v51 = vsel %vm885_vm0, %v2130_v37, 0.0 }
 0x518   : > { %v2052_v33 = vpop.xlane.xlu1 %2051  ;;  %2151 = vadd.xlane.f32.xlu2 %v2150_v51 }
 0x519   : > { %v2099_v10 = vmul.f32 %v4809_v39, %v2052_v33 }
 0x51b   : > { %v4859_v50 = vsub.f32 %v4787_v11, %v2099_v10 }
 0x51d   : > { %v2131_v36 = vmul.f32 %v4859_v50, %v4859_v50 }
 0x51f   : > { %v2020_v28 = vpop.f32.mrf.mxu0  ;;  %v2153_v32 = vsel %vm885_vm0, %v2131_v36, 0.0 }
 0x520   : > { %v2021_v29 = vadd.f32 %v2020_v28, %v4768_v30  ;;  %v2055_v6 = vpop.xlane.xlu0 %2054  ;;  %2154 = vadd.xlane.f32.xlu0 %v2153_v32  ;;  %2069 = vadd.xlane.f32.xlu2 %v2068_v34 }
 0x521   : > { %v2100_v11 = vmul.f32 %v4809_v39, %v2055_v6 }
 0x522   : > { %v4875_v0 = vadd.f32 %v2021_v29, %v4297_v19 }
 0x523   : > { %v4872_v48 = vsub.f32 %v4793_v4, %v2100_v11 }
 0x524   : > { %v2083_v2 = vsel %vm885_vm0, %v4875_v0, 0.0 }
 0x525   : > { %v2132_v5 = vmul.f32 %v4872_v48, %v4872_v48 }
 0x527   : > { %v2022_v55 = vpop.f32.mrf.mxu0  ;;  %v2156_v16 = vsel %vm885_vm0, %v2132_v5, 0.0 }
 0x528   : > { %v2023_v57 = vadd.f32 %v2022_v55, %v4768_v30  ;;  %v2058_v24 = vpop.xlane.xlu1 %2057  ;;  %2157 = vadd.xlane.f32.xlu2 %v2156_v16  ;;  %2084 = vadd.xlane.f32.xlu0 %v2083_v2 }
 0x529   : > { %v2101_v4 = vmul.f32 %v4809_v39, %v2058_v24 }
 0x52a   : > { %v4886_v19 = vadd.f32 %v2023_v57, %v4300_v21  ;;  %v2074_v21 = vsel %vm885_vm0, %v4892_v22, 0.0 }
 0x52b   : > { %v4889_v15 = vsub.f32 %v4799_v41, %v2101_v4 }
 0x52c   : > { %v2086_v7 = vsel %vm885_vm0, %v4886_v19, 0.0 }
 0x52d   : > { %2087 = vadd.xlane.f32.xlu1 %v2086_v7  ;;  %v2133_v46 = vmul.f32 %v4889_v15, %v4889_v15 }
 0x52f   : > { %v2159_v40 = vsel %vm885_vm0, %v2133_v46, 0.0  ;;  %v4937_v46 = vperm.slane %v4765_v1, 1 }
 0x530   : > { %2075 = vadd.xlane.f32.xlu2 %v2074_v21  ;;  %2160 = vadd.xlane.f32.xlu0 %v2159_v40  ;;  %v2061_v41 = vpop.xlane.xlu2 %2060 }
 0x531   : > { %v2102_v30 = vmul.f32 %v4809_v39, %v2061_v41 }
 0x533   : > { %v4908_v43 = vsub.f32 %v4805_v52, %v2102_v30 }
 0x535   : > { %2072 = vadd.xlane.f32.xlu1 %v2071_v3  ;;  %v2134_v25 = vmul.f32 %v4908_v43, %v4908_v43 }
 0x537   : > { %v2162_v59 = vsel %vm885_vm0, %v2134_v25, 0.0  ;;  %v4943_v25 = vperm.slane %v4765_v1, 2 }
 0x538   : > { %2163 = vadd.xlane.f32.xlu0 %v2162_v59 }
 0x550   : > { %v2146_v12 = vpop.xlane.xlu1 %2145 }
 0x551   : > { %v2192_v45 = vmul.f32 %v2146_v12, %v4809_v39 }
 0x553   : > { %v2208_v52 = vadd.f32 1e-05, %v2192_v45 }
 0x555   : > { %3873 = vrsqrt.f32 %v2208_v52  ;;  %vm2230_vm6 = vweird.f32 %v2208_v52 }
 0x558   : > { %v2149_v60 = vpop.xlane.xlu1 %2148 }
 0x559   : > { %v2193_v37 = vmul.f32 %v2149_v60, %v4809_v39 }
 0x55b   : > { %v3874_v35 = vpop.eup %3873  ;;  %v2209_v51 = vadd.f32 1e-05, %v2193_v37 }
 0x55c   : > { %v2225_v33 = vmul.f32 %v3874_v35, %v2208_v52  ;;  %vm2231_vm5 = vweird.f32 %v3874_v35 }
 0x55d   : > { %3875 = vrsqrt.f32 %v2209_v51  ;;  %vm2232_vm7 = vmor %vm2230_vm6, %vm2231_vm5  ;;  %vm2240_vm9 = vweird.f32 %v2209_v51 }
 0x55e   : > { %v2226_v10 = vmul.f32 %v3874_v35, %v2225_v33 }
 0x560   : > { %v2227_v36 = vmul.f32 0.5, %v2226_v10  ;;  %v2064_v28 = vpop.xlane.xlu1 %2063 }
 0x561   : > { %v2103_v32 = vmul.f32 %v4809_v39, %v2064_v28 }
 0x562   : > { %v2228_v34 = vsub.f32 1.5, %v2227_v36 }
 0x563   : > { %v3876_v29 = vpop.eup %3875  ;;  %v4925_v6 = vsub.f32 %v4827_v58, %v2103_v32 }
 0x564   : > { %v2229_v11 = vmul.f32 %v3874_v35, %v2228_v34  ;;  %v2235_v5 = vmul.f32 %v3876_v29, %v2209_v51  ;;  %vm2241_vm8 = vweird.f32 %v3876_v29 }
 0x565   : > { %v2079_v26 = vpop.xlane.xlu2 %2078  ;;  %v2135_v55 = vmul.f32 %v4925_v6, %v4925_v6  ;;  %vm2242_vm10 = vmor %vm2240_vm9, %vm2241_vm8 }
 0x566   : > { %v2236_v16 = vmul.f32 %v3876_v29, %v2235_v5  ;;  %v2108_v2 = vmul.f32 %v4809_v39, %v2079_v26  ;;  %v2233_v24 = vsel %vm2232_vm7, %v3874_v35, %v2229_v11 }
 0x567   : > { %v2165_v57 = vsel %vm885_vm0, %v2135_v55, 0.0  ;;  %v2384_v21 = vmul.f32 %v2233_v24, %v4812_v18 }
 0x568   : > { %v2237_v4 = vmul.f32 0.5, %v2236_v16  ;;  %v4932_v9 = vsub.f32 %v4833_v13, %v2108_v2  ;;  %2166 = vadd.xlane.f32.xlu1 %v2165_v57 }
 0x569   : > { %v2401_v59 = vmul.f32 %v4937_v46, %v2384_v21 }
 0x56a   : > { %v2238_v58 = vsub.f32 1.5, %v2237_v4  ;;  %v2140_v7 = vmul.f32 %v4932_v9, %v4932_v9 }
 0x56b   : > { %v4954_v52 = vadd.f32 %v4943_v25, %v2401_v59 }
 0x56c   : > { %v2239_v40 = vmul.f32 %v3876_v29, %v2238_v58  ;;  %v2180_v41 = vsel %vm885_vm0, %v2140_v7, 0.0 }
 0x56d   : > { %v2082_v30 = vpop.xlane.xlu1 %2081  ;;  %2181 = vadd.xlane.f32.xlu2 %v2180_v41 }
 0x56e   : > { %v2243_v13 = vsel %vm2242_vm10, %v3876_v29, %v2239_v40  ;;  %v2109_v3 = vmul.f32 %v4809_v39, %v2082_v30 }
 0x56f   : > { %v2385_v12 = vmul.f32 %v2243_v13, %v4820_v47 }
 0x570   : > { %v4948_v63 = vsub.f32 %v4839_v56, %v2109_v3 }
 0x571   : > { %v2402_v18 = vmul.f32 %v4937_v46, %v2385_v12 }
 0x572   : > { %v2141_v45 = vmul.f32 %v4948_v63, %v4948_v63 }
 0x573   : > { %v4957_v49 = vadd.f32 %v4943_v25, %v2402_v18 }
 0x574   : > { %v2183_v60 = vsel %vm885_vm0, %v2141_v45, 0.0 }
 0x575   : > { %v2067_v37 = vpop.xlane.xlu1 %2066  ;;  %2184 = vadd.xlane.f32.xlu0 %v2183_v60  ;;  %v2434_v47 = vpack.c.bf16 %v4957_v49, %v4954_v52 }
 0x576   : > { %v2104_v56 = vmul.f32 %v4809_v39, %v2067_v37 }
 0x577   : > { %3576 = vmatmul.msk.bf16.vlgmr.msra.gmra.mxu1 %vm885_vm0, %v2434_v47 }
 0x578   : > { %v4965_v35 = vsub.f32 %v4845_v62, %v2104_v56 }
 0x57a   : > { %v2136_v51 = vmul.f32 %v4965_v35, %v4965_v35 }
 0x57c   : > { %v2168_v33 = vsel %vm885_vm0, %v2136_v51, 0.0 }
 0x57d   : > { %2169 = vadd.xlane.f32.xlu1 %v2168_v33 }
 0x58b   : > { %v2152_v10 = vpop.xlane.xlu2 %2151 }
 0x58c   : > { %v2194_v36 = vmul.f32 %v2152_v10, %v4809_v39 }
 0x58e   : > { %v2210_v28 = vadd.f32 1e-05, %v2194_v36 }
 0x590   : > { %3877 = vrsqrt.f32 %v2210_v28  ;;  %vm2250_vm12 = vweird.f32 %v2210_v28 }
 0x593   : > { %v2155_v32 = vpop.xlane.xlu0 %2154  ;;  %v2070_v34 = vpop.xlane.xlu2 %2069 }
 0x594   : > { %v2195_v29 = vmul.f32 %v2155_v32, %v4809_v39  ;;  %v2105_v11 = vmul.f32 %v4809_v39, %v2070_v34 }
 0x596   : > { %v3878_v5 = vpop.eup %3877  ;;  %v2211_v62 = vadd.f32 1e-05, %v2195_v29  ;;  %v4974_v26 = vsub.f32 %v4862_v54, %v2105_v11 }
 0x597   : > { %v2245_v55 = vmul.f32 %v3878_v5, %v2210_v28  ;;  %vm2251_vm11 = vweird.f32 %v3878_v5 }
 0x598   : > { %3879 = vrsqrt.f32 %v2211_v62  ;;  %v2137_v16 = vmul.f32 %v4974_v26, %v4974_v26  ;;  %vm2252_vm13 = vmor %vm2250_vm12, %vm2251_vm11  ;;  %vm2260_vm15 = vweird.f32 %v2211_v62 }
 0x599   : > { %v2246_v2 = vmul.f32 %v3878_v5, %v2245_v55 }
 0x59a   : > { %v2171_v57 = vsel %vm885_vm0, %v2137_v16, 0.0 }
 0x59b   : > { %v2247_v24 = vmul.f32 0.5, %v2246_v2  ;;  %v2085_v4 = vpop.xlane.xlu0 %2084  ;;  %2172 = vadd.xlane.f32.xlu2 %v2171_v57  ;;  %v2158_v58 = vpop.xlane.xlu2 %2157 }
 0x59c   : > { %v2110_v7 = vmul.f32 %v4809_v39, %v2085_v4  ;;  %v2196_v21 = vmul.f32 %v2158_v58, %v4809_v39 }
 0x59d   : > { %v2248_v40 = vsub.f32 1.5, %v2247_v24 }
 0x59e   : > { %v3880_v41 = vpop.eup %3879  ;;  %v4982_v54 = vsub.f32 %v4875_v0, %v2110_v7  ;;  %v2212_v30 = vadd.f32 1e-05, %v2196_v21 }
 0x59f   : > { %v2249_v13 = vmul.f32 %v3878_v5, %v2248_v40  ;;  %v2255_v3 = vmul.f32 %v3880_v41, %v2211_v62  ;;  %vm2261_vm14 = vweird.f32 %v3880_v41 }
 0x5a0   : > { %3881 = vrsqrt.f32 %v2212_v30  ;;  %v2088_v59 = vpop.xlane.xlu1 %2087  ;;  %v2142_v12 = vmul.f32 %v4982_v54, %v4982_v54  ;;  %vm2262_vm1 = vmor %vm2260_vm15, %vm2261_vm14  ;;  %vm2270_vm3 = vweird.f32 %v2212_v30 }
 0x5a1   : > { %v2256_v18 = vmul.f32 %v3880_v41, %v2255_v3  ;;  %v2111_v45 = vmul.f32 %v4809_v39, %v2088_v59  ;;  %v2253_v37 = vsel %vm2252_vm13, %v3878_v5, %v2249_v13 }
 0x5a2   : > { %v2186_v60 = vsel %vm885_vm0, %v2142_v12, 0.0  ;;  %v2386_v34 = vmul.f32 %v2253_v37, %v4851_v14 }
 0x5a3   : > { %v2257_v47 = vmul.f32 0.5, %v2256_v18  ;;  %v4989_v0 = vsub.f32 %v4886_v19, %v2111_v45  ;;  %v2161_v56 = vpop.xlane.xlu0 %2160  ;;  %2187 = vadd.xlane.f32.xlu0 %v2186_v60  ;;  %v2076_v51 = vpop.xlane.xlu2 %2075 }
 0x5a4   : > { %v2197_v33 = vmul.f32 %v2161_v56, %v4809_v39  ;;  %v2107_v10 = vmul.f32 %v4809_v39, %v2076_v51  ;;  %v2403_v62 = vmul.f32 %v4937_v46, %v2386_v34 }
 0x5a5   : > { %v2258_v36 = vsub.f32 1.5, %v2257_v47  ;;  %v2143_v28 = vmul.f32 %v4989_v0, %v4989_v0 }
 0x5a6   : > { %v3882_v32 = vpop.eup %3881  ;;  %v2213_v29 = vadd.f32 1e-05, %v2197_v33  ;;  %v4997_v11 = vsub.f32 %v4892_v22, %v2107_v10  ;;  %v5013_v3 = vadd.f32 %v4943_v25, %v2403_v62 }
 0x5a7   : > { %v2259_v19 = vmul.f32 %v3880_v41, %v2258_v36  ;;  %v2265_v5 = vmul.f32 %v3882_v32, %v2212_v30  ;;  %v2189_v55 = vsel %vm885_vm0, %v2143_v28, 0.0  ;;  %vm2271_vm2 = vweird.f32 %v3882_v32 }
 0x5a8   : > { %3883 = vrsqrt.f32 %v2213_v29  ;;  %2190 = vadd.xlane.f32.xlu1 %v2189_v55  ;;  %v2073_v16 = vpop.xlane.xlu1 %2072  ;;  %v2139_v2 = vmul.f32 %v4997_v11, %v4997_v11  ;;  %vm2272_vm4 = vmor %vm2270_vm3, %vm2271_vm2  ;;  %vm2280_vm6 = vweird.f32 %v2213_v29 }
 0x5a9   : > { %v2263_v57 = vsel %vm2262_vm1, %v3880_v41, %v2259_v19  ;;  %v2266_v24 = vmul.f32 %v3882_v32, %v2265_v5  ;;  %v2106_v14 = vmul.f32 %v4809_v39, %v2073_v16 }
 0x5aa   : > { %v2387_v4 = vmul.f32 %v2263_v57, %v4859_v50  ;;  %v2177_v22 = vsel %vm885_vm0, %v2139_v2, 0.0  ;;  %v3647_v57 = vld [vmem:[%s5679_s6 + $0x28] sm:$0xff] }
 0x5ab   : > { %v2267_v58 = vmul.f32 0.5, %v2266_v24  ;;  %v5007_v7 = vsub.f32 %v4904_v44, %v2106_v14  ;;  %2178 = vadd.xlane.f32.xlu0 %v2177_v22  ;;  %2605 = vmatpush.bf16.msra.mxu2 %v3647_v57  ;;  %v3646_v22 = vld [vmem:[%s5679_s6 + $0x20] sm:$0xff] }
 0x5ac   : > { %v2404_v21 = vmul.f32 %v4937_v46, %v2387_v4  ;;  %3771 = vmatpush.bf16.msra.mxu3 %v3647_v57 }
 0x5ad   : > { %v2268_v40 = vsub.f32 1.5, %v2267_v58  ;;  %v2138_v41 = vmul.f32 %v5007_v7, %v5007_v7 }
 0x5ae   : > { %v3884_v13 = vpop.eup %3883  ;;  %v5016_v50 = vadd.f32 %v4943_v25, %v2404_v21 }
 0x5af   : > { %v2269_v59 = vmul.f32 %v3882_v32, %v2268_v40  ;;  %v2275_v12 = vmul.f32 %v3884_v13, %v2213_v29  ;;  %v2174_v44 = vsel %vm885_vm0, %v2138_v41, 0.0  ;;  %vm2281_vm5 = vweird.f32 %v3884_v13  ;;  %2606 = vmatpush.bf16.msra.mxu2 %v3646_v22 }
 0x5b0   : > { %2175 = vadd.xlane.f32.xlu2 %v2174_v44  ;;  %v2435_v18 = vpack.c.bf16 %v5016_v50, %v5013_v3  ;;  %vm2282_vm7 = vmor %vm2280_vm6, %vm2281_vm5  ;;  %3772 = vmatpush.bf16.msra.mxu3 %v3646_v22 }
 0x5b1   : > { %v2276_v45 = vmul.f32 %v3884_v13, %v2275_v12  ;;  %v2273_v60 = vsel %vm2272_vm4, %v3882_v32, %v2269_v59 }
 0x5b2   : > { %3577 = vmatmul.msk.bf16.gmra.mxu1 %vm885_vm0, %v2435_v18  ;;  %v2388_v56 = vmul.f32 %v2273_v60, %v4872_v48  ;;  %v2164_v48 = vpop.xlane.xlu0 %2163 }
 0x5b3   : > { %v2277_v37 = vmul.f32 0.5, %v2276_v45  ;;  %v2198_v29 = vmul.f32 %v2164_v48, %v4809_v39 }
 0x5b4   : > { %v2405_v36 = vmul.f32 %v4937_v46, %v2388_v56 }
 0x5b5   : > { %v2278_v47 = vsub.f32 1.5, %v2277_v37  ;;  %v2214_v19 = vadd.f32 1e-05, %v2198_v29 }
 0x5b6   : > { %v5027_v28 = vadd.f32 %v4943_v25, %v2405_v36 }
 0x5b7   : > { %v2279_v51 = vmul.f32 %v3884_v13, %v2278_v47  ;;  %3885 = vrsqrt.f32 %v2214_v19  ;;  %vm2290_vm9 = vweird.f32 %v2214_v19 }
 0x5b9   : > { %v2283_v33 = vsel %vm2282_vm7, %v3884_v13, %v2279_v51 }
 0x5ba   : > { %v2389_v10 = vmul.f32 %v2283_v33, %v4889_v15 }
 0x5bc   : > { %v2406_v30 = vmul.f32 %v4937_v46, %v2389_v10 }
 0x5bd   : > { %v3886_v15 = vpop.eup %3885 }
 0x5be   : > { %v5030_v32 = vadd.f32 %v4943_v25, %v2406_v30  ;;  %v2285_v5 = vmul.f32 %v3886_v15, %v2214_v19  ;;  %vm2291_vm8 = vweird.f32 %v3886_v15 }
 0x5bf   : > { %vm2292_vm10 = vmor %vm2290_vm9, %vm2291_vm8 }
 0x5c0   : > { %v2436_v34 = vpack.c.bf16 %v5030_v32, %v5027_v28  ;;  %v2286_v55 = vmul.f32 %v3886_v15, %v2285_v5 }
 0x5c2   : > { %3578 = vmatmul.msk.bf16.gmra.mxu1 %vm885_vm0, %v2436_v34  ;;  %v2287_v14 = vmul.f32 0.5, %v2286_v55 }
 0x5c4   : > { %v2288_v58 = vsub.f32 1.5, %v2287_v14 }
 0x5c6   : > { %v2289_v41 = vmul.f32 %v3886_v15, %v2288_v58 }
 0x5c8   : > { %v2293_v45 = vsel %vm2292_vm10, %v3886_v15, %v2289_v41 }
 0x5c9   : > { %v2390_v51 = vmul.f32 %v2293_v45, %v4908_v43 }
 0x5cb   : > { %v2407_v29 = vmul.f32 %v4937_v46, %v2390_v51 }
 0x5cd   : > { %v5050_v57 = vadd.f32 %v4943_v25, %v2407_v29 }
 0x5db   : > { %v2167_v16 = vpop.xlane.xlu1 %2166 }
 0x5dc   : > { %v2199_v2 = vmul.f32 %v2167_v16, %v4809_v39 }
 0x5de   : > { %v2215_v24 = vadd.f32 1e-05, %v2199_v2 }
 0x5e0   : > { %3887 = vrsqrt.f32 %v2215_v24  ;;  %v2182_v4 = vpop.xlane.xlu2 %2181  ;;  %vm2300_vm12 = vweird.f32 %v2215_v24 }
 0x5e1   : > { %v2204_v62 = vmul.f32 %v2182_v4, %v4809_v39 }
 0x5e3   : > { %v2220_v21 = vadd.f32 1e-05, %v2204_v62 }
 0x5e5   : > { %3889 = vrsqrt.f32 %v2220_v21  ;;  %vm2350_vm15 = vweird.f32 %v2220_v21 }
 0x5e6   : > { %v3888_v40 = vpop.eup %3887 }
 0x5e7   : > { %v2295_v13 = vmul.f32 %v3888_v40, %v2215_v24  ;;  %vm2301_vm11 = vweird.f32 %v3888_v40 }
 0x5e8   : > { %v2185_v59 = vpop.xlane.xlu0 %2184  ;;  %vm2302_vm13 = vmor %vm2300_vm12, %vm2301_vm11 }
 0x5e9   : > { %v2296_v12 = vmul.f32 %v3888_v40, %v2295_v13  ;;  %v2205_v44 = vmul.f32 %v2185_v59, %v4809_v39 }
 0x5eb   : > { %v3890_v18 = vpop.eup %3889  ;;  %v2297_v60 = vmul.f32 0.5, %v2296_v12  ;;  %v2221_v37 = vadd.f32 1e-05, %v2205_v44 }
 0x5ec   : > { %v2345_v47 = vmul.f32 %v3890_v18, %v2220_v21  ;;  %vm2351_vm14 = vweird.f32 %v3890_v18 }
 0x5ed   : > { %v2298_v56 = vsub.f32 1.5, %v2297_v60  ;;  %3891 = vrsqrt.f32 %v2221_v37  ;;  %vm2352_vm1 = vmor %vm2350_vm15, %vm2351_vm14  ;;  %vm2360_vm3 = vweird.f32 %v2221_v37 }
 0x5ee   : > { %v2346_v33 = vmul.f32 %v3890_v18, %v2345_v47 }
 0x5ef   : > { %v2299_v10 = vmul.f32 %v3888_v40, %v2298_v56 }
 0x5f0   : > { %v2347_v36 = vmul.f32 0.5, %v2346_v33  ;;  %v2170_v2 = vpop.xlane.xlu1 %2169 }
 0x5f1   : > { %v2303_v30 = vsel %vm2302_vm13, %v3888_v40, %v2299_v10  ;;  %v2200_v62 = vmul.f32 %v2170_v2, %v4809_v39 }
 0x5f2   : > { %v2391_v34 = vmul.f32 %v2303_v30, %v4925_v6  ;;  %v2348_v48 = vsub.f32 1.5, %v2347_v36  ;;  %v5056_v6 = vperm.slane %v4765_v1, 3 }
 0x5f3   : > { %v3892_v19 = vpop.eup %3891  ;;  %v2216_v1 = vadd.f32 1e-05, %v2200_v62 }
 0x5f4   : > { %v2349_v15 = vmul.f32 %v3890_v18, %v2348_v48  ;;  %v2355_v5 = vmul.f32 %v3892_v19, %v2221_v37  ;;  %v2493_v55 = vpop.f32.mrf.mxu1  ;;  %v2408_v16 = vmul.f32 %v4937_v46, %v2391_v34  ;;  %vm2361_vm2 = vweird.f32 %v3892_v19 }
 0x5f5   : > { %v2494_v40 = vadd.f32 %v2493_v55, %v5056_v6  ;;  %vm2362_vm4 = vmor %vm2360_vm3, %vm2361_vm2  ;;  %3893 = vrsqrt.f32 %v2216_v1  ;;  %vm2310_vm6 = vweird.f32 %v2216_v1 }
 0x5f6   : > { %v2356_v43 = vmul.f32 %v3892_v19, %v2355_v5  ;;  %v5053_v24 = vadd.f32 %v4943_v25, %v2408_v16  ;;  %v2353_v14 = vsel %vm2352_vm1, %v3890_v18, %v2349_v15 }
 0x5f7   : > { %v2396_v21 = vmul.f32 %v2353_v14, %v4932_v9  ;;  %v2533_v45 = vmax.f32 %v2494_v40, 0.0 }
 0x5f8   : > { %v2357_v4 = vmul.f32 0.5, %v2356_v43  ;;  %v2437_v22 = vpack.c.bf16 %v5053_v24, %v5050_v57 }
 0x5f9   : > { %v2413_v44 = vmul.f32 %v4937_v46, %v2396_v21 }
 0x5fa   : > { %v2358_v58 = vsub.f32 1.5, %v2357_v4  ;;  %3579 = vmatmul.msk.bf16.gmra.mxu1 %vm885_vm0, %v2437_v22 }
 0x5fb   : > { %v5069_v56 = vadd.f32 %v4943_v25, %v2413_v44  ;;  %v3894_v33 = vpop.eup %3893 }
 0x5fc   : > { %v2359_v41 = vmul.f32 %v3892_v19, %v2358_v58  ;;  %v2495_v13 = vpop.f32.mrf.mxu1  ;;  %vm2311_vm5 = vweird.f32 %v3894_v33 }
 0x5fd   : > { %v2496_v59 = vadd.f32 %v2495_v13, %v5056_v6  ;;  %vm2312_vm7 = vmor %vm2310_vm6, %vm2311_vm5 }
 0x5fe   : > { %v2363_v12 = vsel %vm2362_vm4, %v3892_v19, %v2359_v41 }
 0x5ff   : > { %v2397_v18 = vmul.f32 %v2363_v12, %v4948_v63  ;;  %v2534_v60 = vmax.f32 %v2496_v59, 0.0  ;;  %v2305_v63 = vmul.f32 %v3894_v33, %v2216_v1 }
 0x601   : > { %v2414_v47 = vmul.f32 %v4937_v46, %v2397_v18  ;;  %v2549_v9 = vpack.c.bf16 %v2534_v60, %v2533_v45  ;;  %v2306_v10 = vmul.f32 %v3894_v33, %v2305_v63 }
 0x603   : > { %v5072_v37 = vadd.f32 %v4943_v25, %v2414_v47  ;;  %3596 = vmatmul.msk.bf16.vlgmr.msra.gmra.mxu2 %vm885_vm0, %v2549_v9  ;;  %v2307_v48 = vmul.f32 0.5, %v2306_v10 }
 0x605   : > { %v2440_v51 = vpack.c.bf16 %v5072_v37, %v5069_v56  ;;  %v2308_v29 = vsub.f32 1.5, %v2307_v48 }
 0x607   : > { %3582 = vmatmul.msk.bf16.vlgmr.msrb.gmra.mxu3 %vm885_vm0, %v2440_v51  ;;  %v2309_v16 = vmul.f32 %v3894_v33, %v2308_v29 }
 0x609   : > { %v2313_v22 = vsel %vm2312_vm7, %v3894_v33, %v2309_v16 }
 0x60a   : > { %v2392_v59 = vmul.f32 %v2313_v22, %v4965_v35 }
 0x60c   : > { %v2409_v51 = vmul.f32 %v4937_v46, %v2392_v59 }
 0x60e   : > { %v2173_v36 = vpop.xlane.xlu2 %2172  ;;  %v5088_v29 = vadd.f32 %v4943_v25, %v2409_v51 }
 0x60f   : > { %v2201_v30 = vmul.f32 %v2173_v36, %v4809_v39 }
 0x611   : > { %v2217_v34 = vadd.f32 1e-05, %v2201_v30 }
 0x613   : > { %3895 = vrsqrt.f32 %v2217_v34  ;;  %vm2320_vm9 = vweird.f32 %v2217_v34 }
 0x616   : > { %v2188_v19 = vpop.xlane.xlu0 %2187 }
 0x617   : > { %v2206_v15 = vmul.f32 %v2188_v19, %v4809_v39 }
 0x619   : > { %v3896_v5 = vpop.eup %3895  ;;  %v2222_v55 = vadd.f32 1e-05, %v2206_v15 }
 0x61a   : > { %v2315_v43 = vmul.f32 %v3896_v5, %v2217_v34  ;;  %vm2321_vm8 = vweird.f32 %v3896_v5 }
 0x61b   : > { %3897 = vrsqrt.f32 %v2222_v55  ;;  %v2191_v2 = vpop.xlane.xlu1 %2190  ;;  %vm2322_vm10 = vmor %vm2320_vm9, %vm2321_vm8  ;;  %vm2370_vm12 = vweird.f32 %v2222_v55 }
 0x61c   : > { %v2316_v14 = vmul.f32 %v3896_v5, %v2315_v43  ;;  %v2207_v4 = vmul.f32 %v2191_v2, %v4809_v39 }
 0x61e   : > { %v2317_v62 = vmul.f32 0.5, %v2316_v14  ;;  %v2223_v58 = vadd.f32 1e-05, %v2207_v4  ;;  %v2179_v21 = vpop.xlane.xlu0 %2178 }
 0x61f   : > { %v2203_v40 = vmul.f32 %v2179_v21, %v4809_v39 }
 0x620   : > { %v2318_v41 = vsub.f32 1.5, %v2317_v62  ;;  %3899 = vrsqrt.f32 %v2223_v58  ;;  %vm2380_vm15 = vweird.f32 %v2223_v58 }
 0x621   : > { %v3898_v13 = vpop.eup %3897  ;;  %v2219_v12 = vadd.f32 1e-05, %v2203_v40 }
 0x622   : > { %v2319_v44 = vmul.f32 %v3896_v5, %v2318_v41  ;;  %v2365_v1 = vmul.f32 %v3898_v13, %v2222_v55  ;;  %vm2371_vm11 = vweird.f32 %v3898_v13 }
 0x623   : > { %3901 = vrsqrt.f32 %v2219_v12  ;;  %v2176_v18 = vpop.xlane.xlu2 %2175  ;;  %vm2372_vm13 = vmor %vm2370_vm12, %vm2371_vm11  ;;  %vm2340_vm3 = vweird.f32 %v2219_v12 }
 0x624   : > { %v2323_v45 = vsel %vm2322_vm10, %v3896_v5, %v2319_v44  ;;  %v2366_v60 = vmul.f32 %v3898_v13, %v2365_v1  ;;  %v2202_v47 = vmul.f32 %v2176_v18, %v4809_v39 }
 0x625   : > { %v2393_v9 = vmul.f32 %v2323_v45, %v4974_v26 }
 0x626   : > { %v3900_v33 = vpop.eup %3899  ;;  %v2367_v63 = vmul.f32 0.5, %v2366_v60  ;;  %v2218_v10 = vadd.f32 1e-05, %v2202_v47 }
 0x627   : > { %v2375_v36 = vmul.f32 %v3900_v33, %v2223_v58  ;;  %v2410_v35 = vmul.f32 %v4937_v46, %v2393_v9  ;;  %vm2381_vm14 = vweird.f32 %v3900_v33 }
 0x628   : > { %v2368_v30 = vsub.f32 1.5, %v2367_v63  ;;  %3903 = vrsqrt.f32 %v2218_v10  ;;  %vm2382_vm1 = vmor %vm2380_vm15, %vm2381_vm14  ;;  %vm2330_vm6 = vweird.f32 %v2218_v10 }
 0x629   : > { %v3902_v34 = vpop.eup %3901  ;;  %v2376_v48 = vmul.f32 %v3900_v33, %v2375_v36  ;;  %v5091_v19 = vadd.f32 %v4943_v25, %v2410_v35 }
 0x62a   : > { %v2369_v26 = vmul.f32 %v3898_v13, %v2368_v30  ;;  %v2335_v15 = vmul.f32 %v3902_v34, %v2219_v12  ;;  %vm2341_vm2 = vweird.f32 %v3902_v34 }
 0x62b   : > { %v2377_v5 = vmul.f32 0.5, %v2376_v48  ;;  %v2438_v16 = vpack.c.bf16 %v5091_v19, %v5088_v29  ;;  %vm2342_vm4 = vmor %vm2340_vm3, %vm2341_vm2 }
 0x62c   : > { %v2373_v43 = vsel %vm2372_vm13, %v3898_v13, %v2369_v26  ;;  %v2336_v2 = vmul.f32 %v3902_v34, %v2335_v15 }
 0x62d   : > { %v2378_v14 = vsub.f32 1.5, %v2377_v5  ;;  %3580 = vmatmul.msk.bf16.gmra.mxu1 %vm885_vm0, %v2438_v16  ;;  %v2398_v22 = vmul.f32 %v2373_v43, %v4982_v54 }
 0x62e   : > { %v3904_v4 = vpop.eup %3903  ;;  %v2337_v62 = vmul.f32 0.5, %v2336_v2 }
 0x62f   : > { %v2379_v21 = vmul.f32 %v3900_v33, %v2378_v14  ;;  %v2325_v40 = vmul.f32 %v3904_v4, %v2218_v10  ;;  %v2498_v55 = vpop.f32.mrf.mxu1  ;;  %v2415_v18 = vmul.f32 %v4937_v46, %v2398_v22  ;;  %vm2331_vm5 = vweird.f32 %v3904_v4 }
 0x630   : > { %v2338_v41 = vsub.f32 1.5, %v2337_v62  ;;  %v2499_v9 = vadd.f32 %v2498_v55, %v5056_v6  ;;  %vm2332_vm7 = vmor %vm2330_vm6, %vm2331_vm5 }
 0x631   : > { %v2383_v59 = vsel %vm2382_vm1, %v3900_v33, %v2379_v21  ;;  %v2326_v44 = vmul.f32 %v3904_v4, %v2325_v40  ;;  %v5103_v51 = vadd.f32 %v4943_v25, %v2415_v18 }
 0x632   : > { %v2399_v13 = vmul.f32 %v2383_v59, %v4989_v0  ;;  %v2339_v1 = vmul.f32 %v3902_v34, %v2338_v41  ;;  %v2535_v30 = vmax.f32 %v2499_v9, 0.0  ;;  %v5133_v59 = vld [vmem:[%s5680_s7] sm:$0xff] }
 0x633   : > { %v2327_v45 = vmul.f32 0.5, %v2326_v44  ;;  %v5136_v44 = vperm.slane %v5133_v59, 4 }
 0x634   : > { %v2343_v60 = vsel %vm2342_vm4, %v3902_v34, %v2339_v1  ;;  %v2416_v54 = vmul.f32 %v4937_v46, %v2399_v13 }
 0x635   : > { %v2328_v47 = vsub.f32 1.5, %v2327_v45  ;;  %v2395_v58 = vmul.f32 %v2343_v60, %v4997_v11 }
 0x636   : > { %v5106_v0 = vadd.f32 %v4943_v25, %v2416_v54 }
 0x637   : > { %v2329_v12 = vmul.f32 %v3904_v4, %v2328_v47  ;;  %v2500_v33 = vpop.f32.mrf.mxu1  ;;  %v2412_v48 = vmul.f32 %v4937_v46, %v2395_v58 }
 0x638   : > { %v2501_v63 = vadd.f32 %v2500_v33, %v5056_v6  ;;  %v2441_v36 = vpack.c.bf16 %v5106_v0, %v5103_v51 }
 0x639   : > { %v2333_v35 = vsel %vm2332_vm7, %v3904_v4, %v2329_v12  ;;  %v5120_v5 = vadd.f32 %v4943_v25, %v2412_v48 }
 0x63a   : > { %v2394_v11 = vmul.f32 %v2333_v35, %v5007_v7  ;;  %v2536_v34 = vmax.f32 %v2501_v63, 0.0  ;;  %3583 = vmatmul.msk.bf16.gmra.mxu3 %vm885_vm0, %v2441_v36 }
 0x63c   : > { %v2550_v26 = vpack.c.bf16 %v2536_v34, %v2535_v30  ;;  %v2411_v15 = vmul.f32 %v4937_v46, %v2394_v11 }
 0x63e   : > { %3597 = vmatmul.msk.bf16.gmra.mxu2 %vm885_vm0, %v2550_v26  ;;  %v5117_v10 = vadd.f32 %v4943_v25, %v2411_v15 }
 0x63f   : > { %v2503_v16 = vpop.f32.mrf.mxu1 }
 0x640   : > { %v2439_v7 = vpack.c.bf16 %v5120_v5, %v5117_v10  ;;  %v2504_v43 = vadd.f32 %v2503_v16, %v5056_v6 }
 0x642   : > { %3581 = vmatmul.msk.bf16.gmra.mxu1 %vm885_vm0, %v2439_v7  ;;  %v2537_v46 = vmax.f32 %v2504_v43, 0.0 }
 0x647   : > { %v2505_v2 = vpop.f32.mrf.mxu1 }
 0x648   : > { %v2506_v14 = vadd.f32 %v2505_v2, %v5056_v6 }
 0x64a   : > { %v2538_v4 = vmax.f32 %v2506_v14, 0.0 }
 0x64c   : > { %v2551_v22 = vpack.c.bf16 %v2538_v4, %v2537_v46 }
 0x64e   : > { %3598 = vmatmul.msk.bf16.gmra.mxu2 %vm885_vm0, %v2551_v22 }
 0x677   : > { %v2508_v62 = vpop.f32.mrf.mxu1 }
 0x678   : > { %v2509_v25 = vadd.f32 %v2508_v62, %v5056_v6 }
 0x67a   : > { %v2539_v55 = vmax.f32 %v2509_v25, 0.0 }
 0x67f   : > { %v2510_v21 = vpop.f32.mrf.mxu1 }
 0x680   : > { %v2511_v40 = vadd.f32 %v2510_v21, %v5056_v6 }
 0x682   : > { %v2540_v41 = vmax.f32 %v2511_v40, 0.0 }
 0x684   : > { %v2552_v13 = vpack.c.bf16 %v2540_v41, %v2539_v55 }
 0x686   : > { %v2608_v1 = vpop.f32.mrf.mxu2  ;;  %3599 = vmatmul.msk.bf16.gmra.mxu2 %vm885_vm0, %v2552_v13 }
 0x687   : > { %v2609_v18 = vadd.f32 %v2608_v1, %v5136_v44 }
 0x689   : > { %v5141_v45 = vadd.f32 %v2609_v18, %v4954_v52 }
 0x68a   : > { %v2523_v60 = vpop.f32.mrf.mxu3 }
 0x68b   : > { %v2664_v54 = vsel %vm885_vm0, %v5141_v45, 0.0  ;;  %v2524_v9 = vadd.f32 %v2523_v60, %v5056_v6 }
 0x68c   : > { %2665 = vadd.xlane.f32.xlu1 %v2664_v54 }
 0x68d   : > { %v2545_v36 = vmax.f32 %v2524_v9, 0.0 }
 0x68e   : > { %v2610_v47 = vpop.f32.mrf.mxu2 }
 0x68f   : > { %v2611_v58 = vadd.f32 %v2610_v47, %v5136_v44 }
 0x691   : > { %v5148_v12 = vadd.f32 %v2611_v58, %v4957_v49 }
 0x692   : > { %v2525_v33 = vpop.f32.mrf.mxu3 }
 0x693   : > { %v2526_v63 = vadd.f32 %v2525_v33, %v5056_v6  ;;  %v2667_v52 = vsel %vm885_vm0, %v5148_v12, 0.0 }
 0x694   : > { %2668 = vadd.xlane.f32.xlu2 %v2667_v52 }
 0x695   : > { %v2546_v35 = vmax.f32 %v2526_v63, 0.0 }
 0x697   : > { %v2555_v11 = vpack.c.bf16 %v2546_v35, %v2545_v36 }
 0x699   : > { %3602 = vmatmul.msk.bf16.vlgmr.msra.gmra.mxu3 %vm885_vm0, %v2555_v11 }
 0x6aa   : > { %v2513_v30 = vpop.f32.mrf.mxu1 }
 0x6ab   : > { %v2514_v34 = vadd.f32 %v2513_v30, %v5056_v6 }
 0x6ad   : > { %v2541_v49 = vmax.f32 %v2514_v34, 0.0 }
 0x6b2   : > { %v2515_v48 = vpop.f32.mrf.mxu1 }
 0x6b3   : > { %v2516_v26 = vadd.f32 %v2515_v48, %v5056_v6 }
 0x6b5   : > { %v2542_v15 = vmax.f32 %v2516_v26, 0.0 }
 0x6b7   : > { %v2553_v16 = vpack.c.bf16 %v2542_v15, %v2541_v49 }
 0x6b9   : > { %3600 = vmatmul.msk.bf16.gmra.mxu2 %vm885_vm0, %v2553_v16 }
 0x6bd   : > { %v2528_v7 = vpop.f32.mrf.mxu3 }
 0x6be   : > { %v2529_v46 = vadd.f32 %v2528_v7, %v5056_v6 }
 0x6bf   : > { %v2518_v43 = vpop.f32.mrf.mxu1 }
 0x6c0   : > { %v2519_v62 = vadd.f32 %v2518_v43, %v5056_v6  ;;  %v2547_v55 = vmax.f32 %v2529_v46, 0.0 }
 0x6c1   : > { %v2613_v2 = vpop.f32.mrf.mxu2 }
 0x6c2   : > { %v2614_v14 = vadd.f32 %v2613_v2, %v5136_v44  ;;  %v2543_v18 = vmax.f32 %v2519_v62, 0.0 }
 0x6c4   : > { %v5160_v4 = vadd.f32 %v2614_v14, %v5013_v3 }
 0x6c5   : > { %v2530_v22 = vpop.f32.mrf.mxu3 }
 0x6c6   : > { %v2531_v25 = vadd.f32 %v2530_v22, %v5056_v6  ;;  %v2670_v21 = vsel %vm885_vm0, %v5160_v4, 0.0 }
 0x6c7   : > { %2671 = vadd.xlane.f32.xlu0 %v2670_v21  ;;  %v2520_v40 = vpop.f32.mrf.mxu1 }
 0x6c8   : > { %v2548_v41 = vmax.f32 %v2531_v25, 0.0  ;;  %v2521_v13 = vadd.f32 %v2520_v40, %v5056_v6 }
 0x6c9   : > { %v2615_v1 = vpop.f32.mrf.mxu2 }
 0x6ca   : > { %v2556_v60 = vpack.c.bf16 %v2548_v41, %v2547_v55  ;;  %v2544_v54 = vmax.f32 %v2521_v13, 0.0  ;;  %v2616_v3 = vadd.f32 %v2615_v1, %v5136_v44 }
 0x6cc   : > { %v2554_v47 = vpack.c.bf16 %v2544_v54, %v2543_v18  ;;  %3603 = vmatmul.msk.bf16.gmra.mxu3 %vm885_vm0, %v2556_v60  ;;  %v5170_v58 = vadd.f32 %v2616_v3, %v5016_v50 }
 0x6ce   : > { %3601 = vmatmul.msk.bf16.gmra.mxu2 %vm885_vm0, %v2554_v47  ;;  %v2673_v9 = vsel %vm885_vm0, %v5170_v58, 0.0 }
 0x6cf   : > { %2674 = vadd.xlane.f32.xlu1 %v2673_v9 }
 0x6d1   : > { %v2618_v33 = vpop.f32.mrf.mxu2 }
 0x6d2   : > { %v2619_v6 = vadd.f32 %v2618_v33, %v5136_v44 }
 0x6d4   : > { %v5177_v63 = vadd.f32 %v2619_v6, %v5027_v28 }
 0x6d6   : > { %v2676_v52 = vsel %vm885_vm0, %v5177_v63, 0.0 }
 0x6d7   : > { %2677 = vadd.xlane.f32.xlu2 %v2676_v52 }
 0x6d9   : > { %v2620_v36 = vpop.f32.mrf.mxu2 }
 0x6da   : > { %v2621_v50 = vadd.f32 %v2620_v36, %v5136_v44 }
 0x6dc   : > { %v5183_v35 = vadd.f32 %v2621_v50, %v5030_v32 }
 0x6de   : > { %v2679_v11 = vsel %vm885_vm0, %v5183_v35, 0.0 }
 0x6df   : > { %2680 = vadd.xlane.f32.xlu0 %v2679_v11 }
 0x6ff   : > { %v2666_v60 = vpop.xlane.xlu1 %2665 }
 0x700   : > { %v2712_v9 = vmul.f32 %v2666_v60, %v4809_v39 }
 0x709   : > { %v2623_v30 = vpop.f32.mrf.mxu2 }
 0x70a   : > { %v2624_v34 = vadd.f32 %v2623_v30, %v5136_v44  ;;  %v5243_v30 = vsub.f32 %v5141_v45, %v2712_v9 }
 0x70c   : > { %v5189_v28 = vadd.f32 %v2624_v34, %v5050_v57  ;;  %v2669_v34 = vpop.xlane.xlu2 %2668 }
 0x70d   : > { %v2713_v45 = vmul.f32 %v2669_v34, %v4809_v39 }
 0x70e   : > { %v2682_v48 = vsel %vm885_vm0, %v5189_v28, 0.0 }
 0x70f   : > { %2683 = vadd.xlane.f32.xlu1 %v2682_v48 }
 0x711   : > { %v2625_v26 = vpop.f32.mrf.mxu2 }
 0x712   : > { %v2626_v49 = vadd.f32 %v2625_v26, %v5136_v44 }
 0x714   : > { %v5195_v32 = vadd.f32 %v2626_v49, %v5053_v24 }
 0x716   : > { %v2685_v15 = vsel %vm885_vm0, %v5195_v32, 0.0 }
 0x717   : > { %2686 = vadd.xlane.f32.xlu2 %v2685_v15  ;;  %v2744_v15 = vmul.f32 %v5243_v30, %v5243_v30 }
 0x71c   : > { %v2638_v7 = vpop.f32.mrf.mxu3 }
 0x71d   : > { %v2639_v62 = vadd.f32 %v2638_v7, %v5136_v44 }
 0x724   : > { %v2640_v24 = vpop.f32.mrf.mxu3 }
 0x725   : > { %v2641_v1 = vadd.f32 %v2640_v24, %v5136_v44 }
 0x727   : > { %v5232_v6 = vadd.f32 %v2641_v1, %v5072_v37 }
 0x73a   : > { %v2672_v13 = vpop.xlane.xlu0 %2671 }
 0x73b   : > { %v2714_v54 = vmul.f32 %v2672_v13, %v4809_v39 }
 0x73c   : > { %v2628_v16 = vpop.f32.mrf.mxu2 }
 0x73d   : > { %v2629_v43 = vadd.f32 %v2628_v16, %v5136_v44  ;;  %v5235_v52 = vsub.f32 %v5160_v4, %v2714_v54  ;;  %v2703_v4 = vsel %vm885_vm0, %v5232_v6, 0.0 }
 0x73f   : > { %v5201_v57 = vadd.f32 %v2629_v43, %v5088_v29  ;;  %v5213_v29 = vadd.f32 %v2639_v62, %v5069_v56  ;;  %v2746_v26 = vmul.f32 %v5235_v52, %v5235_v52  ;;  %v5265_v43 = vsub.f32 %v5148_v12, %v2713_v45 }
 0x741   : > { %v2688_v2 = vsel %vm885_vm0, %v5201_v57, 0.0  ;;  %v2700_v55 = vsel %vm885_vm0, %v5213_v29, 0.0  ;;  %v2766_v7 = vsel %vm885_vm0, %v2746_v26, 0.0 }
 0x742   : > { %2689 = vadd.xlane.f32.xlu0 %v2688_v2  ;;  %v2675_v48 = vpop.xlane.xlu1 %2674 }
 0x743   : > { %v2715_v49 = vmul.f32 %v2675_v48, %v4809_v39 }
 0x744   : > { %v2630_v14 = vpop.f32.mrf.mxu2 }
 0x745   : > { %v2631_v46 = vadd.f32 %v2630_v14, %v5136_v44  ;;  %v5268_v2 = vsub.f32 %v5170_v58, %v2715_v49  ;;  %v2745_v58 = vmul.f32 %v5265_v43, %v5265_v43 }
 0x747   : > { %v5207_v22 = vadd.f32 %v2631_v46, %v5091_v19  ;;  %v2747_v12 = vmul.f32 %v5268_v2, %v5268_v2 }
 0x749   : > { %v2691_v25 = vsel %vm885_vm0, %v5207_v22, 0.0 }
 0x74a   : > { %2692 = vadd.xlane.f32.xlu1 %v2691_v25  ;;  %v2678_v46 = vpop.xlane.xlu2 %2677 }
 0x74b   : > { %v2716_v24 = vmul.f32 %v2678_v46, %v4809_v39 }
 0x74d   : > { %v5282_v25 = vsub.f32 %v5177_v63, %v2716_v24 }
 0x74f   : > { %v2643_v21 = vpop.f32.mrf.mxu3 }
 0x751   : > { %v2633_v40 = vpop.f32.mrf.mxu2 }
 0x752   : > { %v2634_v41 = vadd.f32 %v2633_v40, %v5136_v44  ;;  %2701 = vadd.xlane.f32.xlu1 %v2700_v55  ;;  %v2681_v11 = vpop.xlane.xlu0 %2680  ;;  %v2763_v40 = vsel %vm885_vm0, %v2745_v58, 0.0  ;;  %v2748_v55 = vmul.f32 %v5282_v25, %v5282_v25 }
 0x754   : > { %v5219_v19 = vadd.f32 %v2634_v41, %v5117_v10  ;;  %v2772_v41 = vsel %vm885_vm0, %v2748_v55, 0.0 }
 0x756   : > { %v2694_v18 = vsel %vm885_vm0, %v5219_v19, 0.0 }
 0x757   : > { %v2645_v56 = vpop.f32.mrf.mxu3  ;;  %2695 = vadd.xlane.f32.xlu2 %v2694_v18 }
 0x758   : > { %v2646_v3 = vadd.f32 %v2645_v56, %v5136_v44 }
 0x759   : > { %v2635_v47 = vpop.f32.mrf.mxu2 }
 0x75a   : > { %v2636_v33 = vadd.f32 %v2635_v47, %v5136_v44  ;;  %v5229_v10 = vadd.f32 %v2646_v3, %v5106_v0  ;;  %v2644_v0 = vadd.f32 %v2643_v21, %v5136_v44  ;;  %v2769_v21 = vsel %vm885_vm0, %v2747_v12, 0.0 }
 0x75c   : > { %v2709_v36 = vsel %vm885_vm0, %v5229_v10, 0.0  ;;  %v5240_v50 = vadd.f32 %v2636_v33, %v5120_v5  ;;  %v2717_v5 = vmul.f32 %v2681_v11, %v4809_v39  ;;  %v5256_v44 = vadd.f32 %v2644_v0, %v5103_v51 }
 0x75d   : > { %2710 = vadd.xlane.f32.xlu1 %v2709_v36  ;;  %v2760_v51 = vsel %vm885_vm0, %v2744_v15, 0.0 }
 0x75e   : > { %v2697_v37 = vsel %vm885_vm0, %v5240_v50, 0.0  ;;  %v5261_v16 = vsub.f32 %v5183_v35, %v2717_v5  ;;  %v2706_v14 = vsel %vm885_vm0, %v5256_v44, 0.0 }
 0x75f   : > { %2698 = vadd.xlane.f32.xlu0 %v2697_v37  ;;  %2704 = vadd.xlane.f32.xlu2 %v2703_v4 }
 0x760   : > { %v2749_v35 = vmul.f32 %v5261_v16, %v5261_v16 }
 0x762   : > { %v2775_v62 = vsel %vm885_vm0, %v2749_v35, 0.0 }
 0x765   : > { %2767 = vadd.xlane.f32.xlu1 %v2766_v7 }
 0x767   : > { %2707 = vadd.xlane.f32.xlu0 %v2706_v14  ;;  %2761 = vadd.xlane.f32.xlu2 %v2760_v51 }
 0x76d   : > { %2776 = vadd.xlane.f32.xlu1 %v2775_v62 }
 0x76f   : > { %2770 = vadd.xlane.f32.xlu2 %v2769_v21  ;;  %2764 = vadd.xlane.f32.xlu0 %v2763_v40 }
 0x777   : > { %2773 = vadd.xlane.f32.xlu0 %v2772_v41 }
 0x782   : > { %v2684_v13 = vpop.xlane.xlu1 %2683 }
 0x783   : > { %v2718_v1 = vmul.f32 %v2684_v13, %v4809_v39 }
 0x785   : > { %v5291_v18 = vsub.f32 %v5189_v28, %v2718_v1 }
 0x787   : > { %v2750_v63 = vmul.f32 %v5291_v18, %v5291_v18 }
 0x789   : > { %v2778_v60 = vsel %vm885_vm0, %v2750_v63, 0.0 }
 0x78a   : > { %2779 = vadd.xlane.f32.xlu2 %v2778_v60  ;;  %v2687_v56 = vpop.xlane.xlu2 %2686 }
 0x78b   : > { %v2719_v54 = vmul.f32 %v2687_v56, %v4809_v39 }
 0x78d   : > { %v5298_v3 = vsub.f32 %v5195_v32, %v2719_v54 }
 0x78f   : > { %v2751_v47 = vmul.f32 %v5298_v3, %v5298_v3 }
 0x791   : > { %v2781_v9 = vsel %vm885_vm0, %v2751_v47, 0.0 }
 0x792   : > { %2782 = vadd.xlane.f32.xlu0 %v2781_v9 }
 0x7b5   : > { %v2690_v28 = vpop.xlane.xlu0 %2689 }
 0x7b6   : > { %v2720_v33 = vmul.f32 %v2690_v28, %v4809_v39 }
 0x7b8   : > { %v5305_v36 = vsub.f32 %v5201_v57, %v2720_v33 }
 0x7ba   : > { %v2752_v11 = vmul.f32 %v5305_v36, %v5305_v36 }
 0x7bc   : > { %v2784_v0 = vsel %vm885_vm0, %v2752_v11, 0.0 }
 0x7bd   : > { %v2693_v37 = vpop.xlane.xlu1 %2692  ;;  %2785 = vadd.xlane.f32.xlu1 %v2784_v0 }
 0x7be   : > { %v2721_v32 = vmul.f32 %v2693_v37, %v4809_v39 }
 0x7c0   : > { %v5312_v4 = vsub.f32 %v5207_v22, %v2721_v32 }
 0x7c2   : > { %v2753_v34 = vmul.f32 %v5312_v4, %v5312_v4 }
 0x7c4   : > { %v2787_v48 = vsel %vm885_vm0, %v2753_v34, 0.0 }
 0x7c5   : > { %v2702_v5 = vpop.xlane.xlu1 %2701  ;;  %2788 = vadd.xlane.f32.xlu2 %v2787_v48 }
 0x7c6   : > { %v2724_v57 = vmul.f32 %v2702_v5, %v4809_v39 }
 0x7c8   : > { %v5319_v26 = vsub.f32 %v5213_v29, %v2724_v57 }
 0x7ca   : > { %v2696_v45 = vpop.xlane.xlu2 %2695  ;;  %v2756_v49 = vmul.f32 %v5319_v26, %v5319_v26 }
 0x7cb   : > { %v2722_v15 = vmul.f32 %v2696_v45, %v4809_v39 }
 0x7cc   : > { %v2796_v22 = vsel %vm885_vm0, %v2756_v49, 0.0 }
 0x7cd   : > { %v5326_v7 = vsub.f32 %v5219_v19, %v2722_v15  ;;  %2797 = vadd.xlane.f32.xlu2 %v2796_v22 }
 0x7cf   : > { %v2754_v14 = vmul.f32 %v5326_v7, %v5326_v7 }
 0x7d0   : > { %v2711_v51 = vpop.xlane.xlu1 %2710 }
 0x7d1   : > { %v2727_v46 = vmul.f32 %v2711_v51, %v4809_v39  ;;  %v2790_v29 = vsel %vm885_vm0, %v2754_v14, 0.0 }
 0x7d2   : > { %v2699_v35 = vpop.xlane.xlu0 %2698  ;;  %2791 = vadd.xlane.f32.xlu0 %v2790_v29  ;;  %v2705_v24 = vpop.xlane.xlu2 %2704 }
 0x7d3   : > { %v5333_v12 = vsub.f32 %v5229_v10, %v2727_v46  ;;  %v2723_v58 = vmul.f32 %v2699_v35, %v4809_v39  ;;  %v2725_v19 = vmul.f32 %v2705_v24, %v4809_v39 }
 0x7d5   : > { %v5338_v62 = vsub.f32 %v5240_v50, %v2723_v58  ;;  %v5341_v21 = vsub.f32 %v5232_v6, %v2725_v19  ;;  %v2759_v40 = vmul.f32 %v5333_v12, %v5333_v12 }
 0x7d7   : > { %v2805_v55 = vsel %vm885_vm0, %v2759_v40, 0.0  ;;  %v2755_v41 = vmul.f32 %v5338_v62, %v5338_v62  ;;  %v2757_v10 = vmul.f32 %v5341_v21, %v5341_v21 }
 0x7d8   : > { %v2768_v13 = vpop.xlane.xlu1 %2767  ;;  %2806 = vadd.xlane.f32.xlu2 %v2805_v55 }
 0x7d9   : > { %v2810_v1 = vmul.f32 %v2768_v13, %v4809_v39  ;;  %v2793_v50 = vsel %vm885_vm0, %v2755_v41, 0.0  ;;  %v2799_v6 = vsel %vm885_vm0, %v2757_v10, 0.0 }
 0x7da   : > { %2794 = vadd.xlane.f32.xlu1 %v2793_v50  ;;  %v2708_v63 = vpop.xlane.xlu0 %2707  ;;  %2800 = vadd.xlane.f32.xlu0 %v2799_v6  ;;  %v2762_v60 = vpop.xlane.xlu2 %2761 }
 0x7db   : > { %v2826_v56 = vadd.f32 1e-05, %v2810_v1  ;;  %v2726_v54 = vmul.f32 %v2708_v63, %v4809_v39  ;;  %v2808_v47 = vmul.f32 %v2762_v60, %v4809_v39 }
 0x7dd   : > { %3905 = vrsqrt.f32 %v2826_v56  ;;  %v5356_v9 = vsub.f32 %v5256_v44, %v2726_v54  ;;  %v2824_v28 = vadd.f32 1e-05, %v2808_v47  ;;  %vm2866_vm9 = vweird.f32 %v2826_v56 }
 0x7de   : > { %v5380_v47 = vperm.slane %v5133_v59, 5 }
 0x7df   : > { %3907 = vrsqrt.f32 %v2824_v28  ;;  %v2758_v33 = vmul.f32 %v5356_v9, %v5356_v9  ;;  %vm2846_vm12 = vweird.f32 %v2824_v28 }
 0x7e0   : > { %v2777_v11 = vpop.xlane.xlu1 %2776 }
 0x7e1   : > { %v2813_v0 = vmul.f32 %v2777_v11, %v4809_v39  ;;  %v2802_v37 = vsel %vm885_vm0, %v2758_v33, 0.0 }
 0x7e2   : > { %2803 = vadd.xlane.f32.xlu1 %v2802_v37  ;;  %v2765_v32 = vpop.xlane.xlu0 %2764  ;;  %v2771_v34 = vpop.xlane.xlu2 %2770 }
 0x7e3   : > { %v3906_v48 = vpop.eup %3905  ;;  %v5362_v5 = vadd.f32 1e-05, %v2813_v0  ;;  %v2809_v57 = vmul.f32 %v2765_v32, %v4809_v39  ;;  %v2811_v44 = vmul.f32 %v2771_v34, %v4809_v39 }
 0x7e4   : > { %v2861_v45 = vmul.f32 %v3906_v48, %v2826_v56  ;;  %vm2867_vm8 = vweird.f32 %v3906_v48 }
 0x7e5   : > { %v3908_v49 = vpop.eup %3907  ;;  %3909 = vrsqrt.f32 %v5362_v5  ;;  %v2825_v15 = vadd.f32 1e-05, %v2809_v57  ;;  %v5367_v22 = vadd.f32 1e-05, %v2811_v44  ;;  %vm2868_vm11 = vmor %vm2866_vm9, %vm2867_vm8  ;;  %v5387_v44 = vperm.slane %v5133_v59, 6 }
 0x7e6   : > { %v2862_v14 = vmul.f32 %v3906_v48, %v2861_v45  ;;  %v2841_v51 = vmul.f32 %v3908_v49, %v2824_v28  ;;  %vm2847_vm10 = vweird.f32 %v3908_v49  ;;  %v3759_v45 = vld [vmem:[%s4134_s27 + $0x80] sm:$0xff]   ;;  %vm2896_vm6 = vweird.f32 %v5362_v5 }
 0x7e7   : > { %3911 = vrsqrt.f32 %v2825_v15  ;;  %vm2848_vm13 = vmor %vm2846_vm12, %vm2847_vm10  ;;  %vm2856_vm1 = vweird.f32 %v2825_v15  ;;  %vm2876_vm3 = vweird.f32 %v5367_v22 }
 0x7e8   : > { %v2863_v46 = vmul.f32 0.5, %v2862_v14  ;;  %v2842_v29 = vmul.f32 %v3908_v49, %v2841_v51  ;;  %3913 = vrsqrt.f32 %v5367_v22  ;;  %v3751_v14 = vld [vmem:[%s4134_s27 + $0x40] sm:$0xff]  }
 0x7ea   : > { %v2864_v35 = vsub.f32 1.5, %v2863_v46  ;;  %v2843_v24 = vmul.f32 0.5, %v2842_v29  ;;  %v2774_v58 = vpop.xlane.xlu0 %2773 }
 0x7eb   : > { %v5370_v19 = vpop.eup %3909  ;;  %v2812_v40 = vmul.f32 %v2774_v58, %v4809_v39  ;;  %v3714_v58 = vunpack.c.l.bf16 %v3759_v45 }
 0x7ec   : > { %v2865_v55 = vmul.f32 %v3906_v48, %v2864_v35  ;;  %v2844_v41 = vsub.f32 1.5, %v2843_v24  ;;  %v2891_v10 = vmul.f32 %v5370_v19, %v5362_v5  ;;  %vm2897_vm4 = vweird.f32 %v5370_v19 }
 0x7ed   : > { %v3912_v13 = vpop.eup %3911  ;;  %v5375_v1 = vadd.f32 1e-05, %v2812_v40  ;;  %v3682_v40 = vunpack.c.l.bf16 %v3751_v14  ;;  %vm5409_vm7 = vmor %vm2896_vm6, %vm2897_vm4 }
 0x7ee   : > { %v3914_v50 = vpop.eup %3913  ;;  %v2869_v6 = vsel %vm2868_vm11, %v3906_v48, %v2865_v55  ;;  %v2845_v63 = vmul.f32 %v3908_v49, %v2844_v41  ;;  %v2892_v60 = vmul.f32 %v5370_v19, %v2891_v10  ;;  %v2851_v56 = vmul.f32 %v3912_v13, %v2825_v15 }
 0x7ef   : > { %v2871_v54 = vmul.f32 %v3914_v50, %v5367_v22  ;;  %v3002_v33 = vmul.f32 %v2869_v6, %v5235_v52  ;;  %3915 = vrsqrt.f32 %v5375_v1  ;;  %vm2857_vm14 = vweird.f32 %v3912_v13 }
 0x7f0   : > { %v2849_v28 = vsel %vm2848_vm13, %v3908_v49, %v2845_v63  ;;  %v2852_v11 = vmul.f32 %v3912_v13, %v2851_v56  ;;  %v2893_v37 = vmul.f32 0.5, %v2892_v60  ;;  %v5393_v49 = vld [vmem:[%s4134_s27 + $0x88] sm:$0xff]   ;;  %vm2877_vm15 = vweird.f32 %v3914_v50  ;;  %vm2858_vm2 = vmor %vm2856_vm1, %vm2857_vm14 }
 0x7f1   : > { %v3000_v0 = vmul.f32 %v2849_v28, %v5243_v30  ;;  %v2872_v32 = vmul.f32 %v3914_v50, %v2871_v54  ;;  %v3019_v52 = vmul.f32 %v5380_v47, %v3002_v33  ;;  %v3718_v41 = vunpack.c.l.bf16 %v5393_v49  ;;  %vm2878_vm5 = vmor %vm2876_vm3, %vm2877_vm15 }
 0x7f2   : > { %v2853_v34 = vmul.f32 0.5, %v2852_v11  ;;  %v2894_v46 = vsub.f32 1.5, %v2893_v37  ;;  %v3683_v11 = vunpack.c.h.bf16 %v3751_v14  ;;  %v3715_v37 = vunpack.c.h.bf16 %v3759_v45 }
 0x7f3   : > { %v2873_v48 = vmul.f32 0.5, %v2872_v32  ;;  %v3017_v57 = vmul.f32 %v5380_v47, %v3000_v0  ;;  %v3036_v63 = vadd.f32 %v5387_v44, %v3019_v52  ;;  %vm2886_vm9 = vweird.f32 %v5375_v1 }
 0x7f4   : > { %v2854_v51 = vsub.f32 1.5, %v2853_v34  ;;  %v2895_v15 = vmul.f32 %v5370_v19, %v2894_v46 }
 0x7f5   : > { %v2874_v29 = vsub.f32 1.5, %v2873_v48  ;;  %v3034_v30 = vadd.f32 %v5387_v44, %v3017_v57  ;;  %v3916_v35 = vpop.eup %3915 }
 0x7f6   : > { %v2855_v24 = vmul.f32 %v3912_v13, %v2854_v51  ;;  %v2881_v55 = vmul.f32 %v3916_v35, %v5375_v1  ;;  %v2899_v5 = vsel %vm5409_vm7, %v5370_v19, %v2895_v15  ;;  %vm2887_vm8 = vweird.f32 %v3916_v35  ;;  %v3752_v19 = vld [vmem:[%s4134_s27 + $0x48] sm:$0xff]  }
 0x7f7   : > { %v2875_v59 = vmul.f32 %v3914_v50, %v2874_v29  ;;  %v3050_v6 = vadd.f32 %v3034_v30, %v4151_v61  ;;  %v3005_v51 = vmul.f32 %v2899_v5, %v5261_v16  ;;  %vm2888_vm10 = vmor %vm2886_vm9, %vm2887_vm8 }
 0x7f8   : > { %v2859_v10 = vsel %vm2858_vm2, %v3912_v13, %v2855_v24  ;;  %v2882_v54 = vmul.f32 %v3916_v35, %v2881_v55  ;;  %v3687_v55 = vunpack.c.h.bf16 %v3752_v19 }
 0x7f9   : > { %v3001_v60 = vmul.f32 %v2859_v10, %v5265_v43  ;;  %v2879_v56 = vsel %vm2878_vm5, %v3914_v50, %v2875_v59  ;;  %v3196_v33 = vmul.f32 %v3714_v58, %v3050_v6  ;;  %v3132_v28 = vmul.f32 %v3682_v40, %v3050_v6  ;;  %v3753_v6 = vld [vmem:[%s4134_s27 + $0x50] sm:$0xff]  }
 0x7fa   : > { %v3003_v22 = vmul.f32 %v2879_v56, %v5268_v2  ;;  %v2883_v0 = vmul.f32 0.5, %v2882_v54  ;;  %v3052_v2 = vadd.f32 %v3036_v63, %v4177_v23  ;;  %v3022_v10 = vmul.f32 %v5380_v47, %v3005_v51 }
 0x7fb   : > { %v3018_v13 = vmul.f32 %v5380_v47, %v3001_v60  ;;  %v3212_v43 = vsel %vm885_vm0, %v3196_v33, 0.0  ;;  %v3148_v50 = vsel %vm885_vm0, %v3132_v28, 0.0  ;;  %v3690_v60 = vunpack.c.l.bf16 %v3753_v6 }
 0x7fc   : > { %v3020_v32 = vmul.f32 %v5380_v47, %v3003_v22  ;;  %v2884_v34 = vsub.f32 1.5, %v2883_v0  ;;  %3213 = vadd.xlane.f32.xlu2 %v3212_v43  ;;  %3149 = vadd.xlane.f32.xlu0 %v3148_v50  ;;  %v3198_v46 = vmul.f32 %v3718_v41, %v3052_v2  ;;  %v3719_v50 = vunpack.c.h.bf16 %v5393_v49 }
 0x7fd   : > { %v2780_v48 = vpop.xlane.xlu2 %2779  ;;  %v3035_v57 = vadd.f32 %v5387_v44, %v3018_v13 }
 0x7fe   : > { %v2814_v45 = vmul.f32 %v2780_v48, %v4809_v39  ;;  %v2885_v14 = vmul.f32 %v3916_v35, %v2884_v34  ;;  %v3037_v29 = vadd.f32 %v5387_v44, %v3020_v32  ;;  %v3218_v16 = vsel %vm885_vm0, %v3198_v46, 0.0 }
 0x7ff   : > { %v3051_v23 = vadd.f32 %v3035_v57, %v4164_v8  ;;  %v3686_v8 = vunpack.c.l.bf16 %v3752_v19 }
 0x800   : > { %v2830_v52 = vadd.f32 1e-05, %v2814_v45  ;;  %v2889_v30 = vsel %vm2888_vm10, %v3916_v35, %v2885_v14  ;;  %v3053_v35 = vadd.f32 %v3037_v29, %v4179_v27  ;;  %v3761_v27 = vld [vmem:[%s4134_s27 + $0x90] sm:$0xff]  }
 0x801   : > { %v3133_v24 = vmul.f32 %v3683_v11, %v3051_v23  ;;  %v3197_v58 = vmul.f32 %v3715_v37, %v3051_v23  ;;  %v3004_v40 = vmul.f32 %v2889_v30, %v5282_v25  ;;  %v3134_v56 = vmul.f32 %v3686_v8, %v3052_v2 }
 0x802   : > { %3917 = vrsqrt.f32 %v2830_v52  ;;  %v3135_v28 = vmul.f32 %v3687_v55, %v3053_v35  ;;  %v3039_v11 = vadd.f32 %v5387_v44, %v3022_v10  ;;  %v3723_v43 = vunpack.c.h.bf16 %v3761_v27 }
 0x803   : > { %v3151_v59 = vsel %vm885_vm0, %v3133_v24, 0.0  ;;  %v3215_v1 = vsel %vm885_vm0, %v3197_v58, 0.0  ;;  %v3021_v41 = vmul.f32 %v5380_v47, %v3004_v40  ;;  %v3154_v61 = vsel %vm885_vm0, %v3134_v56, 0.0 }
 0x804   : > { %3152 = vadd.xlane.f32.xlu1 %v3151_v59  ;;  %3219 = vadd.xlane.f32.xlu2 %v3218_v16  ;;  %v3157_v32 = vsel %vm885_vm0, %v3135_v28, 0.0  ;;  %v3722_v5 = vunpack.c.l.bf16 %v3761_v27  ;;  %v3199_v57 = vmul.f32 %v3719_v50, %v3053_v35  ;;  %vm2906_vm12 = vweird.f32 %v2830_v52  ;;  %v3754_v59 = vld [vmem:[%s4134_s27 + $0x58] sm:$0xff]  }
 0x805   : > { %3216 = vadd.xlane.f32.xlu0 %v3215_v1  ;;  %v2783_v25 = vpop.xlane.xlu0 %2782  ;;  %v3038_v15 = vadd.f32 %v5387_v44, %v3021_v41  ;;  %v3694_v16 = vunpack.c.l.bf16 %v3754_v59  ;;  %v3762_v41 = vld [vmem:[%s4134_s27 + $0x98] sm:$0xff]  }
 0x806   : > { %v2815_v63 = vmul.f32 %v2783_v25, %v4809_v39  ;;  %v3221_v29 = vsel %vm885_vm0, %v3199_v57, 0.0  ;;  %v3727_v28 = vunpack.c.h.bf16 %v3762_v41 }
 0x807   : > { %v3054_v33 = vadd.f32 %v3038_v15, %v4219_v17  ;;  %v3055_v17 = vadd.f32 %v3039_v11, %v4221_v20  ;;  %v3691_v20 = vunpack.c.h.bf16 %v3753_v6  ;;  %v3726_v6 = vunpack.c.l.bf16 %v3762_v41 }
 0x808   : > { %v3918_v54 = vpop.eup %3917  ;;  %v2831_v22 = vadd.f32 1e-05, %v2815_v63 }
 0x809   : > { %v2901_v0 = vmul.f32 %v3918_v54, %v2830_v52  ;;  %v3136_v13 = vmul.f32 %v3690_v60, %v3054_v33  ;;  %vm2907_vm11 = vweird.f32 %v3918_v54  ;;  %v3201_v14 = vmul.f32 %v3723_v43, %v3055_v17 }
 0x80a   : > { %3919 = vrsqrt.f32 %v2831_v22  ;;  %v3200_v23 = vmul.f32 %v3722_v5, %v3054_v33  ;;  %vm2908_vm13 = vmor %vm2906_vm12, %vm2907_vm11  ;;  %v3137_v8 = vmul.f32 %v3691_v20, %v3055_v17  ;;  %vm2916_vm15 = vweird.f32 %v2831_v22 }
 0x80b   : > { %v2902_v37 = vmul.f32 %v3918_v54, %v2901_v0  ;;  %v3160_v2 = vsel %vm885_vm0, %v3136_v13, 0.0  ;;  %v3227_v24 = vsel %vm885_vm0, %v3201_v14, 0.0 }
 0x80c   : > { %3155 = vadd.xlane.f32.xlu1 %v3154_v61  ;;  %3161 = vadd.xlane.f32.xlu2 %v3160_v2  ;;  %v3224_v58 = vsel %vm885_vm0, %v3200_v23, 0.0  ;;  %v3163_v25 = vsel %vm885_vm0, %v3137_v8, 0.0 }
 0x80d   : > { %v2903_v34 = vmul.f32 0.5, %v2902_v37  ;;  %3158 = vadd.xlane.f32.xlu0 %v3157_v32 }
 0x80f   : > { %v2904_v48 = vsub.f32 1.5, %v2903_v34 }
 0x810   : > { %v3920_v45 = vpop.eup %3919 }
 0x811   : > { %v2905_v51 = vmul.f32 %v3918_v54, %v2904_v48  ;;  %v2911_v49 = vmul.f32 %v3920_v45, %v2831_v22  ;;  %vm2917_vm14 = vweird.f32 %v3920_v45  ;;  %v3695_v22 = vunpack.c.h.bf16 %v3754_v59  ;;  %v5474_v59 = vld [vmem:[%s4134_s27 + $0x60] sm:$0xff]  }
 0x812   : > { %vm2918_vm1 = vmor %vm2916_vm15, %vm2917_vm14 }
 0x813   : > { %v2909_v46 = vsel %vm2908_vm13, %v3918_v54, %v2905_v51  ;;  %v2912_v19 = vmul.f32 %v3920_v45, %v2911_v49 }
 0x814   : > { %v3006_v30 = vmul.f32 %v2909_v46, %v5291_v18  ;;  %3222 = vadd.xlane.f32.xlu1 %v3221_v29  ;;  %3228 = vadd.xlane.f32.xlu2 %v3227_v24 }
 0x815   : > { %v2913_v40 = vmul.f32 0.5, %v2912_v19  ;;  %3225 = vadd.xlane.f32.xlu0 %v3224_v58 }
 0x816   : > { %v3023_v52 = vmul.f32 %v5380_v47, %v3006_v30 }
 0x817   : > { %v2914_v1 = vsub.f32 1.5, %v2913_v40  ;;  %v5471_v40 = vld [vmem:[%s4134_s27 + $0xa0] sm:$0xff]  }
 0x818   : > { %v3040_v55 = vadd.f32 %v5387_v44, %v3023_v52  ;;  %v3730_v41 = vunpack.c.l.bf16 %v5471_v40 }
 0x819   : > { %v2915_v35 = vmul.f32 %v3920_v45, %v2914_v1 }
 0x81a   : > { %v3056_v18 = vadd.f32 %v3040_v55, %v4274_v42 }
 0x81b   : > { %v2919_v10 = vsel %vm2918_vm1, %v3920_v45, %v2915_v35 }
 0x81c   : > { %v3007_v63 = vmul.f32 %v2919_v10, %v5298_v3  ;;  %3164 = vadd.xlane.f32.xlu1 %v3163_v25  ;;  %v3138_v15 = vmul.f32 %v3694_v16, %v3056_v18  ;;  %v3202_v54 = vmul.f32 %v3726_v6, %v3056_v18 }
 0x81e   : > { %v3166_v60 = vsel %vm885_vm0, %v3138_v15, 0.0  ;;  %v3024_v56 = vmul.f32 %v5380_v47, %v3007_v63  ;;  %v3230_v11 = vsel %vm885_vm0, %v3202_v54, 0.0 }
 0x81f   : > { %3167 = vadd.xlane.f32.xlu0 %v3166_v60 }
 0x820   : > { %v3041_v33 = vadd.f32 %v5387_v44, %v3024_v56 }
 0x822   : > { %v3057_v42 = vadd.f32 %v3041_v33, %v4272_v38 }
 0x824   : > { %3231 = vadd.xlane.f32.xlu1 %v3230_v11  ;;  %v3139_v27 = vmul.f32 %v3695_v22, %v3057_v42  ;;  %v3203_v0 = vmul.f32 %v3727_v28, %v3057_v42 }
 0x826   : > { %v3169_v3 = vsel %vm885_vm0, %v3139_v27, 0.0  ;;  %v3233_v13 = vsel %vm885_vm0, %v3203_v0, 0.0 }
 0x827   : > { %3170 = vadd.xlane.f32.xlu2 %v3169_v3  ;;  %3234 = vadd.xlane.f32.xlu0 %v3233_v13 }
 0x830   : > { %v2786_v37 = vpop.xlane.xlu1 %2785 }
 0x831   : > { %v2816_v61 = vmul.f32 %v2786_v37, %v4809_v39 }
 0x833   : > { %v2832_v43 = vadd.f32 1e-05, %v2816_v61 }
 0x835   : > { %3921 = vrsqrt.f32 %v2832_v43  ;;  %vm2926_vm3 = vweird.f32 %v2832_v43 }
 0x838   : > { %v2789_v50 = vpop.xlane.xlu2 %2788 }
 0x839   : > { %v2817_v2 = vmul.f32 %v2789_v50, %v4809_v39 }
 0x83b   : > { %v3922_v38 = vpop.eup %3921  ;;  %v2833_v32 = vadd.f32 1e-05, %v2817_v2 }
 0x83c   : > { %v2921_v17 = vmul.f32 %v3922_v38, %v2832_v43  ;;  %vm2927_vm2 = vweird.f32 %v3922_v38 }
 0x83d   : > { %3923 = vrsqrt.f32 %v2833_v32  ;;  %vm2928_vm4 = vmor %vm2926_vm3, %vm2927_vm2  ;;  %vm2936_vm6 = vweird.f32 %v2833_v32 }
 0x83e   : > { %v2922_v5 = vmul.f32 %v3922_v38, %v2921_v17 }
 0x840   : > { %v2923_v34 = vmul.f32 0.5, %v2922_v5  ;;  %v2798_v48 = vpop.xlane.xlu2 %2797 }
 0x841   : > { %v2820_v57 = vmul.f32 %v2798_v48, %v4809_v39  ;;  %v3731_v48 = vunpack.c.h.bf16 %v5471_v40 }
 0x842   : > { %v2924_v45 = vsub.f32 1.5, %v2923_v34 }
 0x843   : > { %v3924_v14 = vpop.eup %3923  ;;  %v2836_v23 = vadd.f32 1e-05, %v2820_v57 }
 0x844   : > { %v2925_v51 = vmul.f32 %v3922_v38, %v2924_v45  ;;  %v2931_v49 = vmul.f32 %v3924_v14, %v2833_v32  ;;  %vm2937_vm5 = vweird.f32 %v3924_v14 }
 0x845   : > { %3925 = vrsqrt.f32 %v2836_v23  ;;  %v2792_v46 = vpop.xlane.xlu0 %2791  ;;  %vm2938_vm7 = vmor %vm2936_vm6, %vm2937_vm5  ;;  %vm2966_vm9 = vweird.f32 %v2836_v23 }
 0x846   : > { %v2929_v19 = vsel %vm2928_vm4, %v3922_v38, %v2925_v51  ;;  %v2932_v29 = vmul.f32 %v3924_v14, %v2931_v49  ;;  %v2818_v20 = vmul.f32 %v2792_v46, %v4809_v39  ;;  %v5702_v49 = vld [vmem:[#allocation4_spill] sm:$0xff] }
 0x847   : > { %v3008_v30 = vmul.f32 %v2929_v19, %v5305_v36  ;;  %v3698_v36 = vunpack.c.l.bf16 %v5474_v59  ;;  %v3699_v19 = vunpack.c.h.bf16 %v5474_v59 }
 0x848   : > { %v2933_v24 = vmul.f32 0.5, %v2932_v29  ;;  %v5468_v58 = vadd.f32 1e-05, %v2818_v20 }
 0x849   : > { %v3025_v52 = vmul.f32 %v5380_v47, %v3008_v30 }
 0x84a   : > { %v2934_v1 = vsub.f32 1.5, %v2933_v24  ;;  %3927 = vrsqrt.f32 %v5468_v58  ;;  %vm2946_vm12 = vweird.f32 %v5468_v58 }
 0x84b   : > { %v3926_v8 = vpop.eup %3925  ;;  %v2807_v55 = vpop.xlane.xlu2 %2806  ;;  %v3042_v16 = vadd.f32 %v5387_v44, %v3025_v52 }
 0x84c   : > { %v2935_v35 = vmul.f32 %v3924_v14, %v2934_v1  ;;  %v2961_v18 = vmul.f32 %v3926_v8, %v2836_v23  ;;  %v2823_v10 = vmul.f32 %v2807_v55, %v4809_v39  ;;  %vm2967_vm8 = vweird.f32 %v3926_v8  ;;  %v5523_v55 = vld [vmem:[%s4134_s27 + $0x68] sm:$0xff]  }
 0x84d   : > { %v2795_v25 = vpop.xlane.xlu1 %2794  ;;  %v2801_v6 = vpop.xlane.xlu0 %2800  ;;  %v3058_v63 = vadd.f32 %v3042_v16, %v4140_v53  ;;  %vm5502_vm10 = vmor %vm2966_vm9, %vm2967_vm8 }
 0x84e   : > { %v2939_v15 = vsel %vm2938_vm7, %v3924_v14, %v2935_v35  ;;  %v2962_v60 = vmul.f32 %v3926_v8, %v2961_v18  ;;  %v5483_v56 = vadd.f32 1e-05, %v2823_v10  ;;  %v2819_v54 = vmul.f32 %v2795_v25, %v4809_v39  ;;  %v5528_v18 = vld [vmem:[%s4134_s27 + $0xa8] sm:$0xff]  }
 0x84f   : > { %v3009_v33 = vmul.f32 %v2939_v15, %v5312_v4  ;;  %v2821_v22 = vmul.f32 %v2801_v6, %v4809_v39  ;;  %v3204_v28 = vmul.f32 %v3730_v41, %v3058_v63  ;;  %v3140_v42 = vmul.f32 %v3698_v36, %v3058_v63 }
 0x850   : > { %v3928_v11 = vpop.eup %3927  ;;  %v2963_v27 = vmul.f32 0.5, %v2962_v60  ;;  %3929 = vrsqrt.f32 %v5483_v56  ;;  %v5489_v0 = vadd.f32 1e-05, %v2819_v54  ;;  %v3702_v6 = vunpack.c.l.bf16 %v5523_v55 }
 0x851   : > { %v2941_v53 = vmul.f32 %v3928_v11, %v5468_v58  ;;  %v5492_v3 = vadd.f32 1e-05, %v2821_v22  ;;  %v3236_v13 = vsel %vm885_vm0, %v3204_v28, 0.0  ;;  %v3172_v4 = vsel %vm885_vm0, %v3140_v42, 0.0 }
 0x852   : > { %v2964_v37 = vsub.f32 1.5, %v2963_v27  ;;  %3931 = vrsqrt.f32 %v5489_v0  ;;  %3237 = vadd.xlane.f32.xlu2 %v3236_v13  ;;  %3173 = vadd.xlane.f32.xlu1 %v3172_v4  ;;  %v3026_v43 = vmul.f32 %v5380_v47, %v3009_v33  ;;  %vm2947_vm11 = vweird.f32 %v3928_v11  ;;  %v5703_v27 = vld [vmem:[#allocation5_spill] sm:$0xff] }
 0x853   : > { %v2942_v61 = vmul.f32 %v3928_v11, %v2941_v53  ;;  %3933 = vrsqrt.f32 %v5492_v3  ;;  %vm2948_vm13 = vmor %vm2946_vm12, %vm2947_vm11  ;;  %v3734_v22 = vunpack.c.l.bf16 %v5528_v18  ;;  %vm2956_vm1 = vweird.f32 %v5489_v0  ;;  %v3757_v13 = vld [vmem:[%s4134_s27 + $0x70] sm:$0xff]  }
 0x854   : > { %v2965_v50 = vmul.f32 %v3926_v8, %v2964_v37  ;;  %v3043_v32 = vadd.f32 %v5387_v44, %v3026_v43  ;;  %vm2976_vm4 = vweird.f32 %v5492_v3  ;;  %vm2996_vm6 = vweird.f32 %v5483_v56 }
 0x855   : > { %v2943_v2 = vmul.f32 0.5, %v2942_v61  ;;  %v2804_v38 = vpop.xlane.xlu1 %2803  ;;  %vm3279_vm11 = vcmask 130112   ;;  %vm3287_vm12 = vcmask 261312  }
 0x856   : > { %v5500_v17 = vpop.eup %3929  ;;  %v2822_v34 = vmul.f32 %v2804_v38, %v4809_v39  ;;  %v2969_v57 = vsel %vm5502_vm10, %v3926_v8, %v2965_v50  ;;  %v3059_v46 = vadd.f32 %v3043_v32, %v5702_v49 }
 0x857   : > { %v2944_v45 = vsub.f32 1.5, %v2943_v2  ;;  %v2991_v14 = vmul.f32 %v5500_v17, %v5483_v56  ;;  %v3012_v24 = vmul.f32 %v2969_v57, %v5319_v26  ;;  %vm2997_vm2 = vweird.f32 %v5500_v17 }
 0x858   : > { %v3932_v23 = vpop.eup %3931  ;;  %v5512_v51 = vadd.f32 1e-05, %v2822_v34  ;;  %v3205_v59 = vmul.f32 %v3731_v48, %v3059_v46  ;;  %v3141_v41 = vmul.f32 %v3699_v19, %v3059_v46  ;;  %v3706_v34 = vunpack.c.l.bf16 %v3757_v13  ;;  %vm5552_vm7 = vmor %vm2996_vm6, %vm2997_vm2 }
 0x859   : > { %v3934_v29 = vpop.eup %3933  ;;  %v2945_v39 = vmul.f32 %v3928_v11, %v2944_v45  ;;  %v2992_v20 = vmul.f32 %v5500_v17, %v2991_v14  ;;  %v2951_v30 = vmul.f32 %v3932_v23, %v5489_v0  ;;  %vm2957_vm14 = vweird.f32 %v3932_v23 }
 0x85a   : > { %v2971_v40 = vmul.f32 %v3934_v29, %v5492_v3  ;;  %3935 = vrsqrt.f32 %v5512_v51  ;;  %v3239_v35 = vsel %vm885_vm0, %v3205_v59, 0.0  ;;  %v3175_v10 = vsel %vm885_vm0, %v3141_v41, 0.0  ;;  %vm2958_vm3 = vmor %vm2956_vm1, %vm2957_vm14  ;;  %v5708_v41 = vld [vmem:[#allocation6_spill] sm:$0xff] }
 0x85b   : > { %v2949_v52 = vsel %vm2948_vm13, %v3928_v11, %v2945_v39  ;;  %v2993_v1 = vmul.f32 0.5, %v2992_v20  ;;  %v2952_v8 = vmul.f32 %v3932_v23, %v2951_v30  ;;  %3240 = vadd.xlane.f32.xlu1 %v3239_v35  ;;  %3176 = vadd.xlane.f32.xlu0 %v3175_v10  ;;  %vm2977_vm15 = vweird.f32 %v3934_v29  ;;  %v5707_v39 = vld [vmem:[#allocation3_spill] sm:$0xff] }
 0x85c   : > { %v3010_v58 = vmul.f32 %v2949_v52, %v5326_v7  ;;  %v2972_v16 = vmul.f32 %v3934_v29, %v2971_v40  ;;  %v3029_v7 = vmul.f32 %v5380_v47, %v3012_v24  ;;  %vm2978_vm5 = vmor %vm2976_vm4, %vm2977_vm15  ;;  %v3735_v46 = vunpack.c.h.bf16 %v5528_v18  ;;  %v3765_v24 = vld [vmem:[%s4134_s27 + $0xb0] sm:$0xff]  }
 0x85d   : > { %v2953_v36 = vmul.f32 0.5, %v2952_v8  ;;  %v2994_v63 = vsub.f32 1.5, %v2993_v1  ;;  %v3703_v19 = vunpack.c.h.bf16 %v5523_v55  ;;  %vm2986_vm9 = vweird.f32 %v5512_v51 }
 0x85e   : > { %v2973_v26 = vmul.f32 0.5, %v2972_v16  ;;  %v3027_v25 = vmul.f32 %v5380_v47, %v3010_v58  ;;  %v3046_v43 = vadd.f32 %v5387_v44, %v3029_v7  ;;  %v3707_v58 = vunpack.c.h.bf16 %v3757_v13  ;;  %v3766_v7 = vld [vmem:[%s4134_s27 + $0xb8] sm:$0xff]  }
 0x85f   : > { %v2954_v15 = vsub.f32 1.5, %v2953_v36  ;;  %v2995_v37 = vmul.f32 %v5500_v17, %v2994_v63  ;;  %v3738_v16 = vunpack.c.l.bf16 %v3765_v24  ;;  %v3739_v18 = vunpack.c.h.bf16 %v3765_v24 }
 0x860   : > { %v3936_v60 = vpop.eup %3935  ;;  %v2974_v54 = vsub.f32 1.5, %v2973_v26  ;;  %v3044_v33 = vadd.f32 %v5387_v44, %v3027_v25  ;;  %vm3291_vm13 = vcmask 326912   ;;  %vm3295_vm14 = vcmask 392512  }
 0x861   : > { %v2955_v28 = vmul.f32 %v3932_v23, %v2954_v15  ;;  %v2981_v42 = vmul.f32 %v3936_v60, %v5512_v51  ;;  %vm2987_vm8 = vweird.f32 %v3936_v60  ;;  %v5579_v15 = vadd.s32 4294967288, %v4513_v31 }
 0x862   : > { %v2975_v11 = vmul.f32 %v3934_v29, %v2974_v54  ;;  %v3060_v53 = vadd.f32 %v3044_v33, %v5703_v27  ;;  %vm2988_vm10 = vmor %vm2986_vm9, %vm2987_vm8  ;;  %v3742_v33 = vunpack.c.l.bf16 %v3766_v7  ;;  %vm3299_vm15 = vcmask 458112  }
 0x863   : > { %v2959_v4 = vsel %vm2958_vm3, %v3932_v23, %v2955_v28  ;;  %v2982_v61 = vmul.f32 %v3936_v60, %v2981_v42  ;;  %v2999_v23 = vsel %vm5552_vm7, %v5500_v17, %v2995_v37  ;;  %vm3303_vm1 = vcmask 523712  }
 0x864   : > { %v3011_v0 = vmul.f32 %v2959_v4, %v5338_v62  ;;  %v2979_v50 = vsel %vm2978_vm5, %v3934_v29, %v2975_v11  ;;  %v3142_v2 = vmul.f32 %v3702_v6, %v3060_v53  ;;  %v3206_v38 = vmul.f32 %v3734_v22, %v3060_v53  ;;  %v5710_v53 = vld [vmem:[#allocation9_spill] sm:$0xff] }
 0x865   : > { %v3013_v32 = vmul.f32 %v2979_v50, %v5341_v21  ;;  %v2983_v5 = vmul.f32 0.5, %v2982_v61  ;;  %v5706_v21 = vld [vmem:[#allocation7_spill] sm:$0xff]  ;;  %v3015_v40 = vmul.f32 %v2999_v23, %v5333_v12  ;;  %vm3307_vm2 = vcmask 589312  }
 0x866   : > { %v3178_v3 = vsel %vm885_vm0, %v3142_v2, 0.0  ;;  %v3242_v48 = vsel %vm885_vm0, %v3206_v38, 0.0  ;;  %v3028_v57 = vmul.f32 %v5380_v47, %v3011_v0  ;;  %v3062_v14 = vadd.f32 %v3046_v43, %v5706_v21 }
 0x867   : > { %v2984_v62 = vsub.f32 1.5, %v2983_v5  ;;  %3179 = vadd.xlane.f32.xlu2 %v3178_v3  ;;  %3243 = vadd.xlane.f32.xlu0 %v3242_v48  ;;  %v3030_v56 = vmul.f32 %v5380_v47, %v3013_v32  ;;  %v3743_v5 = vunpack.c.h.bf16 %v3766_v7  ;;  %v3293_v7 = vadd.s32 4294967256, %v4513_v31 }
 0x868   : > { %v3045_v49 = vadd.f32 %v5387_v44, %v3028_v57  ;;  %v3144_v1 = vmul.f32 %v3706_v34, %v3062_v14  ;;  %v3208_v10 = vmul.f32 %v3738_v16, %v3062_v14  ;;  %v3285_v16 = vadd.s32 4294967272, %v4513_v31 }
 0x869   : > { %v2985_v29 = vmul.f32 %v3936_v60, %v2984_v62  ;;  %v3047_v30 = vadd.f32 %v5387_v44, %v3030_v56  ;;  %vm3311_vm3 = vcmask 654912   ;;  %vm3315_vm4 = vcmask 720512  }
 0x86a   : > { %v3061_v20 = vadd.f32 %v3045_v49, %v5707_v39  ;;  %v3184_v12 = vsel %vm885_vm0, %v3144_v1, 0.0  ;;  %v3248_v28 = vsel %vm885_vm0, %v3208_v10, 0.0  ;;  %v3289_v10 = vadd.s32 4294967264, %v4513_v31 }
 0x86b   : > { %v2989_v52 = vsel %vm2988_vm10, %v3936_v60, %v2985_v29  ;;  %v3063_v36 = vadd.f32 %v3047_v30, %v5708_v41  ;;  %v3758_v60 = vld [vmem:[%s4134_s27 + $0x78] sm:$0xff]   ;;  %vm3319_vm5 = vcmask 786112   ;;  %vm3323_vm6 = vcmask 851712   ;;  %s3498_s27 = sshll.u32 %s5719_s30, 1 }
 0x86c   : > { %v3014_v17 = vmul.f32 %v2989_v52, %v5356_v9  ;;  %v3207_v8 = vmul.f32 %v3735_v46, %v3061_v20  ;;  %v3143_v59 = vmul.f32 %v3703_v19, %v3061_v20  ;;  %v3032_v9 = vmul.f32 %v5380_v47, %v3015_v40  ;;  %s577_s29 = scalar_lea.vmem %s5681_s8, %s3498_s27 }
 0x86d   : > { %v3145_v26 = vmul.f32 %v3707_v58, %v3063_v36  ;;  %v3209_v6 = vmul.f32 %v3739_v18, %v3063_v36  ;;  %v3710_v11 = vunpack.c.l.bf16 %v3758_v60  ;;  %v3711_v37 = vunpack.c.h.bf16 %v3758_v60 }
 0x86e   : > { %v3245_v55 = vsel %vm885_vm0, %v3207_v8, 0.0  ;;  %v3181_v51 = vsel %vm885_vm0, %v3143_v59, 0.0  ;;  %v3031_v35 = vmul.f32 %v5380_v47, %v3014_v17  ;;  %v3049_v63 = vadd.f32 %v5387_v44, %v3032_v9  ;;  %v5709_v47 = vld [vmem:[#allocation8_spill] sm:$0xff] }
 0x86f   : > { %3246 = vadd.xlane.f32.xlu2 %v3245_v55  ;;  %3182 = vadd.xlane.f32.xlu1 %v3181_v51  ;;  %v3150_v54 = vpop.xlane.xlu0 %3149  ;;  %v3187_v22 = vsel %vm885_vm0, %v3145_v26, 0.0  ;;  %v3214_v57 = vpop.xlane.xlu2 %3213  ;;  %v3281_v59 = vadd.s32 4294967280, %v4513_v31  ;;  %v3301_v60 = vadd.s32 4294967240, %v4513_v31  ;;  %vm3327_vm7 = vcmask 917312  }
 0x870   : > { %3185 = vadd.xlane.f32.xlu0 %v3184_v12  ;;  %v3048_v25 = vadd.f32 %v5387_v44, %v3031_v35  ;;  %v3251_v44 = vsel %vm885_vm0, %v3209_v6, 0.0  ;;  %v3065_v13 = vadd.f32 %v3049_v63, %v5710_v53  ;;  %v3276_v4 = vperm.slane %v3150_v54, %v4513_v31 }
 0x871   : > { %v3354_v55 = vperm.slane %v3214_v57, %v4513_v31  ;;  %v3297_v6 = vadd.s32 4294967248, %v4513_v31  ;;  %vm3331_vm8 = vcmask 982912   ;;  %vm3335_vm9 = vcmask 1048512  }
 0x872   : > { %v3064_v42 = vadd.f32 %v3048_v25, %v5709_v47  ;;  %v3147_v2 = vmul.f32 %v3711_v37, %v3065_v13  ;;  %v3211_v3 = vmul.f32 %v3743_v5, %v3065_v13  ;;  %v3309_v13 = vadd.s32 4294967224, %v4513_v31 }
 0x873   : > { %vm3386_vm10 = vcmask 1040384  }
 0x874   : > { %v3210_v0 = vmul.f32 %v3742_v33, %v3064_v42  ;;  %v3146_v50 = vmul.f32 %v3710_v11, %v3064_v42  ;;  %v3193_v34 = vsel %vm885_vm0, %v3147_v2, 0.0  ;;  %v3257_v48 = vsel %vm885_vm0, %v3211_v3, 0.0 }
 0x875   : > { %v3305_v42 = vadd.s32 4294967232, %v4513_v31  ;;  %v3317_v2 = vadd.s32 4294967208, %v4513_v31 }
 0x876   : > { %v3254_v38 = vsel %vm885_vm0, %v3210_v0, 0.0  ;;  %v3190_v32 = vsel %vm885_vm0, %v3146_v50, 0.0  ;;  %vm3283_vm0 = vcmask 195712  }
 0x877   : > { %v3153_v27 = vpop.xlane.xlu1 %3152  ;;  %3188 = vadd.xlane.f32.xlu2 %v3187_v22  ;;  %3249 = vadd.xlane.f32.xlu1 %v3248_v28  ;;  %v3220_v21 = vpop.xlane.xlu2 %3219 }
 0x878   : > { %v3278_v61 = vperm.slane %v3153_v27, %v5579_v15  ;;  %3252 = vadd.xlane.f32.xlu0 %v3251_v44  ;;  %v3217_v45 = vpop.xlane.xlu0 %3216  ;;  %v3357_v35 = vperm.slane %v3220_v21, %v3281_v59  ;;  %v3321_v21 = vadd.s32 4294967200, %v4513_v31 }
 0x879   : > { %v3355_v58 = vperm.slane %v3217_v45, %v5579_v15 }
 0x87a   : > { %v3280_v43 = vsel %vm3279_vm11, %v3278_v61, %v3276_v4 }
 0x87b   : > { %v3356_v18 = vsel %vm3279_vm11, %v3355_v58, %v3354_v55  ;;  %v3333_v58 = vadd.s32 4294967176, %v4513_v31 }
 0x87c   : > { %v3358_v63 = vsel %vm3283_vm0, %v3357_v35, %v3356_v18 }
 0x87f   : > { %3255 = vadd.xlane.f32.xlu2 %v3254_v38  ;;  %3191 = vadd.xlane.f32.xlu1 %v3190_v32  ;;  %v3156_v62 = vpop.xlane.xlu1 %3155  ;;  %v3162_v23 = vpop.xlane.xlu2 %3161 }
 0x880   : > { %3194 = vadd.xlane.f32.xlu0 %v3193_v34  ;;  %v3159_v14 = vpop.xlane.xlu0 %3158  ;;  %v3282_v51 = vperm.slane %v3156_v62, %v3281_v59  ;;  %v3290_v28 = vperm.slane %v3162_v23, %v3289_v10  ;;  %v3325_v23 = vadd.s32 4294967192, %v4513_v31 }
 0x881   : > { %v3286_v26 = vperm.slane %v3159_v14, %v3285_v16 }
 0x882   : > { %v3284_v25 = vsel %vm3283_vm0, %v3282_v51, %v3280_v43  ;;  %v3313_v43 = vadd.s32 4294967216, %v4513_v31 }
 0x883   : > { %v3288_v33 = vsel %vm3287_vm12, %v3286_v26, %v3284_v25 }
 0x884   : > { %v3292_v4 = vsel %vm3291_vm13, %v3290_v28, %v3288_v33 }
 0x887   : > { %3258 = vadd.xlane.f32.xlu1 %v3257_v48  ;;  %v3223_v56 = vpop.xlane.xlu1 %3222  ;;  %v3229_v29 = vpop.xlane.xlu2 %3228 }
 0x888   : > { %v3226_v49 = vpop.xlane.xlu0 %3225  ;;  %v3359_v9 = vperm.slane %v3223_v56, %v3285_v16  ;;  %v3363_v61 = vperm.slane %v3229_v29, %v3293_v7 }
 0x889   : > { %v3361_v15 = vperm.slane %v3226_v49, %v3289_v10 }
 0x88a   : > { %v3360_v54 = vsel %vm3287_vm12, %v3359_v9, %v3358_v63 }
 0x88b   : > { %v3362_v27 = vsel %vm3291_vm13, %v3361_v15, %v3360_v54 }
 0x88c   : > { %v3364_v38 = vsel %vm3295_vm14, %v3363_v61, %v3362_v27 }
 0x88f   : > { %v3165_v46 = vpop.xlane.xlu1 %3164 }
 0x890   : > { %v3294_v22 = vperm.slane %v3165_v46, %v3293_v7 }
 0x892   : > { %v3168_v19 = vpop.xlane.xlu0 %3167  ;;  %v3296_v50 = vsel %vm3295_vm14, %v3294_v22, %v3292_v4 }
 0x893   : > { %v3298_v47 = vperm.slane %v3168_v19, %v3297_v6  ;;  %v3329_v19 = vadd.s32 4294967184, %v4513_v31 }
 0x895   : > { %v3300_v32 = vsel %vm3299_vm15, %v3298_v47, %v3296_v50 }
 0x897   : > { %v3232_v39 = vpop.xlane.xlu1 %3231 }
 0x898   : > { %v3365_v44 = vperm.slane %v3232_v39, %v3297_v6 }
 0x89a   : > { %v5595_v20 = vpop.xlane.xlu0 %3234  ;;  %v3171_v30 = vpop.xlane.xlu2 %3170  ;;  %v3366_v34 = vsel %vm3299_vm15, %v3365_v44, %v3364_v38 }
 0x89b   : > { %v3302_v53 = vperm.slane %v3171_v30, %v3301_v60  ;;  %v3367_v3 = vperm.slane %v5595_v20, %v3301_v60 }
 0x89d   : > { %v3304_v48 = vsel %vm3303_vm1, %v3302_v53, %v3300_v32  ;;  %v3368_v39 = vsel %vm3303_vm1, %v3367_v3, %v3366_v34 }
 0x8c5   : > { %v5597_v24 = vpop.xlane.xlu1 %3173  ;;  %v5599_v40 = vpop.xlane.xlu2 %3237 }
 0x8c6   : > { %v3306_v5 = vperm.slane %v5597_v24, %v3305_v42  ;;  %v3369_v45 = vperm.slane %v5599_v40, %v3305_v42 }
 0x8c8   : > { %v3308_v49 = vsel %vm3307_vm2, %v3306_v5, %v3304_v48  ;;  %v3370_v24 = vsel %vm3307_vm2, %v3369_v45, %v3368_v39 }
 0x8ce   : > { %v5601_v52 = vpop.xlane.xlu0 %3176  ;;  %v5603_v1 = vpop.xlane.xlu1 %3240 }
 0x8cf   : > { %v3310_v57 = vperm.slane %v5601_v52, %v3309_v13  ;;  %v3371_v14 = vperm.slane %v5603_v1, %v3309_v13 }
 0x8d1   : > { %v3312_v20 = vsel %vm3311_vm3, %v3310_v57, %v3308_v49 }
 0x8da   : > { %v5605_v17 = vpop.xlane.xlu0 %3243  ;;  %v5607_v8 = vpop.xlane.xlu2 %3179 }
 0x8db   : > { %v3314_v62 = vperm.slane %v5607_v8, %v3313_v43  ;;  %v3373_v46 = vperm.slane %v5605_v17, %v3313_v43  ;;  %v3372_v17 = vsel %vm3311_vm3, %v3371_v14, %v3370_v24 }
 0x8dd   : > { %v3316_v40 = vsel %vm3315_vm4, %v3314_v62, %v3312_v20  ;;  %v3374_v55 = vsel %vm3315_vm4, %v3373_v46, %v3372_v17 }
 0x8e2   : > { %v5613_v41 = vpop.xlane.xlu1 %3182  ;;  %v5615_v36 = vpop.xlane.xlu2 %3246 }
 0x8e3   : > { %v5617_v12 = vpop.xlane.xlu0 %3185  ;;  %v3318_v56 = vperm.slane %v5613_v41, %v3317_v2  ;;  %v3375_v30 = vperm.slane %v5615_v36, %v3317_v2 }
 0x8e4   : > { %v3322_v52 = vperm.slane %v5617_v12, %v3321_v21 }
 0x8e5   : > { %v3320_v8 = vsel %vm3319_vm5, %v3318_v56, %v3316_v40  ;;  %v3376_v36 = vsel %vm3319_vm5, %v3375_v30, %v3374_v55 }
 0x8e6   : > { %v3324_v12 = vsel %vm3323_vm6, %v3322_v52, %v3320_v8 }
 0x8ea   : > { %v3250_v11 = vpop.xlane.xlu1 %3249  ;;  %v3189_v37 = vpop.xlane.xlu2 %3188 }
 0x8eb   : > { %v3253_v0 = vpop.xlane.xlu0 %3252  ;;  %v3377_v1 = vperm.slane %v3250_v11, %v3321_v21  ;;  %v3326_v59 = vperm.slane %v3189_v37, %v3325_v23 }
 0x8ec   : > { %v3379_v35 = vperm.slane %v3253_v0, %v3325_v23 }
 0x8ed   : > { %v3378_v18 = vsel %vm3323_vm6, %v3377_v1, %v3376_v36  ;;  %v3328_v26 = vsel %vm3327_vm7, %v3326_v59, %v3324_v12 }
 0x8ee   : > { %v3380_v6 = vsel %vm3327_vm7, %v3379_v35, %v3378_v18 }
 0x8f2   : > { %v3192_v29 = vpop.xlane.xlu1 %3191  ;;  %v3256_v16 = vpop.xlane.xlu2 %3255 }
 0x8f3   : > { %v3330_v51 = vperm.slane %v3192_v29, %v3329_v19  ;;  %v3195_v41 = vpop.xlane.xlu0 %3194  ;;  %v3381_v9 = vperm.slane %v3256_v16, %v3329_v19 }
 0x8f4   : > { %v3334_v10 = vperm.slane %v3195_v41, %v3333_v58 }
 0x8f5   : > { %v3332_v25 = vsel %vm3331_vm8, %v3330_v51, %v3328_v26  ;;  %v3382_v15 = vsel %vm3331_vm8, %v3381_v9, %v3380_v6 }
 0x8f6   : > { %v3336_v7 = vsel %vm3335_vm9, %v3334_v10, %v3332_v25 }
 0x8fa   : > { %v3259_v31 = vpop.xlane.xlu1 %3258 }
 0x8fb   : > { %v3383_v63 = vperm.slane %v3259_v31, %v3333_v58 }
 0x8fd   : > { %v3384_v60 = vsel %vm3335_vm9, %v3383_v63, %v3382_v15 }
 0x8fe   : > { %v3387_v54 = vsel %vm3386_vm10, %v3336_v7, %v3384_v60 }
 0x8ff   : > { %v3636_v33 = vmul.f32 -1.442695, %v3387_v54 }
 0x901   : > { %3937 = vpow2.f32 %v3636_v33 }
 0x907   : > { %v3938_v22 = vpop.eup %3937 }
 0x908   : > { %v3391_v28 = vadd.f32 1.0, %v3938_v22 }
 0x90a   : > { %3939 = vrcp.f32 %v3391_v28  ;;  %v3403_v27 = vand.u32 2147483648, %v3391_v28  ;;  %v3401_v53 = vand.u32 2147483647, %v3391_v28  ;;  %vm3397_vm0 = vweird.f32 %v3391_v28 }
 0x90c   : > { %v3404_v37 = vor.u32 1.1754944e-38, %v3403_v27  ;;  %vm3402_vm13 = vcmp.eq.f32.partialorder %v3401_v53, 8.507059e+37 }
 0x910   : > { %v3940_v47 = vpop.eup %3939 }
 0x911   : > { %v3393_v42 = vmul.f32 %v3940_v47, %v3391_v28  ;;  %vm3398_vm11 = vweird.f32 %v3940_v47 }
 0x912   : > { %vm3399_vm12 = vmor %vm3397_vm0, %vm3398_vm11 }
 0x913   : > { %v3394_v11 = vsub.f32 1.0, %v3393_v42 }
 0x915   : > { %v3395_v44 = vmul.f32 %v3940_v47, %v3394_v11 }
 0x917   : > { %v3396_v13 = vadd.f32 %v3940_v47, %v3395_v44 }
 0x919   : > { %v3400_v4 = vsel %vm3399_vm12, %v3940_v47, %v3396_v13 }
 0x91a   : > { %v3405_v61 = vsel %vm3402_vm13, %v3404_v37, %v3400_v4 }
 0x91b   : > { %3407 = vst [vmem:[%s577_s29] sm:$0x3] %v3405_v61 }
 0x91c PF: > { %p15_p11 = scmp.ge.s32.totalorder %s4034_s9, 4   ;;  %s5711_s27 = smov %s3960_s28 }
 0x91d   : > { %s5712_s28 = smov %s4043_s12  ;;  %s5713_s29 = smov %s4034_s9 }
 0x91e   :  { %17 = sbr.rel (!%p15_p11) target bundleno = 2 (0x2), region = 139 }

</bundles_post_ra>
